<compile_context>
chip_gen: v7x
topology: tpu7x:2x2x1
jax: 0.10.0
libtpu: 0.0.40
codegen_flags: <defaults>
</compile_context>

<pallas_src>
import functools

import numpy as np

import jax
import jax.numpy as jnp
from jax import lax
from jax.experimental import pallas as pl
from jax.experimental.pallas import tpu as pltpu

_SSIM_KSIZE = 11
_SSIM_HALF = (_SSIM_KSIZE - 1) // 2
_SSIM_SIGMA = 1.5
_SSIM_K1 = 0.01
_SSIM_K2 = 0.03


def _gaussian_taps():
    """Normalized separable 1-D taps of the piq 11x11 sigma=1.5 gaussian window."""
    coords = np.arange(_SSIM_KSIZE, dtype=np.float32) - (_SSIM_KSIZE - 1) / 2.0
    g = np.exp(-(coords ** 2) / (2.0 * _SSIM_SIGMA ** 2))
    return (g / g.sum()).astype(np.float32)


_TAPS = tuple(float(v) for v in _gaussian_taps())


def _band_matrix(m):
    """(M, M-10) matrix with the 11 gaussian taps on a sliding band.

    jnp.dot(f, band)[:, w] == sum_q taps[q] * f[:, w + q] (the 'valid' 1-D conv
    along the mel axis), so the whole mel-axis filter pass becomes one small MXU
    matmul per filtered array.  Size is only M*(M-10)*4 bytes (~22 KB at M=80).
    """
    wo = m - _SSIM_KSIZE + 1
    taps = _gaussian_taps()
    band = np.zeros((m, wo), np.float32)
    for q in range(_SSIM_KSIZE):
        for w in range(wo):
            band[w + q, w] = taps[q]
    return band


def _loss_kernel(bpg,
                 mel_len_sref, phon_len_sref,            # scalar prefetch (SMEM)
                 mel_out_ref, postnet_ref, mel_tgt_ref,  # (1, T, M) each
                 dur_ref,                                # (1, 2, L): [pred, target] log-dur
                 vec_ref,                                # (1, 4, T): [pitch, energy, avg_pitch, avg_energy]
                 band_ref,                               # (M, Wo) constant gaussian band
                 out_ref):                               # (1, 1, 8) resident accumulator
    _, T, M = mel_out_ref.shape
    L = dur_ref.shape[2]
    Ho = T - _SSIM_KSIZE + 1
    Wo = M - _SSIM_KSIZE + 1

    g = pl.program_id(0)
    b = pl.program_id(1)
    sample = g * bpg + b

    @pl.when(b == 0)
    def _init():
        out_ref[...] = jnp.zeros_like(out_ref)

    mel_len = mel_len_sref[sample]
    phon_len = phon_len_sref[sample]
    mel_len_f = mel_len.astype(jnp.float32)
    phon_len_f = phon_len.astype(jnp.float32)

    mel_out = mel_out_ref[0]                             # (T, M)
    postnet = postnet_ref[0]
    mel_tgt = mel_tgt_ref[0]

    # validity masks for this sample
    mask3b = lax.broadcasted_iota(jnp.int32, (T, M), 0) < mel_len
    mask3 = mask3b.astype(jnp.float32)                   # (T, M)
    mask_t = (lax.broadcasted_iota(jnp.int32, (1, T), 1) < mel_len).astype(jnp.float32)
    mask_l = (lax.broadcasted_iota(jnp.int32, (1, L), 1) < phon_len).astype(jnp.float32)

    # ---- per-sample masked MSE (== nn.MSELoss on x[i, :len_i]) -- exact f32 ----
    def mse3(pred, tgt):
        d = (pred - tgt) * mask3
        s = jnp.sum(jnp.sum(d * d, axis=1, keepdims=True), axis=0, keepdims=True)
        return s / (mel_len_f * float(M))                # (1, 1)

    mel_val = mse3(mel_out, mel_tgt)
    post_val = mse3(postnet, mel_tgt)

    d2 = dur_ref[0]                                      # (2, L)
    dd = (d2[0:1, :] - d2[1:2, :]) * mask_l
    dur_val = jnp.sum(dd * dd, axis=1, keepdims=True) / phon_len_f      # (1, 1)

    v4 = vec_ref[0]                                      # (4, T)
    dv = (v4[0:2, :] - v4[2:4, :]) * mask_t              # pitch / energy diffs
    sq = jnp.sum(dv * dv, axis=1, keepdims=True) / mel_len_f            # (2, 1)
    pitch_val = sq[0:1, :]
    energy_val = sq[1:2, :]

    # ---- SSIM (piq / speechbrain semantics on the (T, M) "image") ----
    # TODO(synk): piq's avg_pool2d downsample branch (f = round(min(T, M)/256) > 1) is
    # skipped; it is a no-op for T, M < 384 so results are exact at these shapes.
    def minmax_norm(v):
        vmax = jnp.max(jnp.max(jnp.where(mask3b, v, 0.0), axis=1, keepdims=True),
                       axis=0, keepdims=True)
        vmin = jnp.min(jnp.min(jnp.where(mask3b, v, jnp.inf), axis=1, keepdims=True),
                       axis=0, keepdims=True)
        # exact divide: one scalar per image, its error would multiply into every
        # SSIM input, so the approx reciprocal is reserved for the (T, Wo) maps.
        return (v - vmin) / (vmax - vmin + 1e-8)

    x_img = minmax_norm(mel_tgt) * mask3   # target image (first SSIM operand in torch)
    y_img = minmax_norm(mel_out) * mask3   # prediction image

    # second moments computed once (saves 3 muls/elem per tap inside the filter loop)
    xx = x_img * x_img
    yy = y_img * y_img
    xy = x_img * y_img

    def frame_filter(arr):
        # Centered symmetric 11-tap gaussian along the frame (sublane) axis, built
        # from XLU rolls; rows [HALF, HALF+Ho) hold the 'valid' filter outputs (the
        # circularly wrapped rows are discarded after the SSIM map is formed).
        # Pairing the symmetric taps halves the scale-multiplies and makes the result
        # independent of the roll direction convention.
        acc = _TAPS[_SSIM_HALF] * arr
        for j in range(1, _SSIM_HALF + 1):
            pair = (pltpu.roll(arr, shift=j, axis=0)
                    + pltpu.roll(arr, shift=T - j, axis=0))
            acc = acc + _TAPS[_SSIM_HALF - j] * pair
        return acc

    fx = frame_filter(x_img)
    fy = frame_filter(y_img)
    fxx = frame_filter(xx)
    fyy = frame_filter(yy)
    fxy = frame_filter(xy)

    # mel-axis 11-tap gaussian (valid) as a tiny banded matmul on the (idle) MXU.
    band = band_ref[...]                                 # (M, Wo)
    dot = functools.partial(jnp.dot, precision=lax.Precision.HIGHEST,
                            preferred_element_type=jnp.float32)
    mu_x = dot(fx, band)                                 # (T, Wo)
    mu_y = dot(fy, band)
    exx = dot(fxx, band)
    eyy = dot(fyy, band)
    exy = dot(fxy, band)

    c1 = _SSIM_K1 ** 2
    c2 = _SSIM_K2 ** 2
    sxx = exx - mu_x * mu_x
    syy = eyy - mu_y * mu_y
    sxy = exy - mu_x * mu_y
    cs = (2.0 * sxy + c2) * pl.reciprocal(sxx + syy + c2, approx=True)
    lum = (2.0 * mu_x * mu_y + c1) * pl.reciprocal(mu_x * mu_x + mu_y * mu_y + c1,
                                                   approx=True)
    ss = lum * cs                                        # (T, Wo); valid frame rows only
    ss_valid = ss[_SSIM_HALF:_SSIM_HALF + Ho, :]         # (Ho, Wo), single slice
    ssim_val = jnp.sum(jnp.sum(ss_valid, axis=1, keepdims=True), axis=0,
                       keepdims=True) / float(Ho * Wo)   # (1, 1)

    # ---- accumulate all six per-sample losses into the resident (1, 1, 8) output ----
    lane = lax.broadcasted_iota(jnp.int32, (1, 8), 1)
    step = (jnp.where(lane == 0, mel_val, 0.0)
            + jnp.where(lane == 1, post_val, 0.0)
            + jnp.where(lane == 2, dur_val, 0.0)
            + jnp.where(lane == 3, pitch_val, 0.0)
            + jnp.where(lane == 4, energy_val, 0.0)
            + jnp.where(lane == 5, ssim_val, 0.0))
    out_ref[0] = out_ref[0] + step


def _pallas_loss(mel_out, postnet, mel_tgt, dur2, vec4, mel_length, phon_len, band):
    B, T, M = mel_out.shape
    L = dur2.shape[2]
    Wo = M - _SSIM_KSIZE + 1

    # Split the batch over a leading "parallel" group axis so multi-TensorCore parts
    # (v7x megacore) can shard the per-sample work; each group owns its own partial
    # row which the wrapper reduces.  On 1-TC parts this is just 1 extra grid step.
    groups = 2 if (B >= 2 and B % 2 == 0) else 1
    bpg = B // groups

    kernel = functools.partial(_loss_kernel, bpg)

    mel_spec = pl.BlockSpec((1, T, M), lambda g, b, ml, pln: (g * bpg + b, 0, 0))
    dur_spec = pl.BlockSpec((1, 2, L), lambda g, b, ml, pln: (g * bpg + b, 0, 0))
    vec_spec = pl.BlockSpec((1, 4, T), lambda g, b, ml, pln: (g * bpg + b, 0, 0))
    band_spec = pl.BlockSpec((M, Wo), lambda g, b, ml, pln: (0, 0))   # resident constant

    grid_spec = pltpu.PrefetchScalarGridSpec(
        num_scalar_prefetch=2,                 # mel_length, phon_len -> SMEM
        grid=(groups, bpg),
        in_specs=[mel_spec, mel_spec, mel_spec, dur_spec, vec_spec, band_spec],
        out_specs=pl.BlockSpec((1, 1, 8), lambda g, b, ml, pln: (g, 0, 0)),
    )

    # Honest per-step working set: three double-buffered (1,T,M) inputs, the packed
    # vectors, the resident band constant, and ~22 (T,M)-sized f32 SSIM intermediates
    # (x/y images, 3 moments, 5 filtered arrays, 5 (T,Wo) maps, masks, temporaries).
    mel_bytes = T * M * 4
    per_step = (3 * 2 * mel_bytes
                + 2 * (4 * T + 2 * L) * 4
                + 2 * M * Wo * 4
                + 22 * mel_bytes
                + (2 << 20))
    try:  # generation-aware cap (v7x: 64 MiB physical VMEM; v5e/v6e: 128 MiB)
        phys = int(getattr(pltpu.get_tpu_info(), "vmem_capacity_bytes", 64 << 20))
    except Exception:  # conservative fallback if the query is unavailable
        phys = 64 << 20
    cap = max(phys - (16 << 20), 16 << 20)
    vmem_limit = int(min(cap, max(32 << 20, per_step)))

    # TODO(synk): for very long production utterances (T of several thousand frames)
    # add an inner T-tile reduction axis with a 10-frame halo for the SSIM frame pass;
    # at typical TTS shapes the per-sample working set fits VMEM comfortably.
    # TODO(synk): with M (mel bins, e.g. 80) on the lane axis the SSIM VPU ops run at
    # ~M/128 lane occupancy; a pltpu.einshape transpose putting T on lanes could
    # recover that, at the cost of re-validating the roll / band-matmul axes.
    return pl.pallas_call(
        kernel,
        out_shape=jax.ShapeDtypeStruct((groups, 1, 8), jnp.float32),
        grid_spec=grid_spec,
        compiler_params=pltpu.CompilerParams(
            dimension_semantics=("parallel", "arbitrary"),
            vmem_limit_bytes=vmem_limit),
    )(mel_length, phon_len, mel_out, postnet, mel_tgt, dur2, vec4, band)


class Loss:
    """JAX/Pallas port of the FastSpeech2 Loss module (forward pass only)."""

    def __init__(self, log_scale_durations, ssim_loss_weight, duration_loss_weight,
                 pitch_loss_weight, energy_loss_weight, mel_loss_weight,
                 postnet_mel_loss_weight, spn_loss_weight=1.0, spn_loss_max_epochs=8):
        self.log_scale_durations = log_scale_durations
        self.ssim_loss_weight = ssim_loss_weight
        self.mel_loss_weight = mel_loss_weight
        self.postnet_mel_loss_weight = postnet_mel_loss_weight
        self.duration_loss_weight = duration_loss_weight
        self.pitch_loss_weight = pitch_loss_weight
        self.energy_loss_weight = energy_loss_weight
        self.spn_loss_weight = spn_loss_weight
        self.spn_loss_max_epochs = spn_loss_max_epochs

    def __call__(self, predictions, targets, current_epoch):
        # current_epoch / spn loss is declared but never used in the reference forward.
        (mel_target, target_durations, _target_pitch, _target_energy,
         mel_length, phon_len) = targets
        (mel_out, postnet_mel_out, log_durations, predicted_pitch, average_pitch,
         predicted_energy, average_energy, _mel_lens) = predictions

        f32 = jnp.float32
        predicted_pitch = predicted_pitch[..., 0].astype(f32)
        predicted_energy = predicted_energy[..., 0].astype(f32)
        target_pitch = average_pitch[..., 0].astype(f32)   # matches the torch forward
        target_energy = average_energy[..., 0].astype(f32)
        log_durations = log_durations[..., 0].astype(f32)

        if self.log_scale_durations:
            log_target_durations = jnp.log1p(target_durations.astype(f32))
        else:
            # torch only defines log_target_durations when log_scale_durations=True;
            # fall back to raw durations otherwise.
            log_target_durations = target_durations.astype(f32)

        B, _, M = mel_target.shape
        dur2 = jnp.stack([log_durations, log_target_durations], axis=1)   # (B, 2, L)
        vec4 = jnp.stack([predicted_pitch, predicted_energy,
                          target_pitch, target_energy], axis=1)           # (B, 4, T)
        band = jnp.asarray(_band_matrix(M))

        out = _pallas_loss(
            mel_out.astype(f32), postnet_mel_out.astype(f32), mel_target.astype(f32),
            dur2, vec4,
            mel_length.astype(jnp.int32).reshape(B),
            phon_len.astype(jnp.int32).reshape(B),
            band)

        sums = jnp.sum(out, axis=(0, 1)) / B             # (8,) batch means
        mel_loss = sums[0] * self.mel_loss_weight
        postnet_mel_loss = sums[1] * self.postnet_mel_loss_weight
        dur_loss = sums[2] * self.duration_loss_weight
        pitch_loss = sums[3] * self.pitch_loss_weight
        energy_loss = sums[4] * self.energy_loss_weight
        # clamp mirrors the .item()-based [0, 1] clamp in speechbrain's SSIMLoss wrapper
        ssim_loss = jnp.clip(1.0 - sums[5], 0.0, 1.0) * self.ssim_loss_weight
        total_loss = (ssim_loss + mel_loss + postnet_mel_loss + dur_loss
                      + pitch_loss + energy_loss)
        # TODO(synk): spn_loss path (spn_loss_weight / spn_loss_max_epochs) is unused in
        # the reference forward; intentionally not implemented.
        return {'total_loss': total_loss, 'ssim_loss': ssim_loss, 'mel_loss': mel_loss,
                'postnet_mel_loss': postnet_mel_loss, 'dur_loss': dur_loss,
                'pitch_loss': pitch_loss, 'energy_loss': energy_loss}


def _reference_loss(predictions, targets, weights, log_scale_durations=True):
    """Pure NumPy reference mirroring the PyTorch forward, for validation."""
    (mel_target, target_durations, _tp, _te, mel_length, phon_len) = [np.asarray(t) for t in targets]
    (mel_out, postnet_mel_out, log_durations, predicted_pitch, average_pitch,
     predicted_energy, average_energy, _ml) = [np.asarray(p) for p in predictions]
    predicted_pitch = predicted_pitch[..., 0]
    predicted_energy = predicted_energy[..., 0]
    target_pitch = average_pitch[..., 0]
    target_energy = average_energy[..., 0]
    log_durations = log_durations[..., 0]
    log_tgt_dur = np.log1p(target_durations.astype(np.float32)) if log_scale_durations \
        else target_durations.astype(np.float32)

    B, T, M = mel_target.shape
    mel_loss = post_loss = dur_loss = pitch_loss = energy_loss = 0.0
    for i in range(B):
        ml = int(mel_length[i])
        pln = int(phon_len[i])
        mel_loss += np.mean((mel_out[i, :ml] - mel_target[i, :ml]) ** 2)
        post_loss += np.mean((postnet_mel_out[i, :ml] - mel_target[i, :ml]) ** 2)
        dur_loss += np.mean((log_durations[i, :pln] - log_tgt_dur[i, :pln]) ** 2)
        pitch_loss += np.mean((predicted_pitch[i, :ml] - target_pitch[i, :ml]) ** 2)
        energy_loss += np.mean((predicted_energy[i, :ml] - target_energy[i, :ml]) ** 2)
    mel_loss /= B; post_loss /= B; dur_loss /= B; pitch_loss /= B; energy_loss /= B

    # SSIM reference (direct 11x11 valid cross-correlation)
    mask = (np.arange(T)[None, :] < mel_length[:, None])[:, :, None]
    def norm(x):
        mx = np.max(np.where(mask, x, 0.0), axis=(1, 2), keepdims=True)
        mn = np.min(np.where(mask, x, np.inf), axis=(1, 2), keepdims=True)
        return (x - mn) / (mx - mn + 1e-8)
    xs = (norm(mel_target) * mask).astype(np.float32)
    ys = (norm(mel_out) * mask).astype(np.float32)
    w = _gaussian_taps(); k2d = np.outer(w, w)
    Ho, Wo = T - _SSIM_KSIZE + 1, M - _SSIM_KSIZE + 1
    def conv(img):
        out = np.zeros((Ho, Wo), np.float32)
        for p in range(Ho):
            for q in range(Wo):
                out[p, q] = np.sum(img[p:p + _SSIM_KSIZE, q:q + _SSIM_KSIZE] * k2d)
        return out
    c1, c2 = _SSIM_K1 ** 2, _SSIM_K2 ** 2
    score = 0.0
    for b in range(B):
        mu_x, mu_y = conv(xs[b]), conv(ys[b])
        sxx = conv(xs[b] * xs[b]) - mu_x ** 2
        syy = conv(ys[b] * ys[b]) - mu_y ** 2
        sxy = conv(xs[b] * ys[b]) - mu_x * mu_y
        cs = (2 * sxy + c2) / (sxx + syy + c2)
        ss = (2 * mu_x * mu_y + c1) / (mu_x ** 2 + mu_y ** 2 + c1) * cs
        score += ss.mean()
    score /= B
    ssim_loss = min(max(1.0 - score, 0.0), 1.0)

    d = {'ssim_loss': ssim_loss * weights['ssim'], 'mel_loss': mel_loss * weights['mel'],
         'postnet_mel_loss': post_loss * weights['postnet'], 'dur_loss': dur_loss * weights['dur'],
         'pitch_loss': pitch_loss * weights['pitch'], 'energy_loss': energy_loss * weights['energy']}
    d['total_loss'] = sum(d.values())
    return d


if __name__ == "__main__":
    key = jax.random.PRNGKey(0)
    B, T, M, L = 2, 32, 16, 8   # batch, mel frames, mel bins (>= 11 for SSIM), phonemes
    ks = jax.random.split(key, 9)

    mel_target = jax.random.normal(ks[0], (B, T, M), jnp.float32)
    mel_out = jax.random.normal(ks[1], (B, T, M), jnp.float32)
    postnet_mel_out = jax.random.normal(ks[2], (B, T, M), jnp.float32)
    log_durations = jax.random.normal(ks[3], (B, L, 1), jnp.float32)
    target_durations = jax.random.randint(ks[4], (B, L), 1, 6).astype(jnp.float32)
    predicted_pitch = jax.random.normal(ks[5], (B, T, 1), jnp.float32)
    average_pitch = jax.random.normal(ks[6], (B, T, 1), jnp.float32)
    predicted_energy = jax.random.normal(ks[7], (B, T, 1), jnp.float32)
    average_energy = jax.random.normal(ks[8], (B, T, 1), jnp.float32)
    mel_length = jnp.array([26, 32], jnp.int32)
    phon_len = jnp.array([6, 8], jnp.int32)
    target_pitch = jnp.zeros((B, T, 1), jnp.float32)   # overwritten in forward (unused)
    target_energy = jnp.zeros((B, T, 1), jnp.float32)  # overwritten in forward (unused)

    predictions = (mel_out, postnet_mel_out, log_durations, predicted_pitch, average_pitch,
                   predicted_energy, average_energy, mel_length)
    targets = (mel_target, target_durations, target_pitch, target_energy, mel_length, phon_len)

    loss_fn = Loss(log_scale_durations=True, ssim_loss_weight=1.0, duration_loss_weight=1.0,
                   pitch_loss_weight=1.0, energy_loss_weight=1.0, mel_loss_weight=1.0,
                   postnet_mel_loss_weight=1.0)
    loss = loss_fn(predictions, targets, current_epoch=0)
    loss = jax.tree_util.tree_map(jax.block_until_ready, loss)

    ref = _reference_loss(predictions, targets,
                          weights=dict(ssim=1.0, mel=1.0, postnet=1.0, dur=1.0,
                                       pitch=1.0, energy=1.0))
    # MSE losses are exact f32; the SSIM path additionally carries approx-reciprocal
    # (EUP) rounding on the elementwise maps, well inside the 5e-3 tolerance.
    for k in ref:
        np.testing.assert_allclose(float(loss[k]), ref[k], rtol=5e-3, atol=5e-3,
                                   err_msg=f"mismatch in {k}")
    print("KERNEL_OK")
</pallas_src>

<mosaic_0001>
module attributes {stable_mosaic.version = 11 : i64} {
  func.func @_loss_kernel(%arg0: i32, %arg1: i32, %arg2: memref<2xi32, #tpu.memory_space<smem>>, %arg3: memref<2xi32, #tpu.memory_space<smem>>, %arg4: memref<1x32x16xf32, #tpu.memory_space<vmem>>, %arg5: memref<1x32x16xf32, #tpu.memory_space<vmem>>, %arg6: memref<1x32x16xf32, #tpu.memory_space<vmem>>, %arg7: memref<1x2x8xf32, #tpu.memory_space<vmem>>, %arg8: memref<1x4x32xf32, #tpu.memory_space<vmem>>, %arg9: memref<16x6xf32, #tpu.memory_space<vmem>>, %arg10: memref<1x1x8xf32, #tpu.memory_space<vmem>>) attributes {dimension_semantics = [#tpu.dimension_semantics<parallel>, #tpu.dimension_semantics<arbitrary>], iteration_bounds = array<i64: 2, 1>, scalar_prefetch = 2 : i64, scratch_operands = 0 : i64, tpu.core_type = #tpu.core_type<tc>, window_params = [{transform_indices = @transform_0, window_bounds = array<i64: 1, 32, 16>}, {transform_indices = @transform_1, window_bounds = array<i64: 1, 32, 16>}, {transform_indices = @transform_2, window_bounds = array<i64: 1, 32, 16>}, {transform_indices = @transform_3, window_bounds = array<i64: 1, 2, 8>}, {transform_indices = @transform_4, window_bounds = array<i64: 1, 4, 32>}, {pipeline_mode = #tpu.pipeline_mode<synchronous>, transform_indices = @transform_5, window_bounds = array<i64: 16, 6>}, {transform_indices = @transform_6, window_bounds = array<i64: 1, 1, 8>}]} {
    %c1_i32 = arith.constant 1 : i32
    %0 = arith.muli %arg0, %c1_i32 : i32
    %1 = arith.addi %0, %arg1 : i32
    %c0_i32 = arith.constant 0 : i32
    %2 = arith.cmpi eq, %arg1, %c0_i32 : i32
    %3 = arith.extui %2 : i1 to i32
    %c0_i32_0 = arith.constant 0 : i32
    %4 = arith.cmpi ne, %3, %c0_i32_0 : i32
    scf.if %4 {
      %cst_141 = arith.constant 0.000000e+00 : f32
      %369 = vector.broadcast %cst_141 : f32 to vector<1x1x8xf32>
      %c0_142 = arith.constant 0 : index
      %c0_143 = arith.constant 0 : index
      %c0_144 = arith.constant 0 : index
      %370 = vector.load %arg10[%c0_142, %c0_143, %c0_144] : memref<1x1x8xf32, #tpu.memory_space<vmem>>, vector<1x1x8xf32>
      tpu.vector_store %arg10[%c0_142, %c0_143, %c0_144], %369 {strides = array<i32>} : memref<1x1x8xf32, #tpu.memory_space<vmem>>, vector<1x1x8xf32>,
    } else {
    }
    %5 = arith.index_cast %1 : i32 to index
    %6 = memref.load %arg2[%5] : memref<2xi32, #tpu.memory_space<smem>>
    %7 = arith.index_cast %1 : i32 to index
    %8 = memref.load %arg3[%7] : memref<2xi32, #tpu.memory_space<smem>>
    %9 = arith.sitofp %6 : i32 to f32
    %10 = arith.sitofp %8 : i32 to f32
    %c0 = arith.constant 0 : index
    %c0_1 = arith.constant 0 : index
    %c0_2 = arith.constant 0 : index
    %11 = vector.load %arg4[%c0, %c0_1, %c0_2] : memref<1x32x16xf32, #tpu.memory_space<vmem>>, vector<1x32x16xf32>
    %12 = vector.shape_cast %11 : vector<1x32x16xf32> to vector<32x16xf32>
    %c0_3 = arith.constant 0 : index
    %c0_4 = arith.constant 0 : index
    %c0_5 = arith.constant 0 : index
    %13 = vector.load %arg5[%c0_3, %c0_4, %c0_5] : memref<1x32x16xf32, #tpu.memory_space<vmem>>, vector<1x32x16xf32>
    %14 = vector.shape_cast %13 : vector<1x32x16xf32> to vector<32x16xf32>
    %c0_6 = arith.constant 0 : index
    %c0_7 = arith.constant 0 : index
    %c0_8 = arith.constant 0 : index
    %15 = vector.load %arg6[%c0_6, %c0_7, %c0_8] : memref<1x32x16xf32, #tpu.memory_space<vmem>>, vector<1x32x16xf32>
    %16 = vector.shape_cast %15 : vector<1x32x16xf32> to vector<32x16xf32>
    %17 = tpu.iota {dimensions = array<i32: 0>} : vector<32x16xi32>
    %18 = vector.broadcast %6 : i32 to vector<32x16xi32>
    %19 = arith.cmpi slt, %17, %18 : vector<32x16xi32>
    %20 = arith.extui %19 : vector<32x16xi1> to vector<32x16xi32>
    %21 = arith.sitofp %20 : vector<32x16xi32> to vector<32x16xf32>
    %22 = tpu.iota {dimensions = array<i32: 1>} : vector<1x32xi32>
    %23 = vector.broadcast %6 : i32 to vector<1x32xi32>
    %24 = arith.cmpi slt, %22, %23 : vector<1x32xi32>
    %25 = arith.extui %24 : vector<1x32xi1> to vector<1x32xi32>
    %26 = arith.sitofp %25 : vector<1x32xi32> to vector<1x32xf32>
    %27 = tpu.iota {dimensions = array<i32: 1>} : vector<1x8xi32>
    %28 = vector.broadcast %8 : i32 to vector<1x8xi32>
    %29 = arith.cmpi slt, %27, %28 : vector<1x8xi32>
    %30 = arith.extui %29 : vector<1x8xi1> to vector<1x8xi32>
    %31 = arith.sitofp %30 : vector<1x8xi32> to vector<1x8xf32>
    %32 = arith.subf %12, %16 : vector<32x16xf32>
    %33 = arith.mulf %32, %21 : vector<32x16xf32>
    %34 = arith.mulf %33, %33 : vector<32x16xf32>
    %cst = arith.constant dense<0.000000e+00> : vector<32xf32>
    %35 = vector.multi_reduction <add>, %34, %cst [1] : vector<32x16xf32> to vector<32xf32>
    %36 = vector.shape_cast %35 : vector<32xf32> to vector<32x1xf32>
    %cst_9 = arith.constant dense<0.000000e+00> : vector<1xf32>
    %37 = vector.multi_reduction <add>, %36, %cst_9 [0] : vector<32x1xf32> to vector<1xf32>
    %38 = vector.shape_cast %37 : vector<1xf32> to vector<1x1xf32>
    %cst_10 = arith.constant 1.600000e+01 : f32
    %39 = arith.mulf %9, %cst_10 : f32
    %40 = vector.broadcast %39 : f32 to vector<1x1xf32>
    %41 = arith.divf %38, %40 : vector<1x1xf32>
    %42 = arith.subf %14, %16 : vector<32x16xf32>
    %43 = arith.mulf %42, %21 : vector<32x16xf32>
    %44 = arith.mulf %43, %43 : vector<32x16xf32>
    %cst_11 = arith.constant dense<0.000000e+00> : vector<32xf32>
    %45 = vector.multi_reduction <add>, %44, %cst_11 [1] : vector<32x16xf32> to vector<32xf32>
    %46 = vector.shape_cast %45 : vector<32xf32> to vector<32x1xf32>
    %cst_12 = arith.constant dense<0.000000e+00> : vector<1xf32>
    %47 = vector.multi_reduction <add>, %46, %cst_12 [0] : vector<32x1xf32> to vector<1xf32>
    %48 = vector.shape_cast %47 : vector<1xf32> to vector<1x1xf32>
    %cst_13 = arith.constant 1.600000e+01 : f32
    %49 = arith.mulf %9, %cst_13 : f32
    %50 = vector.broadcast %49 : f32 to vector<1x1xf32>
    %51 = arith.divf %48, %50 : vector<1x1xf32>
    %c0_14 = arith.constant 0 : index
    %c0_15 = arith.constant 0 : index
    %c0_16 = arith.constant 0 : index
    %52 = vector.load %arg7[%c0_14, %c0_15, %c0_16] : memref<1x2x8xf32, #tpu.memory_space<vmem>>, vector<1x2x8xf32>
    %53 = vector.shape_cast %52 : vector<1x2x8xf32> to vector<2x8xf32>
    %54 = vector.extract_strided_slice %53 {offsets = [0, 0], sizes = [1, 8], strides = [1, 1]} : vector<2x8xf32> to vector<1x8xf32>
    %55 = vector.extract_strided_slice %53 {offsets = [1, 0], sizes = [1, 8], strides = [1, 1]} : vector<2x8xf32> to vector<1x8xf32>
    %56 = arith.subf %54, %55 : vector<1x8xf32>
    %57 = arith.mulf %56, %31 : vector<1x8xf32>
    %58 = arith.mulf %57, %57 : vector<1x8xf32>
    %cst_17 = arith.constant dense<0.000000e+00> : vector<1xf32>
    %59 = vector.multi_reduction <add>, %58, %cst_17 [1] : vector<1x8xf32> to vector<1xf32>
    %60 = vector.shape_cast %59 : vector<1xf32> to vector<1x1xf32>
    %61 = vector.broadcast %10 : f32 to vector<1x1xf32>
    %62 = arith.divf %60, %61 : vector<1x1xf32>
    %c0_18 = arith.constant 0 : index
    %c0_19 = arith.constant 0 : index
    %c0_20 = arith.constant 0 : index
    %63 = vector.load %arg8[%c0_18, %c0_19, %c0_20] : memref<1x4x32xf32, #tpu.memory_space<vmem>>, vector<1x4x32xf32>
    %64 = vector.shape_cast %63 : vector<1x4x32xf32> to vector<4x32xf32>
    %65 = vector.extract_strided_slice %64 {offsets = [0, 0], sizes = [2, 32], strides = [1, 1]} : vector<4x32xf32> to vector<2x32xf32>
    %66 = vector.extract_strided_slice %64 {offsets = [2, 0], sizes = [2, 32], strides = [1, 1]} : vector<4x32xf32> to vector<2x32xf32>
    %67 = arith.subf %65, %66 : vector<2x32xf32>
    %68 = vector.broadcast %26 : vector<1x32xf32> to vector<2x32xf32>
    %69 = arith.mulf %67, %68 : vector<2x32xf32>
    %70 = arith.mulf %69, %69 : vector<2x32xf32>
    %cst_21 = arith.constant dense<0.000000e+00> : vector<2xf32>
    %71 = vector.multi_reduction <add>, %70, %cst_21 [1] : vector<2x32xf32> to vector<2xf32>
    %72 = vector.shape_cast %71 : vector<2xf32> to vector<2x1xf32>
    %73 = vector.broadcast %9 : f32 to vector<2x1xf32>
    %74 = arith.divf %72, %73 : vector<2x1xf32>
    %75 = vector.extract_strided_slice %74 {offsets = [0, 0], sizes = [1, 1], strides = [1, 1]} : vector<2x1xf32> to vector<1x1xf32>
    %76 = vector.extract_strided_slice %74 {offsets = [1, 0], sizes = [1, 1], strides = [1, 1]} : vector<2x1xf32> to vector<1x1xf32>
    %cst_22 = arith.constant 0.000000e+00 : f32
    %77 = vector.broadcast %cst_22 : f32 to vector<32x16xf32>
    %78 = arith.select %19, %16, %77 : vector<32x16xi1>, vector<32x16xf32>
    %cst_23 = arith.constant dense<0xFF800000> : vector<32xf32>
    %79 = vector.multi_reduction <maximumf>, %78, %cst_23 [1] : vector<32x16xf32> to vector<32xf32>
    %80 = vector.shape_cast %79 : vector<32xf32> to vector<32x1xf32>
    %cst_24 = arith.constant dense<0xFF800000> : vector<1xf32>
    %81 = vector.multi_reduction <maximumf>, %80, %cst_24 [0] : vector<32x1xf32> to vector<1xf32>
    %82 = vector.shape_cast %81 : vector<1xf32> to vector<1x1xf32>
    %cst_25 = arith.constant 0x7F800000 : f32
    %83 = vector.broadcast %cst_25 : f32 to vector<32x16xf32>
    %84 = arith.select %19, %16, %83 : vector<32x16xi1>, vector<32x16xf32>
    %cst_26 = arith.constant dense<0x7F800000> : vector<32xf32>
    %85 = vector.multi_reduction <minimumf>, %84, %cst_26 [1] : vector<32x16xf32> to vector<32xf32>
    %86 = vector.shape_cast %85 : vector<32xf32> to vector<32x1xf32>
    %cst_27 = arith.constant dense<0x7F800000> : vector<1xf32>
    %87 = vector.multi_reduction <minimumf>, %86, %cst_27 [0] : vector<32x1xf32> to vector<1xf32>
    %88 = vector.shape_cast %87 : vector<1xf32> to vector<1x1xf32>
    %89 = vector.broadcast %88 : vector<1x1xf32> to vector<32x16xf32>
    %90 = arith.subf %16, %89 : vector<32x16xf32>
    %91 = arith.subf %82, %88 : vector<1x1xf32>
    %cst_28 = arith.constant 9.99999993E-9 : f32
    %92 = vector.broadcast %cst_28 : f32 to vector<1x1xf32>
    %93 = arith.addf %91, %92 : vector<1x1xf32>
    %94 = vector.broadcast %93 : vector<1x1xf32> to vector<32x16xf32>
    %95 = arith.divf %90, %94 : vector<32x16xf32>
    %96 = arith.mulf %95, %21 : vector<32x16xf32>
    %cst_29 = arith.constant 0.000000e+00 : f32
    %97 = vector.broadcast %cst_29 : f32 to vector<32x16xf32>
    %98 = arith.select %19, %12, %97 : vector<32x16xi1>, vector<32x16xf32>
    %cst_30 = arith.constant dense<0xFF800000> : vector<32xf32>
    %99 = vector.multi_reduction <maximumf>, %98, %cst_30 [1] : vector<32x16xf32> to vector<32xf32>
    %100 = vector.shape_cast %99 : vector<32xf32> to vector<32x1xf32>
    %cst_31 = arith.constant dense<0xFF800000> : vector<1xf32>
    %101 = vector.multi_reduction <maximumf>, %100, %cst_31 [0] : vector<32x1xf32> to vector<1xf32>
    %102 = vector.shape_cast %101 : vector<1xf32> to vector<1x1xf32>
    %cst_32 = arith.constant 0x7F800000 : f32
    %103 = vector.broadcast %cst_32 : f32 to vector<32x16xf32>
    %104 = arith.select %19, %12, %103 : vector<32x16xi1>, vector<32x16xf32>
    %cst_33 = arith.constant dense<0x7F800000> : vector<32xf32>
    %105 = vector.multi_reduction <minimumf>, %104, %cst_33 [1] : vector<32x16xf32> to vector<32xf32>
    %106 = vector.shape_cast %105 : vector<32xf32> to vector<32x1xf32>
    %cst_34 = arith.constant dense<0x7F800000> : vector<1xf32>
    %107 = vector.multi_reduction <minimumf>, %106, %cst_34 [0] : vector<32x1xf32> to vector<1xf32>
    %108 = vector.shape_cast %107 : vector<1xf32> to vector<1x1xf32>
    %109 = vector.broadcast %108 : vector<1x1xf32> to vector<32x16xf32>
    %110 = arith.subf %12, %109 : vector<32x16xf32>
    %111 = arith.subf %102, %108 : vector<1x1xf32>
    %cst_35 = arith.constant 9.99999993E-9 : f32
    %112 = vector.broadcast %cst_35 : f32 to vector<1x1xf32>
    %113 = arith.addf %111, %112 : vector<1x1xf32>
    %114 = vector.broadcast %113 : vector<1x1xf32> to vector<32x16xf32>
    %115 = arith.divf %110, %114 : vector<32x16xf32>
    %116 = arith.mulf %115, %21 : vector<32x16xf32>
    %117 = arith.mulf %96, %96 : vector<32x16xf32>
    %118 = arith.mulf %116, %116 : vector<32x16xf32>
    %119 = arith.mulf %96, %116 : vector<32x16xf32>
    %cst_36 = arith.constant 0.266011745 : f32
    %120 = vector.broadcast %cst_36 : f32 to vector<32x16xf32>
    %121 = arith.mulf %120, %96 : vector<32x16xf32>
    %c1_i32_37 = arith.constant 1 : i32
    %122 = tpu.dynamic_rotate %96 by %c1_i32_37 dim 0 : vector<32x16xf32>, i32 -> vector<32x16xf32>
    %c31_i32 = arith.constant 31 : i32
    %123 = tpu.dynamic_rotate %96 by %c31_i32 dim 0 : vector<32x16xf32>, i32 -> vector<32x16xf32>
    %124 = arith.addf %122, %123 : vector<32x16xf32>
    %cst_38 = arith.constant 0.213005543 : f32
    %125 = vector.broadcast %cst_38 : f32 to vector<32x16xf32>
    %126 = arith.mulf %125, %124 : vector<32x16xf32>
    %127 = arith.addf %121, %126 : vector<32x16xf32>
    %c2_i32 = arith.constant 2 : i32
    %128 = tpu.dynamic_rotate %96 by %c2_i32 dim 0 : vector<32x16xf32>, i32 -> vector<32x16xf32>
    %c30_i32 = arith.constant 30 : i32
    %129 = tpu.dynamic_rotate %96 by %c30_i32 dim 0 : vector<32x16xf32>, i32 -> vector<32x16xf32>
    %130 = arith.addf %128, %129 : vector<32x16xf32>
    %cst_39 = arith.constant 0.109360702 : f32
    %131 = vector.broadcast %cst_39 : f32 to vector<32x16xf32>
    %132 = arith.mulf %131, %130 : vector<32x16xf32>
    %133 = arith.addf %127, %132 : vector<32x16xf32>
    %c3_i32 = arith.constant 3 : i32
    %134 = tpu.dynamic_rotate %96 by %c3_i32 dim 0 : vector<32x16xf32>, i32 -> vector<32x16xf32>
    %c29_i32 = arith.constant 29 : i32
    %135 = tpu.dynamic_rotate %96 by %c29_i32 dim 0 : vector<32x16xf32>, i32 -> vector<32x16xf32>
    %136 = arith.addf %134, %135 : vector<32x16xf32>
    %cst_40 = arith.constant 0.0360007733 : f32
    %137 = vector.broadcast %cst_40 : f32 to vector<32x16xf32>
    %138 = arith.mulf %137, %136 : vector<32x16xf32>
    %139 = arith.addf %133, %138 : vector<32x16xf32>
    %c4_i32 = arith.constant 4 : i32
    %140 = tpu.dynamic_rotate %96 by %c4_i32 dim 0 : vector<32x16xf32>, i32 -> vector<32x16xf32>
    %c28_i32 = arith.constant 28 : i32
    %141 = tpu.dynamic_rotate %96 by %c28_i32 dim 0 : vector<32x16xf32>, i32 -> vector<32x16xf32>
    %142 = arith.addf %140, %141 : vector<32x16xf32>
    %cst_41 = arith.constant 0.00759875868 : f32
    %143 = vector.broadcast %cst_41 : f32 to vector<32x16xf32>
    %144 = arith.mulf %143, %142 : vector<32x16xf32>
    %145 = arith.addf %139, %144 : vector<32x16xf32>
    %c5_i32 = arith.constant 5 : i32
    %146 = tpu.dynamic_rotate %96 by %c5_i32 dim 0 : vector<32x16xf32>, i32 -> vector<32x16xf32>
    %c27_i32 = arith.constant 27 : i32
    %147 = tpu.dynamic_rotate %96 by %c27_i32 dim 0 : vector<32x16xf32>, i32 -> vector<32x16xf32>
    %148 = arith.addf %146, %147 : vector<32x16xf32>
    %cst_42 = arith.constant 0.00102838036 : f32
    %149 = vector.broadcast %cst_42 : f32 to vector<32x16xf32>
    %150 = arith.mulf %149, %148 : vector<32x16xf32>
    %151 = arith.addf %145, %150 : vector<32x16xf32>
    %cst_43 = arith.constant 0.266011745 : f32
    %152 = vector.broadcast %cst_43 : f32 to vector<32x16xf32>
    %153 = arith.mulf %152, %116 : vector<32x16xf32>
    %c1_i32_44 = arith.constant 1 : i32
    %154 = tpu.dynamic_rotate %116 by %c1_i32_44 dim 0 : vector<32x16xf32>, i32 -> vector<32x16xf32>
    %c31_i32_45 = arith.constant 31 : i32
    %155 = tpu.dynamic_rotate %116 by %c31_i32_45 dim 0 : vector<32x16xf32>, i32 -> vector<32x16xf32>
    %156 = arith.addf %154, %155 : vector<32x16xf32>
    %cst_46 = arith.constant 0.213005543 : f32
    %157 = vector.broadcast %cst_46 : f32 to vector<32x16xf32>
    %158 = arith.mulf %157, %156 : vector<32x16xf32>
    %159 = arith.addf %153, %158 : vector<32x16xf32>
    %c2_i32_47 = arith.constant 2 : i32
    %160 = tpu.dynamic_rotate %116 by %c2_i32_47 dim 0 : vector<32x16xf32>, i32 -> vector<32x16xf32>
    %c30_i32_48 = arith.constant 30 : i32
    %161 = tpu.dynamic_rotate %116 by %c30_i32_48 dim 0 : vector<32x16xf32>, i32 -> vector<32x16xf32>
    %162 = arith.addf %160, %161 : vector<32x16xf32>
    %cst_49 = arith.constant 0.109360702 : f32
    %163 = vector.broadcast %cst_49 : f32 to vector<32x16xf32>
    %164 = arith.mulf %163, %162 : vector<32x16xf32>
    %165 = arith.addf %159, %164 : vector<32x16xf32>
    %c3_i32_50 = arith.constant 3 : i32
    %166 = tpu.dynamic_rotate %116 by %c3_i32_50 dim 0 : vector<32x16xf32>, i32 -> vector<32x16xf32>
    %c29_i32_51 = arith.constant 29 : i32
    %167 = tpu.dynamic_rotate %116 by %c29_i32_51 dim 0 : vector<32x16xf32>, i32 -> vector<32x16xf32>
    %168 = arith.addf %166, %167 : vector<32x16xf32>
    %cst_52 = arith.constant 0.0360007733 : f32
    %169 = vector.broadcast %cst_52 : f32 to vector<32x16xf32>
    %170 = arith.mulf %169, %168 : vector<32x16xf32>
    %171 = arith.addf %165, %170 : vector<32x16xf32>
    %c4_i32_53 = arith.constant 4 : i32
    %172 = tpu.dynamic_rotate %116 by %c4_i32_53 dim 0 : vector<32x16xf32>, i32 -> vector<32x16xf32>
    %c28_i32_54 = arith.constant 28 : i32
    %173 = tpu.dynamic_rotate %116 by %c28_i32_54 dim 0 : vector<32x16xf32>, i32 -> vector<32x16xf32>
    %174 = arith.addf %172, %173 : vector<32x16xf32>
    %cst_55 = arith.constant 0.00759875868 : f32
    %175 = vector.broadcast %cst_55 : f32 to vector<32x16xf32>
    %176 = arith.mulf %175, %174 : vector<32x16xf32>
    %177 = arith.addf %171, %176 : vector<32x16xf32>
    %c5_i32_56 = arith.constant 5 : i32
    %178 = tpu.dynamic_rotate %116 by %c5_i32_56 dim 0 : vector<32x16xf32>, i32 -> vector<32x16xf32>
    %c27_i32_57 = arith.constant 27 : i32
    %179 = tpu.dynamic_rotate %116 by %c27_i32_57 dim 0 : vector<32x16xf32>, i32 -> vector<32x16xf32>
    %180 = arith.addf %178, %179 : vector<32x16xf32>
    %cst_58 = arith.constant 0.00102838036 : f32
    %181 = vector.broadcast %cst_58 : f32 to vector<32x16xf32>
    %182 = arith.mulf %181, %180 : vector<32x16xf32>
    %183 = arith.addf %177, %182 : vector<32x16xf32>
    %cst_59 = arith.constant 0.266011745 : f32
    %184 = vector.broadcast %cst_59 : f32 to vector<32x16xf32>
    %185 = arith.mulf %184, %117 : vector<32x16xf32>
    %c1_i32_60 = arith.constant 1 : i32
    %186 = tpu.dynamic_rotate %117 by %c1_i32_60 dim 0 : vector<32x16xf32>, i32 -> vector<32x16xf32>
    %c31_i32_61 = arith.constant 31 : i32
    %187 = tpu.dynamic_rotate %117 by %c31_i32_61 dim 0 : vector<32x16xf32>, i32 -> vector<32x16xf32>
    %188 = arith.addf %186, %187 : vector<32x16xf32>
    %cst_62 = arith.constant 0.213005543 : f32
    %189 = vector.broadcast %cst_62 : f32 to vector<32x16xf32>
    %190 = arith.mulf %189, %188 : vector<32x16xf32>
    %191 = arith.addf %185, %190 : vector<32x16xf32>
    %c2_i32_63 = arith.constant 2 : i32
    %192 = tpu.dynamic_rotate %117 by %c2_i32_63 dim 0 : vector<32x16xf32>, i32 -> vector<32x16xf32>
    %c30_i32_64 = arith.constant 30 : i32
    %193 = tpu.dynamic_rotate %117 by %c30_i32_64 dim 0 : vector<32x16xf32>, i32 -> vector<32x16xf32>
    %194 = arith.addf %192, %193 : vector<32x16xf32>
    %cst_65 = arith.constant 0.109360702 : f32
    %195 = vector.broadcast %cst_65 : f32 to vector<32x16xf32>
    %196 = arith.mulf %195, %194 : vector<32x16xf32>
    %197 = arith.addf %191, %196 : vector<32x16xf32>
    %c3_i32_66 = arith.constant 3 : i32
    %198 = tpu.dynamic_rotate %117 by %c3_i32_66 dim 0 : vector<32x16xf32>, i32 -> vector<32x16xf32>
    %c29_i32_67 = arith.constant 29 : i32
    %199 = tpu.dynamic_rotate %117 by %c29_i32_67 dim 0 : vector<32x16xf32>, i32 -> vector<32x16xf32>
    %200 = arith.addf %198, %199 : vector<32x16xf32>
    %cst_68 = arith.constant 0.0360007733 : f32
    %201 = vector.broadcast %cst_68 : f32 to vector<32x16xf32>
    %202 = arith.mulf %201, %200 : vector<32x16xf32>
    %203 = arith.addf %197, %202 : vector<32x16xf32>
    %c4_i32_69 = arith.constant 4 : i32
    %204 = tpu.dynamic_rotate %117 by %c4_i32_69 dim 0 : vector<32x16xf32>, i32 -> vector<32x16xf32>
    %c28_i32_70 = arith.constant 28 : i32
    %205 = tpu.dynamic_rotate %117 by %c28_i32_70 dim 0 : vector<32x16xf32>, i32 -> vector<32x16xf32>
    %206 = arith.addf %204, %205 : vector<32x16xf32>
    %cst_71 = arith.constant 0.00759875868 : f32
    %207 = vector.broadcast %cst_71 : f32 to vector<32x16xf32>
    %208 = arith.mulf %207, %206 : vector<32x16xf32>
    %209 = arith.addf %203, %208 : vector<32x16xf32>
    %c5_i32_72 = arith.constant 5 : i32
    %210 = tpu.dynamic_rotate %117 by %c5_i32_72 dim 0 : vector<32x16xf32>, i32 -> vector<32x16xf32>
    %c27_i32_73 = arith.constant 27 : i32
    %211 = tpu.dynamic_rotate %117 by %c27_i32_73 dim 0 : vector<32x16xf32>, i32 -> vector<32x16xf32>
    %212 = arith.addf %210, %211 : vector<32x16xf32>
    %cst_74 = arith.constant 0.00102838036 : f32
    %213 = vector.broadcast %cst_74 : f32 to vector<32x16xf32>
    %214 = arith.mulf %213, %212 : vector<32x16xf32>
    %215 = arith.addf %209, %214 : vector<32x16xf32>
    %cst_75 = arith.constant 0.266011745 : f32
    %216 = vector.broadcast %cst_75 : f32 to vector<32x16xf32>
    %217 = arith.mulf %216, %118 : vector<32x16xf32>
    %c1_i32_76 = arith.constant 1 : i32
    %218 = tpu.dynamic_rotate %118 by %c1_i32_76 dim 0 : vector<32x16xf32>, i32 -> vector<32x16xf32>
    %c31_i32_77 = arith.constant 31 : i32
    %219 = tpu.dynamic_rotate %118 by %c31_i32_77 dim 0 : vector<32x16xf32>, i32 -> vector<32x16xf32>
    %220 = arith.addf %218, %219 : vector<32x16xf32>
    %cst_78 = arith.constant 0.213005543 : f32
    %221 = vector.broadcast %cst_78 : f32 to vector<32x16xf32>
    %222 = arith.mulf %221, %220 : vector<32x16xf32>
    %223 = arith.addf %217, %222 : vector<32x16xf32>
    %c2_i32_79 = arith.constant 2 : i32
    %224 = tpu.dynamic_rotate %118 by %c2_i32_79 dim 0 : vector<32x16xf32>, i32 -> vector<32x16xf32>
    %c30_i32_80 = arith.constant 30 : i32
    %225 = tpu.dynamic_rotate %118 by %c30_i32_80 dim 0 : vector<32x16xf32>, i32 -> vector<32x16xf32>
    %226 = arith.addf %224, %225 : vector<32x16xf32>
    %cst_81 = arith.constant 0.109360702 : f32
    %227 = vector.broadcast %cst_81 : f32 to vector<32x16xf32>
    %228 = arith.mulf %227, %226 : vector<32x16xf32>
    %229 = arith.addf %223, %228 : vector<32x16xf32>
    %c3_i32_82 = arith.constant 3 : i32
    %230 = tpu.dynamic_rotate %118 by %c3_i32_82 dim 0 : vector<32x16xf32>, i32 -> vector<32x16xf32>
    %c29_i32_83 = arith.constant 29 : i32
    %231 = tpu.dynamic_rotate %118 by %c29_i32_83 dim 0 : vector<32x16xf32>, i32 -> vector<32x16xf32>
    %232 = arith.addf %230, %231 : vector<32x16xf32>
    %cst_84 = arith.constant 0.0360007733 : f32
    %233 = vector.broadcast %cst_84 : f32 to vector<32x16xf32>
    %234 = arith.mulf %233, %232 : vector<32x16xf32>
    %235 = arith.addf %229, %234 : vector<32x16xf32>
    %c4_i32_85 = arith.constant 4 : i32
    %236 = tpu.dynamic_rotate %118 by %c4_i32_85 dim 0 : vector<32x16xf32>, i32 -> vector<32x16xf32>
    %c28_i32_86 = arith.constant 28 : i32
    %237 = tpu.dynamic_rotate %118 by %c28_i32_86 dim 0 : vector<32x16xf32>, i32 -> vector<32x16xf32>
    %238 = arith.addf %236, %237 : vector<32x16xf32>
    %cst_87 = arith.constant 0.00759875868 : f32
    %239 = vector.broadcast %cst_87 : f32 to vector<32x16xf32>
    %240 = arith.mulf %239, %238 : vector<32x16xf32>
    %241 = arith.addf %235, %240 : vector<32x16xf32>
    %c5_i32_88 = arith.constant 5 : i32
    %242 = tpu.dynamic_rotate %118 by %c5_i32_88 dim 0 : vector<32x16xf32>, i32 -> vector<32x16xf32>
    %c27_i32_89 = arith.constant 27 : i32
    %243 = tpu.dynamic_rotate %118 by %c27_i32_89 dim 0 : vector<32x16xf32>, i32 -> vector<32x16xf32>
    %244 = arith.addf %242, %243 : vector<32x16xf32>
    %cst_90 = arith.constant 0.00102838036 : f32
    %245 = vector.broadcast %cst_90 : f32 to vector<32x16xf32>
    %246 = arith.mulf %245, %244 : vector<32x16xf32>
    %247 = arith.addf %241, %246 : vector<32x16xf32>
    %cst_91 = arith.constant 0.266011745 : f32
    %248 = vector.broadcast %cst_91 : f32 to vector<32x16xf32>
    %249 = arith.mulf %248, %119 : vector<32x16xf32>
    %c1_i32_92 = arith.constant 1 : i32
    %250 = tpu.dynamic_rotate %119 by %c1_i32_92 dim 0 : vector<32x16xf32>, i32 -> vector<32x16xf32>
    %c31_i32_93 = arith.constant 31 : i32
    %251 = tpu.dynamic_rotate %119 by %c31_i32_93 dim 0 : vector<32x16xf32>, i32 -> vector<32x16xf32>
    %252 = arith.addf %250, %251 : vector<32x16xf32>
    %cst_94 = arith.constant 0.213005543 : f32
    %253 = vector.broadcast %cst_94 : f32 to vector<32x16xf32>
    %254 = arith.mulf %253, %252 : vector<32x16xf32>
    %255 = arith.addf %249, %254 : vector<32x16xf32>
    %c2_i32_95 = arith.constant 2 : i32
    %256 = tpu.dynamic_rotate %119 by %c2_i32_95 dim 0 : vector<32x16xf32>, i32 -> vector<32x16xf32>
    %c30_i32_96 = arith.constant 30 : i32
    %257 = tpu.dynamic_rotate %119 by %c30_i32_96 dim 0 : vector<32x16xf32>, i32 -> vector<32x16xf32>
    %258 = arith.addf %256, %257 : vector<32x16xf32>
    %cst_97 = arith.constant 0.109360702 : f32
    %259 = vector.broadcast %cst_97 : f32 to vector<32x16xf32>
    %260 = arith.mulf %259, %258 : vector<32x16xf32>
    %261 = arith.addf %255, %260 : vector<32x16xf32>
    %c3_i32_98 = arith.constant 3 : i32
    %262 = tpu.dynamic_rotate %119 by %c3_i32_98 dim 0 : vector<32x16xf32>, i32 -> vector<32x16xf32>
    %c29_i32_99 = arith.constant 29 : i32
    %263 = tpu.dynamic_rotate %119 by %c29_i32_99 dim 0 : vector<32x16xf32>, i32 -> vector<32x16xf32>
    %264 = arith.addf %262, %263 : vector<32x16xf32>
    %cst_100 = arith.constant 0.0360007733 : f32
    %265 = vector.broadcast %cst_100 : f32 to vector<32x16xf32>
    %266 = arith.mulf %265, %264 : vector<32x16xf32>
    %267 = arith.addf %261, %266 : vector<32x16xf32>
    %c4_i32_101 = arith.constant 4 : i32
    %268 = tpu.dynamic_rotate %119 by %c4_i32_101 dim 0 : vector<32x16xf32>, i32 -> vector<32x16xf32>
    %c28_i32_102 = arith.constant 28 : i32
    %269 = tpu.dynamic_rotate %119 by %c28_i32_102 dim 0 : vector<32x16xf32>, i32 -> vector<32x16xf32>
    %270 = arith.addf %268, %269 : vector<32x16xf32>
    %cst_103 = arith.constant 0.00759875868 : f32
    %271 = vector.broadcast %cst_103 : f32 to vector<32x16xf32>
    %272 = arith.mulf %271, %270 : vector<32x16xf32>
    %273 = arith.addf %267, %272 : vector<32x16xf32>
    %c5_i32_104 = arith.constant 5 : i32
    %274 = tpu.dynamic_rotate %119 by %c5_i32_104 dim 0 : vector<32x16xf32>, i32 -> vector<32x16xf32>
    %c27_i32_105 = arith.constant 27 : i32
    %275 = tpu.dynamic_rotate %119 by %c27_i32_105 dim 0 : vector<32x16xf32>, i32 -> vector<32x16xf32>
    %276 = arith.addf %274, %275 : vector<32x16xf32>
    %cst_106 = arith.constant 0.00102838036 : f32
    %277 = vector.broadcast %cst_106 : f32 to vector<32x16xf32>
    %278 = arith.mulf %277, %276 : vector<32x16xf32>
    %279 = arith.addf %273, %278 : vector<32x16xf32>
    %c0_107 = arith.constant 0 : index
    %c0_108 = arith.constant 0 : index
    %280 = vector.load %arg9[%c0_107, %c0_108] : memref<16x6xf32, #tpu.memory_space<vmem>>, vector<16x6xf32>
    %cst_109 = arith.constant dense<0.000000e+00> : vector<32x6xf32>
    %281 = tpu.matmul %151, %280, %cst_109 {dimension_numbers = #tpu.dot_dimension_numbers<[1], [0], [0], [1], [0, 0, 1, 1], [], []>, precision = #tpu.contract_precision<fp32>} : vector<32x16xf32>, vector<16x6xf32>, vector<32x6xf32> -> vector<32x6xf32>
    %cst_110 = arith.constant dense<0.000000e+00> : vector<32x6xf32>
    %282 = tpu.matmul %183, %280, %cst_110 {dimension_numbers = #tpu.dot_dimension_numbers<[1], [0], [0], [1], [0, 0, 1, 1], [], []>, precision = #tpu.contract_precision<fp32>} : vector<32x16xf32>, vector<16x6xf32>, vector<32x6xf32> -> vector<32x6xf32>
    %cst_111 = arith.constant dense<0.000000e+00> : vector<32x6xf32>
    %283 = tpu.matmul %215, %280, %cst_111 {dimension_numbers = #tpu.dot_dimension_numbers<[1], [0], [0], [1], [0, 0, 1, 1], [], []>, precision = #tpu.contract_precision<fp32>} : vector<32x16xf32>, vector<16x6xf32>, vector<32x6xf32> -> vector<32x6xf32>
    %cst_112 = arith.constant dense<0.000000e+00> : vector<32x6xf32>
    %284 = tpu.matmul %247, %280, %cst_112 {dimension_numbers = #tpu.dot_dimension_numbers<[1], [0], [0], [1], [0, 0, 1, 1], [], []>, precision = #tpu.contract_precision<fp32>} : vector<32x16xf32>, vector<16x6xf32>, vector<32x6xf32> -> vector<32x6xf32>
    %cst_113 = arith.constant dense<0.000000e+00> : vector<32x6xf32>
    %285 = tpu.matmul %279, %280, %cst_113 {dimension_numbers = #tpu.dot_dimension_numbers<[1], [0], [0], [1], [0, 0, 1, 1], [], []>, precision = #tpu.contract_precision<fp32>} : vector<32x16xf32>, vector<16x6xf32>, vector<32x6xf32> -> vector<32x6xf32>
    %286 = arith.mulf %281, %281 : vector<32x6xf32>
    %287 = arith.subf %283, %286 : vector<32x6xf32>
    %288 = arith.mulf %282, %282 : vector<32x6xf32>
    %289 = arith.subf %284, %288 : vector<32x6xf32>
    %290 = arith.mulf %281, %282 : vector<32x6xf32>
    %291 = arith.subf %285, %290 : vector<32x6xf32>
    %cst_114 = arith.constant 2.000000e+00 : f32
    %292 = vector.broadcast %cst_114 : f32 to vector<32x6xf32>
    %293 = arith.mulf %292, %291 : vector<32x6xf32>
    %cst_115 = arith.constant 8.99999984E-4 : f32
    %294 = vector.broadcast %cst_115 : f32 to vector<32x6xf32>
    %295 = arith.addf %293, %294 : vector<32x6xf32>
    %296 = arith.addf %287, %289 : vector<32x6xf32>
    %cst_116 = arith.constant 8.99999984E-4 : f32
    %297 = vector.broadcast %cst_116 : f32 to vector<32x6xf32>
    %298 = arith.addf %296, %297 : vector<32x6xf32>
    %299 = tpu.reciprocal %298 {approx = true} : vector<32x6xf32> -> vector<32x6xf32>
    %300 = arith.mulf %295, %299 : vector<32x6xf32>
    %cst_117 = arith.constant 2.000000e+00 : f32
    %301 = vector.broadcast %cst_117 : f32 to vector<32x6xf32>
    %302 = arith.mulf %301, %281 : vector<32x6xf32>
    %303 = arith.mulf %302, %282 : vector<32x6xf32>
    %cst_118 = arith.constant 9.99999974E-5 : f32
    %304 = vector.broadcast %cst_118 : f32 to vector<32x6xf32>
    %305 = arith.addf %303, %304 : vector<32x6xf32>
    %306 = arith.mulf %281, %281 : vector<32x6xf32>
    %307 = arith.mulf %282, %282 : vector<32x6xf32>
    %308 = arith.addf %306, %307 : vector<32x6xf32>
    %cst_119 = arith.constant 9.99999974E-5 : f32
    %309 = vector.broadcast %cst_119 : f32 to vector<32x6xf32>
    %310 = arith.addf %308, %309 : vector<32x6xf32>
    %311 = tpu.reciprocal %310 {approx = true} : vector<32x6xf32> -> vector<32x6xf32>
    %312 = arith.mulf %305, %311 : vector<32x6xf32>
    %313 = arith.mulf %312, %300 : vector<32x6xf32>
    %314 = vector.extract_strided_slice %313 {offsets = [5, 0], sizes = [22, 6], strides = [1, 1]} : vector<32x6xf32> to vector<22x6xf32>
    %cst_120 = arith.constant dense<0.000000e+00> : vector<22xf32>
    %315 = vector.multi_reduction <add>, %314, %cst_120 [1] : vector<22x6xf32> to vector<22xf32>
    %316 = vector.shape_cast %315 : vector<22xf32> to vector<22x1xf32>
    %cst_121 = arith.constant dense<0.000000e+00> : vector<1xf32>
    %317 = vector.multi_reduction <add>, %316, %cst_121 [0] : vector<22x1xf32> to vector<1xf32>
    %318 = vector.shape_cast %317 : vector<1xf32> to vector<1x1xf32>
    %cst_122 = arith.constant 1.320000e+02 : f32
    %319 = vector.broadcast %cst_122 : f32 to vector<1x1xf32>
    %320 = arith.divf %318, %319 : vector<1x1xf32>
    %321 = tpu.iota {dimensions = array<i32: 1>} : vector<1x8xi32>
    %c0_i32_123 = arith.constant 0 : i32
    %322 = vector.broadcast %c0_i32_123 : i32 to vector<1x8xi32>
    %323 = arith.cmpi eq, %321, %322 : vector<1x8xi32>
    %cst_124 = arith.constant 0.000000e+00 : f32
    %324 = vector.shape_cast %41 : vector<1x1xf32> to vector<1x1xf32>
    %325 = vector.broadcast %324 : vector<1x1xf32> to vector<1x8xf32>
    %326 = vector.broadcast %cst_124 : f32 to vector<1x8xf32>
    %327 = arith.select %323, %325, %326 : vector<1x8xi1>, vector<1x8xf32>
    %c1_i32_125 = arith.constant 1 : i32
    %328 = vector.broadcast %c1_i32_125 : i32 to vector<1x8xi32>
    %329 = arith.cmpi eq, %321, %328 : vector<1x8xi32>
    %cst_126 = arith.constant 0.000000e+00 : f32
    %330 = vector.shape_cast %51 : vector<1x1xf32> to vector<1x1xf32>
    %331 = vector.broadcast %330 : vector<1x1xf32> to vector<1x8xf32>
    %332 = vector.broadcast %cst_126 : f32 to vector<1x8xf32>
    %333 = arith.select %329, %331, %332 : vector<1x8xi1>, vector<1x8xf32>
    %334 = arith.addf %327, %333 : vector<1x8xf32>
    %c2_i32_127 = arith.constant 2 : i32
    %335 = vector.broadcast %c2_i32_127 : i32 to vector<1x8xi32>
    %336 = arith.cmpi eq, %321, %335 : vector<1x8xi32>
    %cst_128 = arith.constant 0.000000e+00 : f32
    %337 = vector.shape_cast %62 : vector<1x1xf32> to vector<1x1xf32>
    %338 = vector.broadcast %337 : vector<1x1xf32> to vector<1x8xf32>
    %339 = vector.broadcast %cst_128 : f32 to vector<1x8xf32>
    %340 = arith.select %336, %338, %339 : vector<1x8xi1>, vector<1x8xf32>
    %341 = arith.addf %334, %340 : vector<1x8xf32>
    %c3_i32_129 = arith.constant 3 : i32
    %342 = vector.broadcast %c3_i32_129 : i32 to vector<1x8xi32>
    %343 = arith.cmpi eq, %321, %342 : vector<1x8xi32>
    %cst_130 = arith.constant 0.000000e+00 : f32
    %344 = vector.shape_cast %75 : vector<1x1xf32> to vector<1x1xf32>
    %345 = vector.broadcast %344 : vector<1x1xf32> to vector<1x8xf32>
    %346 = vector.broadcast %cst_130 : f32 to vector<1x8xf32>
    %347 = arith.select %343, %345, %346 : vector<1x8xi1>, vector<1x8xf32>
    %348 = arith.addf %341, %347 : vector<1x8xf32>
    %c4_i32_131 = arith.constant 4 : i32
    %349 = vector.broadcast %c4_i32_131 : i32 to vector<1x8xi32>
    %350 = arith.cmpi eq, %321, %349 : vector<1x8xi32>
    %cst_132 = arith.constant 0.000000e+00 : f32
    %351 = vector.shape_cast %76 : vector<1x1xf32> to vector<1x1xf32>
    %352 = vector.broadcast %351 : vector<1x1xf32> to vector<1x8xf32>
    %353 = vector.broadcast %cst_132 : f32 to vector<1x8xf32>
    %354 = arith.select %350, %352, %353 : vector<1x8xi1>, vector<1x8xf32>
    %355 = arith.addf %348, %354 : vector<1x8xf32>
    %c5_i32_133 = arith.constant 5 : i32
    %356 = vector.broadcast %c5_i32_133 : i32 to vector<1x8xi32>
    %357 = arith.cmpi eq, %321, %356 : vector<1x8xi32>
    %cst_134 = arith.constant 0.000000e+00 : f32
    %358 = vector.shape_cast %320 : vector<1x1xf32> to vector<1x1xf32>
    %359 = vector.broadcast %358 : vector<1x1xf32> to vector<1x8xf32>
    %360 = vector.broadcast %cst_134 : f32 to vector<1x8xf32>
    %361 = arith.select %357, %359, %360 : vector<1x8xi1>, vector<1x8xf32>
    %362 = arith.addf %355, %361 : vector<1x8xf32>
    %c0_135 = arith.constant 0 : index
    %c0_136 = arith.constant 0 : index
    %c0_137 = arith.constant 0 : index
    %363 = vector.load %arg10[%c0_135, %c0_136, %c0_137] : memref<1x1x8xf32, #tpu.memory_space<vmem>>, vector<1x1x8xf32>
    %364 = vector.shape_cast %363 : vector<1x1x8xf32> to vector<1x8xf32>
    %365 = arith.addf %364, %362 : vector<1x8xf32>
    %c0_138 = arith.constant 0 : index
    %c0_139 = arith.constant 0 : index
    %c0_140 = arith.constant 0 : index
    %366 = vector.load %arg10[%c0_138, %c0_139, %c0_140] : memref<1x1x8xf32, #tpu.memory_space<vmem>>, vector<1x1x8xf32>
    %367 = vector.shape_cast %366 : vector<1x1x8xf32> to vector<1x8xf32>
    %368 = vector.shape_cast %365 : vector<1x8xf32> to vector<1x1x8xf32>
    tpu.vector_store %arg10[%c0_138, %c0_139, %c0_140], %368 {strides = array<i32>} : memref<1x1x8xf32, #tpu.memory_space<vmem>>, vector<1x1x8xf32>,
    return
  }
  func.func @transform_0(%arg0: i32, %arg1: i32, %arg2: memref<2xi32, #tpu.memory_space<smem>>, %arg3: memref<2xi32, #tpu.memory_space<smem>>) -> (i32, i32, i32) {
    %c1_i32 = arith.constant 1 : i32
    %0 = arith.muli %arg0, %c1_i32 : i32
    %1 = arith.addi %0, %arg1 : i32
    %c0_i32 = arith.constant 0 : i32
    %c0_i32_0 = arith.constant 0 : i32
    %c0_i32_1 = arith.constant 0 : i32
    return %1, %c0_i32, %c0_i32_0 : i32, i32, i32
  }
  func.func @transform_1(%arg0: i32, %arg1: i32, %arg2: memref<2xi32, #tpu.memory_space<smem>>, %arg3: memref<2xi32, #tpu.memory_space<smem>>) -> (i32, i32, i32) {
    %c1_i32 = arith.constant 1 : i32
    %0 = arith.muli %arg0, %c1_i32 : i32
    %1 = arith.addi %0, %arg1 : i32
    %c0_i32 = arith.constant 0 : i32
    %c0_i32_0 = arith.constant 0 : i32
    %c0_i32_1 = arith.constant 0 : i32
    return %1, %c0_i32, %c0_i32_0 : i32, i32, i32
  }
  func.func @transform_2(%arg0: i32, %arg1: i32, %arg2: memref<2xi32, #tpu.memory_space<smem>>, %arg3: memref<2xi32, #tpu.memory_space<smem>>) -> (i32, i32, i32) {
    %c1_i32 = arith.constant 1 : i32
    %0 = arith.muli %arg0, %c1_i32 : i32
    %1 = arith.addi %0, %arg1 : i32
    %c0_i32 = arith.constant 0 : i32
    %c0_i32_0 = arith.constant 0 : i32
    %c0_i32_1 = arith.constant 0 : i32
    return %1, %c0_i32, %c0_i32_0 : i32, i32, i32
  }
  func.func @transform_3(%arg0: i32, %arg1: i32, %arg2: memref<2xi32, #tpu.memory_space<smem>>, %arg3: memref<2xi32, #tpu.memory_space<smem>>) -> (i32, i32, i32) {
    %c1_i32 = arith.constant 1 : i32
    %0 = arith.muli %arg0, %c1_i32 : i32
    %1 = arith.addi %0, %arg1 : i32
    %c0_i32 = arith.constant 0 : i32
    %c0_i32_0 = arith.constant 0 : i32
    %c0_i32_1 = arith.constant 0 : i32
    return %1, %c0_i32, %c0_i32_0 : i32, i32, i32
  }
  func.func @transform_4(%arg0: i32, %arg1: i32, %arg2: memref<2xi32, #tpu.memory_space<smem>>, %arg3: memref<2xi32, #tpu.memory_space<smem>>) -> (i32, i32, i32) {
    %c1_i32 = arith.constant 1 : i32
    %0 = arith.muli %arg0, %c1_i32 : i32
    %1 = arith.addi %0, %arg1 : i32
    %c0_i32 = arith.constant 0 : i32
    %c0_i32_0 = arith.constant 0 : i32
    %c0_i32_1 = arith.constant 0 : i32
    return %1, %c0_i32, %c0_i32_0 : i32, i32, i32
  }
  func.func @transform_5(%arg0: i32, %arg1: i32, %arg2: memref<2xi32, #tpu.memory_space<smem>>, %arg3: memref<2xi32, #tpu.memory_space<smem>>) -> (i32, i32) {
    %c0_i32 = arith.constant 0 : i32
    %c0_i32_0 = arith.constant 0 : i32
    %c0_i32_1 = arith.constant 0 : i32
    return %c0_i32, %c0_i32_0 : i32, i32
  }
  func.func @transform_6(%arg0: i32, %arg1: i32, %arg2: memref<2xi32, #tpu.memory_space<smem>>, %arg3: memref<2xi32, #tpu.memory_space<smem>>) -> (i32, i32, i32) {
    %c0_i32 = arith.constant 0 : i32
    %c0_i32_0 = arith.constant 0 : i32
    %c0_i32_1 = arith.constant 0 : i32
    return %arg0, %c0_i32, %c0_i32_0 : i32, i32, i32
  }
}

</mosaic_0001>

<bundles_post_ra>
// kernel: tpu_custom_call.1
= control target key start
LH: loop header
LB: loop body
LE: loop exit
PB: predicated region body
PF: predicated region fallthrough
CT: control target
= control target key end

     0   :  { %s7226_s0 = inlined_call_operand.vmem [shape: s32[2], index: 0, kind: input, shape index: {}]   ;;  %s7227_s2 = inlined_call_operand.vmem [shape: f32[2,32,16], index: 2, kind: input, shape index: {}]   ;;  %s7228_s3 = inlined_call_operand.vmem [shape: f32[2,32,16], index: 3, kind: input, shape index: {}]   ;;  %s7229_s4 = inlined_call_operand.vmem [shape: f32[2,32,16], index: 4, kind: input, shape index: {}]   ;;  %s7230_s5 = inlined_call_operand.vmem [shape: f32[2,2,8], index: 5, kind: input, shape index: {}]   ;;  %s7231_s6 = inlined_call_operand.vmem [shape: f32[2,4,32], index: 6, kind: input, shape index: {}]   ;;  %s7232_s7 = inlined_call_operand.vmem [shape: f32[16,6], index: 7, kind: input, shape index: {}]   ;;  %s7233_s8 = inlined_call_operand.hbm [shape: f32[2,1,8], index: 8, kind: output, shape index: {}]   ;;  %s7234_s1 = inlined_call_operand.vmem [shape: s32[2], index: 1, kind: input, shape index: {}]  }
   0x1   :  { %s13_s29 = sshll.u32 %s7226_s0, 4  ;;  %s17_s10 = sshll.u32 %s7234_s1, 4  ;;  %s14_s29 = int_to_ptr.vmem [resolvable:$true] %s13_s29  ;;  %s18_s10 = int_to_ptr.vmem [resolvable:$true] %s17_s10 }
   0x2   :  { %s5369_s11 = scalar_lea.vmem %s14_s29, 16  ;;  %p5374_p1 = scmp.lt.s32.totalorder %s14_s29, %s14_s29 }
   0x3   :  { %p5370_p0 = scmp.ne.s32.totalorder %s14_s29, %s5369_s11  ;;  %p5375_p2 = scmp.lt.s32.totalorder %s5369_s11, %s5369_s11 }
   0x5   :  { %p5376_p3 = por %p5375_p2, %p5374_p1 }
   0x7   :  { %p5377_p4 = pnand %p5376_p3, %p5370_p0 }
   0x9   :  { %5380 = shalt.err (!%p5377_p4)  }
   0xa   :  { %s5475_s12 = smov [#allocation3]   ;;  %s5381_s13 = scalar_lea.vmem %s18_s10, 16 }
   0xb   :  { %16 = dma.vmem_to_smem %s14_s29, 16, %s5475_s12, [#allocation2] }
   0xc   :  { %p5382_p5 = scmp.ne.s32.totalorder %s18_s10, %s5381_s13  ;;  %p5386_p6 = scmp.lt.s32.totalorder %s18_s10, %s18_s10 }
   0xd   :  { %p5387_p7 = scmp.lt.s32.totalorder %s5381_s13, %s5381_s13 }
   0xf   :  { %p5388_p8 = por %p5387_p7, %p5386_p6 }
  0x11   :  { %p5389_p9 = pnand %p5388_p8, %p5382_p5 }
  0x13   :  { %5392 = shalt.err (!%p5389_p9)  }
  0x14   :  { %s5476_s0 = smov [#allocation4]  }
  0x15   :  { %20 = dma.vmem_to_smem %s18_s10, 16, %s5476_s0, [#allocation2] }
  0x16   :  { %5445 = dma.done.wait [#allocation2], 32 }
  0x17   :  { %5446 = vsyncadd [#allocation2], 4294967264 }
  0x18   :  { %22 = sfence }
  0x19   :  { %23 = vsyncpa [#allocation6], 0 }
  0x1a   :  { %25 = vsyncpa [#allocation6 + $0x1], 0  ;;  %s5530_s1 = smov 0   ;;  %s5532_s14 = smov 0  }
  0x1b   :  { %s5534_s15 = smov 0   ;;  %s5536_s16 = smov 0  }
  0x1c   :  { %s5538_s17 = smov 0   ;;  %s5540_s18 = smov 0  }
  0x1d LB: > { %s4552_s19 = sadd.s32 4294967295, %s5473_s18   ;;  %s4553_s20 = sadd.s32 4294967294, %s5473_s18   ;;  %s5473_s18 = sphi %s5540_s18, %s31_s18   ;;  %s5469_s17 = sphi %s5538_s17, %s7359_s17   ;;  %s5465_s16 = sphi %s5536_s16, %s7358_s16   ;;  %s5461_s15 = sphi %s5534_s15, %s7357_s15   ;;  %s5457_s14 = sphi %s5532_s14, %s7356_s14   ;;  %s5453_s1 = sphi %s5530_s1, %s7355_s1  }
  0x1e   : > { %s43_s21 = sadd.s32 1, %s5469_s17  ;;  %s211_s22 = sadd.s32 1, %s5461_s15 }
  0x1f   : > { %p45_p10 = scmp.ge.s32.totalorder %s43_s21, 2  ;;  %p221_p11 = scmp.ne.s32.totalorder %s5461_s15, %s5457_s14 }
  0x20   : > { %p222_p12 = scmp.eq.s32.totalorder %s4552_s19, 1  ;;  %p227_p13 = scmp.ne.s32.totalorder %s5457_s14, %s5453_s1 }
  0x21   : > { %s7361_s21 = smov (%p45_p10, %s43_s21), 0  ;;  %p228_p1 = scmp.eq.s32.totalorder %s4553_s20, 1 }
  0x22   : > { %p5570_p0 = por %p222_p12, %p221_p11  ;;  %s208_s24 = ssub.s32 %s5469_s17, %s7361_s21 }
  0x23   : > { %p4556_p2 = scmp.ge.s32.totalorder %s5473_s18, 1  ;;  %p209_p3 = scmp.eq.s32.totalorder %s208_s24, 0 }
  0x24   : > { %p5577_p4 = por %p228_p1, %p227_p13  ;;  %p297_p5 = scmp.lt.s32.totalorder %s5473_s18, 3 }
  0x25   : > { %s5583_s26 = scalar_select %p209_p3, %s5461_s15, %s211_s22  }
  0x26   : > { %p298_p6 = pnand %p4556_p2, %p297_p5 }
  0x28   : > { %301 = sbr.rel (%p298_p6) target bundleno = 917 (0x395), region = 44 }
  0x2f   : > { %p350_p7 = scmp.lt.s32.totalorder %s5465_s16, 1  ;;  %s5587_s27 = sld [smem:[#allocation3 + %s5465_s16]]  ;;  %v7237_v0 = vlaneseq  ;;  %vm444_vm0 = vcmask 130048   ;;  %v1281_v50 = vld [vmem:[%s7232_s7] sm:$0xff]  ;;  %v1282_v51 = vld [vmem:[%s7232_s7 + $0x8] sm:$0xff]  ;;  %vm4367_vm14 = vcmask 48128  }
  0x30   : > { %v1296_v52 = vand.u32 4294901760, %v1281_v50  ;;  %v1299_v53 = vand.u32 4294901760, %v1282_v51  ;;  %s7123_s11 = sld [smem:[#allocation4 + %s5465_s16]]  ;;  %vm4363_vm15 = vcmask 48133   ;;  %s347_s22 = sand.u32 1, %s5457_s14  }
  0x31   : > { %s5590_s28 = scalar_select %p350_p7, %s5465_s16, 1  ;;  %v5593_v1 = vshrl.u32 %v7237_v0, 7 }
  0x32   : > { %v5731_v54 = vpack.c.bf16 %v1299_v53, %v1296_v52  ;;  %v1404_v55 = vsub.f32 %v1281_v50, %v1296_v52  ;;  %v1411_v56 = vsub.f32 %v1282_v51, %v1299_v53  ;;  %s7156_s24 = scalar_lea.vmem [#allocation5], %s347_s22 }
  0x33   : > { %s5596_s29 = sshll.u32 %s5590_s28, 5  ;;  %v408_v2 = vadd.s32 16, %v5593_v1  ;;  %v409_v3 = vadd.s32 24, %v5593_v1  ;;  %v407_v4 = vadd.s32 8, %v5593_v1  ;;  %vm682_vm5 = vcmp.lt.s32.totalorder %v5593_v1, 1 }
  0x34   : > { %s5605_s10 = scalar_lea.vmem %s7229_s4, %s5596_s29  ;;  %s5669_s13 = scalar_lea.vmem %s7227_s2, %s5596_s29  ;;  %5070 = vmatprep.subr.bf16.mxu0 %v5731_v54  ;;  %5058 = vmatprep.subr.bf16.mxu1 %v5731_v54  ;;  %v1405_v57 = vand.u32 4294901760, %v1404_v55  ;;  %v1412_v58 = vand.u32 4294901760, %v1411_v56  ;;  %vm691_vm6 = vcmp.lt.s32.totalorder %v5593_v1, 7  ;;  %vm712_vm7 = vcmp.lt.s32.totalorder %v5593_v1, 2 }
  0x35   : > { %v5608_v5 = vld [vmem:[%s5605_s10 + $0x10] sm:$0xff]  ;;  %v5611_v6 = vstv %s5587_s27  ;;  %v5614_v7 = vld [vmem:[%s5605_s10] sm:$0xff]  ;;  %v5617_v8 = vld [vmem:[%s5605_s10 + $0x18] sm:$0xff]  ;;  %5072 = vmatpush3.bf16.msra.mxu0 %v5731_v54  ;;  %5060 = vmatpush3.bf16.msra.mxu1 %v5731_v54  ;;  %vm721_vm8 = vcmp.lt.s32.totalorder %v5593_v1, 6  ;;  %vm742_vm9 = vcmp.lt.s32.totalorder %v5593_v1, 3  ;;  %vm751_vm10 = vcmp.lt.s32.totalorder %v5593_v1, 5  ;;  %s361_s9 = scalar_lea.vmem %s7228_s3, %s5596_s29  ;;  %s391_s30 = scvt.s32.f32 %s5587_s27 }
  0x36   : > { %7292 = vst [vmem:[#allocation9_spill] sm:$0xff] %v5611_v6  ;;  %vm5620_vm1 = vcmp.lt.s32.totalorder %v408_v2, %v5611_v6  ;;  %vm5626_vm2 = vcmp.lt.s32.totalorder %v5593_v1, %v5611_v6  ;;  %vm5631_vm3 = vcmp.lt.s32.totalorder %v409_v3, %v5611_v6  ;;  %v5636_v12 = vld [vmem:[%s5605_s10 + $0x8] sm:$0xff]  ;;  %vm5639_vm4 = vcmp.lt.s32.totalorder %v407_v4, %v5611_v6  ;;  %v5683_v29 = vld [vmem:[%s5669_s13] sm:$0xff]  ;;  %v5694_v34 = vld [vmem:[%s5669_s13 + $0x18] sm:$0xff]  ;;  %s4564_s29 = sshll.u32 %s5590_s28, 2  ;;  %s4571_s27 = sshll.u32 %s5465_s16, 4 }
  0x37   : > { %v534_v14 = vsel %vm5620_vm1, %v5608_v5, 0.0  ;;  %v532_v15 = vsel %vm5626_vm2, %v5614_v7, 0.0  ;;  %v535_v18 = vsel %vm5631_vm3, %v5617_v8, 0.0  ;;  %v533_v19 = vsel %vm5639_vm4, %v5636_v12, 0.0  ;;  %v5680_v28 = vld [vmem:[%s5669_s13 + $0x8] sm:$0xff]  ;;  %v5697_v35 = vld [vmem:[%s5669_s13 + $0x10] sm:$0xff]  ;;  %s380_s0 = scalar_lea.vmem %s7231_s6, %s4564_s29  ;;  %s392_s29 = scvt.s32.f32 %s7123_s11 }
  0x38   : > { %v542_v16 = vsel %vm444_vm0, %v534_v14, -inf  ;;  %v536_v17 = vsel %vm444_vm0, %v532_v15, -inf  ;;  %v545_v20 = vsel %vm444_vm0, %v535_v18, -inf  ;;  %v539_v21 = vsel %vm444_vm0, %v533_v19, -inf  ;;  %s5478_s16 = smov [#allocation5]  }
  0x39   : > { %543 = vmax.xlane.f32.xlu1 %v542_v16  ;;  %537 = vmax.xlane.f32.xlu0 %v536_v17  ;;  %v558_v22 = vsel %vm5639_vm4, %v5636_v12, inf  ;;  %v557_v23 = vsel %vm5626_vm2, %v5614_v7, inf  ;;  %v560_v26 = vsel %vm5631_vm3, %v5617_v8, inf  ;;  %v559_v27 = vsel %vm5620_vm1, %v5608_v5, inf  ;;  %s5397_s20 = sshll.u32 %s5478_s16, 4  ;;  %s5398_s20 = int_to_ptr.vmem [resolvable:$false] %s5397_s20 }
  0x3a   : > { %v564_v24 = vsel %vm444_vm0, %v558_v22, inf  ;;  %v561_v25 = vsel %vm444_vm0, %v557_v23, inf  ;;  %v570_v30 = vsel %vm444_vm0, %v560_v26, inf  ;;  %v567_v31 = vsel %vm444_vm0, %v559_v27, inf }
  0x3b   : > { %v598_v32 = vsel %vm5639_vm4, %v5680_v28, 0.0  ;;  %v597_v33 = vsel %vm5626_vm2, %v5683_v29, 0.0  ;;  %v600_v38 = vsel %vm5631_vm3, %v5694_v34, 0.0  ;;  %v599_v39 = vsel %vm5620_vm1, %v5697_v35, 0.0 }
  0x3c   : > { %v604_v36 = vsel %vm444_vm0, %v598_v32, -inf  ;;  %v601_v37 = vsel %vm444_vm0, %v597_v33, -inf  ;;  %v610_v40 = vsel %vm444_vm0, %v600_v38, -inf  ;;  %v607_v41 = vsel %vm444_vm0, %v599_v39, -inf }
  0x3d   : > { %546 = vmax.xlane.f32.xlu1 %v545_v20  ;;  %540 = vmax.xlane.f32.xlu0 %v539_v21  ;;  %v623_v42 = vsel %vm5639_vm4, %v5680_v28, inf  ;;  %v622_v43 = vsel %vm5626_vm2, %v5683_v29, inf  ;;  %v625_v46 = vsel %vm5631_vm3, %v5694_v34, inf  ;;  %v624_v47 = vsel %vm5620_vm1, %v5697_v35, inf }
  0x3e   : > { %v629_v44 = vsel %vm444_vm0, %v623_v42, inf  ;;  %v626_v45 = vsel %vm444_vm0, %v622_v43, inf  ;;  %v635_v48 = vsel %vm444_vm0, %v625_v46, inf  ;;  %v632_v49 = vsel %vm444_vm0, %v624_v47, inf }
  0x3f   : > { %v1406_v59 = vsub.f32 %v1404_v55, %v1405_v57  ;;  %v1413_v60 = vsub.f32 %v1411_v56, %v1412_v58  ;;  %v5737_v61 = vpack.c.bf16 %v1412_v58, %v1405_v57  ;;  %v5743_v3 = vpack.c.bf16 %v1411_v56, %v1404_v55 }
  0x40   : > { %vm772_vm11 = vcmp.lt.s32.totalorder %v5593_v1, 4 }
  0x41   : > { %565 = vmin.xlane.f32.xlu1 %v564_v24  ;;  %562 = vmin.xlane.f32.xlu0 %v561_v25  ;;  %v1407_v62 = vand.u32 4294901760, %v1406_v59  ;;  %v1414_v63 = vand.u32 4294901760, %v1413_v60 }
  0x42   : > { %5074 = vmatprep.subr.bf16.mxu0 %v5737_v61 }
  0x43   : > { %v5740_v2 = vpack.c.bf16 %v1414_v63, %v1407_v62 }
  0x45   : > { %571 = vmin.xlane.f32.xlu1 %v570_v30  ;;  %568 = vmin.xlane.f32.xlu0 %v567_v31 }
  0x46   : > { %5062 = vmatprep.subr.bf16.mxu1 %v5740_v2 }
  0x49   : > { %605 = vmax.xlane.f32.xlu1 %v604_v36  ;;  %602 = vmax.xlane.f32.xlu0 %v601_v37 }
  0x4d   : > { %611 = vmax.xlane.f32.xlu1 %v610_v40  ;;  %608 = vmax.xlane.f32.xlu0 %v607_v41 }
  0x51   : > { %630 = vmin.xlane.f32.xlu1 %v629_v44  ;;  %627 = vmin.xlane.f32.xlu0 %v626_v45 }
  0x55   : > { %636 = vmin.xlane.f32.xlu1 %v635_v48  ;;  %633 = vmin.xlane.f32.xlu0 %v632_v49 }
  0xc6   : > { %v544_v4 = vpop.xlane.xlu1 %543  ;;  %v538_v14 = vpop.xlane.xlu0 %537 }
  0xca   : > { %v547_v15 = vpop.xlane.xlu1 %546  ;;  %v541_v16 = vpop.xlane.xlu0 %540 }
  0xcb   : > { %v549_v17 = vmax.f32 %v544_v4, %v547_v15  ;;  %v548_v18 = vmax.f32 %v538_v14, %v541_v16 }
  0xcd   : > { %v550_v19 = vmax.f32 %v548_v18, %v549_v17  ;;  %v7235_v18 = vmov 0.0  }
  0xce   : > { %v566_v20 = vpop.xlane.xlu1 %565  ;;  %v563_v21 = vpop.xlane.xlu0 %562 }
  0xcf   : > { %v551_v22 = vrot.slane %v550_v19, 4  ;;  %v573_v26 = vmin.f32 %v563_v21, %v566_v20  ;;  %v5753_v20 = vsel %vm5626_vm2, 1.0, %v7235_v18  ;;  %v5758_v21 = vsel %vm5631_vm3, 1.0, %v7235_v18 }
  0xd0   : > { %7301 = vst [vmem:[#allocation10_spill] sm:$0xff] %v5758_v21  ;;  %vm387_vm2 = vcmask 57344   ;;  %vm4382_vm3 = vcmask 1042432  }
  0xd1   : > { %v552_v23 = vmax.f32 %v550_v19, %v551_v22  ;;  %v5748_v19 = vsel %vm5620_vm1, 1.0, %v7235_v18  ;;  %v5763_v22 = vsel %vm5639_vm4, 1.0, %v7235_v18  ;;  %vm525_vm1 = vcmask 254976  }
  0xd2   : > { %v572_v24 = vpop.xlane.xlu1 %571  ;;  %v569_v25 = vpop.xlane.xlu0 %568  ;;  %vm4394_vm4 = vcmask 1045504  }
  0xd3   : > { %v574_v27 = vmin.f32 %v569_v25, %v572_v24  ;;  %v553_v31 = vrot.slane %v552_v23, 2 }
  0xd5   : > { %v575_v30 = vmin.f32 %v573_v26, %v574_v27  ;;  %v554_v39 = vmax.f32 %v552_v23, %v553_v31 }
  0xd6   : > { %v606_v32 = vpop.xlane.xlu1 %605  ;;  %v603_v33 = vpop.xlane.xlu0 %602 }
  0xd7   : > { %v576_v36 = vrot.slane %v575_v30, 4  ;;  %v613_v38 = vmax.f32 %v603_v33, %v606_v32  ;;  %v555_v46 = vrot.slane %v554_v39, 1 }
  0xd9   : > { %v577_v37 = vmin.f32 %v575_v30, %v576_v36  ;;  %v556_v52 = vmax.f32 %v554_v39, %v555_v46 }
  0xda   : > { %v612_v40 = vpop.xlane.xlu1 %611  ;;  %v609_v41 = vpop.xlane.xlu0 %608 }
  0xdb   : > { %v578_v42 = vrot.slane %v577_v37, 2  ;;  %v614_v43 = vmax.f32 %v609_v41, %v612_v40 }
  0xdd   : > { %v579_v44 = vmin.f32 %v577_v37, %v578_v42  ;;  %v615_v45 = vmax.f32 %v613_v38, %v614_v43 }
  0xde   : > { %v631_v47 = vpop.xlane.xlu1 %630  ;;  %v628_v48 = vpop.xlane.xlu0 %627 }
  0xdf   : > { %v580_v49 = vrot.slane %v579_v44, 1  ;;  %v616_v50 = vrot.slane %v615_v45, 4  ;;  %v638_v53 = vmin.f32 %v628_v48, %v631_v47 }
  0xe1   : > { %v581_v51 = vmin.f32 %v579_v44, %v580_v49  ;;  %v617_v58 = vmax.f32 %v615_v45, %v616_v50 }
  0xe2   : > { %v637_v55 = vpop.xlane.xlu1 %636  ;;  %v634_v56 = vpop.xlane.xlu0 %633 }
  0xe3   : > { %v586_v57 = vsub.f32 %v556_v52, %v581_v51  ;;  %v639_v59 = vmin.f32 %v634_v56, %v637_v55  ;;  %v618_v63 = vrot.slane %v617_v58, 2  ;;  %v582_v9 = vsub.f32 %v5614_v7, %v581_v51 }
  0xe4   : > { %v583_v10 = vsub.f32 %v5636_v12, %v581_v51  ;;  %v584_v25 = vsub.f32 %v5608_v5, %v581_v51  ;;  %v585_v26 = vsub.f32 %v5617_v8, %v581_v51 }
  0xe5   : > { %v587_v60 = vadd.f32 1e-08, %v586_v57  ;;  %v640_v62 = vmin.f32 %v638_v53, %v639_v59  ;;  %v619_v15 = vmax.f32 %v617_v58, %v618_v63 }
  0xe7   : > { %5335 = vrcp.f32 %v587_v60  ;;  %v641_v4 = vrot.slane %v640_v62, 4  ;;  %v620_v23 = vrot.slane %v619_v15, 1 }
  0xe9   : > { %v642_v14 = vmin.f32 %v640_v62, %v641_v4  ;;  %v621_v7 = vmax.f32 %v619_v15, %v620_v23 }
  0xeb   : > { %v643_v16 = vrot.slane %v642_v14, 2 }
  0xed   : > { %v644_v17 = vmin.f32 %v642_v14, %v643_v16 }
  0xef   : > { %v645_v24 = vrot.slane %v644_v17, 1 }
  0xf1   : > { %v5336_v11 = vpop.eup %5335  ;;  %v5770_v27 = vmin.f32 %v644_v17, %v645_v24 }
  0xf2   : > { %v589_v13 = vmul.f32 %v5336_v11, %v582_v9  ;;  %v590_v30 = vmul.f32 %v5336_v11, %v583_v10  ;;  %v591_v31 = vmul.f32 %v5336_v11, %v584_v25  ;;  %v592_v32 = vmul.f32 %v5336_v11, %v585_v26 }
  0xf3   : > { %v647_v12 = vsub.f32 %v5683_v29, %v5770_v27  ;;  %v648_v36 = vsub.f32 %v5680_v28, %v5770_v27  ;;  %v649_v38 = vsub.f32 %v5697_v35, %v5770_v27  ;;  %v650_v39 = vsub.f32 %v5694_v34, %v5770_v27 }
  0xf4   : > { %v5780_v5 = vmul.f32 %v5753_v20, %v589_v13  ;;  %v5783_v8 = vmul.f32 %v5763_v22, %v590_v30  ;;  %v5786_v33 = vmul.f32 %v5758_v21, %v592_v32  ;;  %v5791_v37 = vmul.f32 %v5748_v19, %v591_v31 }
  0xf5   : > { %v651_v40 = vsub.f32 %v621_v7, %v5770_v27 }
  0xf6   : > { %v674_v41 = vmul.f32 0.26601174, %v5780_v5  ;;  %v678_v42 = vrot.slane %v5780_v5, 7  ;;  %v681_v43 = vrot.slane %v5786_v33, 7  ;;  %v687_v44 = vrot.slane %v5780_v5, 1 }
  0xf7   : > { %v652_v45 = vadd.f32 1e-08, %v651_v40  ;;  %v688_v46 = vrot.slane %v5783_v8, 1  ;;  %v708_v47 = vrot.slane %v5780_v5, 6  ;;  %v711_v48 = vrot.slane %v5786_v33, 6 }
  0xf8   : > { %v686_v49 = vsel %vm682_vm5, %v681_v43, %v678_v42  ;;  %v717_v50 = vrot.slane %v5780_v5, 2  ;;  %v718_v51 = vrot.slane %v5783_v8, 2  ;;  %v738_v52 = vrot.slane %v5780_v5, 5 }
  0xf9   : > { %5337 = vrcp.f32 %v652_v45  ;;  %v694_v53 = vsel %vm691_vm6, %v687_v44, %v688_v46  ;;  %v716_v55 = vsel %vm712_vm7, %v711_v48, %v708_v47  ;;  %v739_v56 = vrot.slane %v5783_v8, 5 }
  0xfa   : > { %v696_v57 = vadd.f32 %v694_v53, %v686_v49  ;;  %v724_v58 = vsel %vm721_vm8, %v717_v50, %v718_v51  ;;  %v740_v59 = vrot.slane %v5791_v37, 5  ;;  %v741_v60 = vrot.slane %v5786_v33, 5 }
  0xfb   : > { %v726_v62 = vadd.f32 %v724_v58, %v716_v55  ;;  %v745_v63 = vsel %vm742_vm9, %v738_v52, %v739_v56  ;;  %v747_v4 = vrot.slane %v5780_v5, 3  ;;  %v748_v14 = vrot.slane %v5783_v8, 3 }
  0xfc   : > { %v700_v15 = vmul.f32 0.21300554, %v696_v57  ;;  %v5842_v16 = vsel %vm742_vm9, %v740_v59, %v741_v60  ;;  %v5846_v17 = vsel %vm742_vm9, %v741_v60, %v738_v52  ;;  %v749_v23 = vrot.slane %v5791_v37, 3 }
  0xfd   : > { %v730_v24 = vmul.f32 0.1093607, %v726_v62  ;;  %v750_v9 = vrot.slane %v5786_v33, 3  ;;  %v754_v10 = vsel %vm751_vm10, %v747_v4, %v748_v14  ;;  %v768_v25 = vrot.slane %v5780_v5, 4 }
  0xfe   : > { %v704_v26 = vadd.f32 %v700_v15, %v674_v41  ;;  %v5855_v11 = vsel %vm751_vm10, %v748_v14, %v749_v23  ;;  %v756_v13 = vadd.f32 %v754_v10, %v5846_v17  ;;  %v769_v30 = vrot.slane %v5783_v8, 4 }
  0xff   : > { %v755_v31 = vsel %vm751_vm10, %v750_v9, %v747_v4  ;;  %v757_v32 = vadd.f32 %v5855_v11, %v745_v63  ;;  %v770_v7 = vrot.slane %v5791_v37, 4  ;;  %v771_v40 = vrot.slane %v5786_v33, 4 }
 0x100   : > { %v734_v45 = vadd.f32 %v730_v24, %v704_v26  ;;  %v759_v41 = vadd.f32 %v755_v31, %v5842_v16  ;;  %v760_v49 = vmul.f32 0.036000773, %v756_v13  ;;  %v775_v52 = vsel %vm772_vm11, %v768_v25, %v769_v30 }
 0x101   : > { %v761_v53 = vmul.f32 0.036000773, %v757_v32  ;;  %v773_v55 = vsel %vm772_vm11, %v770_v7, %v771_v40  ;;  %v774_v57 = vsel %vm772_vm11, %v769_v30, %v770_v7  ;;  %v776_v58 = vsel %vm772_vm11, %v771_v40, %v768_v25 }
 0x102   : > { %v5873_v60 = vmul.f32 0.036000773, %v759_v41  ;;  %v764_v62 = vadd.f32 %v760_v49, %v734_v45  ;;  %v777_v4 = vadd.f32 %v776_v58, %v775_v52  ;;  %v778_v14 = vadd.f32 %v775_v52, %v774_v57 }
 0x103   : > { %v5338_v15 = vpop.eup %5337  ;;  %v5875_v24 = vadd.f32 %v776_v58, %v773_v55  ;;  %v789_v26 = vadd.f32 %v755_v31, %v745_v63  ;;  %v675_v13 = vmul.f32 0.26601174, %v5783_v8  ;;  %v679_v32 = vrot.slane %v5783_v8, 7 }
 0x104   : > { %v654_v30 = vmul.f32 %v5338_v15, %v647_v12  ;;  %v655_v25 = vmul.f32 %v5338_v15, %v648_v36  ;;  %v656_v7 = vmul.f32 %v5338_v15, %v649_v38  ;;  %v657_v63 = vmul.f32 %v5338_v15, %v650_v39 }
 0x105   : > { %v781_v31 = vmul.f32 0.0075987587, %v777_v4  ;;  %v793_v40 = vmul.f32 0.0010283804, %v789_v26  ;;  %v685_v29 = vsel %vm682_vm5, %v678_v42, %v679_v32  ;;  %v689_v12 = vrot.slane %v5791_v37, 1 }
 0x106   : > { %v5897_v28 = vmul.f32 %v5753_v20, %v654_v30  ;;  %v5900_v36 = vmul.f32 %v5763_v22, %v655_v25  ;;  %v5903_v35 = vmul.f32 %v5748_v19, %v656_v7  ;;  %v5906_v34 = vmul.f32 %v5758_v21, %v657_v63 }
 0x107   : > { %v785_v27 = vadd.f32 %v781_v31, %v764_v62  ;;  %v693_v38 = vsel %vm691_vm6, %v688_v46, %v689_v12  ;;  %v709_v39 = vrot.slane %v5783_v8, 6  ;;  %v719_v42 = vrot.slane %v5791_v37, 2 }
 0x108   : > { %v697_v45 = vadd.f32 %v693_v38, %v685_v29  ;;  %v744_v41 = vsel %vm742_vm9, %v739_v56, %v740_v59  ;;  %v752_v49 = vsel %vm751_vm10, %v749_v23, %v750_v9  ;;  %v782_v52 = vmul.f32 0.0075987587, %v778_v14 }
 0x109   : > { %v797_v58 = vadd.f32 %v793_v40, %v785_v27  ;;  %v715_v62 = vsel %vm712_vm7, %v708_v47, %v709_v39  ;;  %v723_v46 = vsel %vm721_vm8, %v718_v51, %v719_v42  ;;  %v758_v4 = vadd.f32 %v752_v49, %v744_v41 }
 0x10a   : > { %v701_v15 = vmul.f32 0.21300554, %v697_v45  ;;  %v727_v26 = vadd.f32 %v723_v46, %v715_v62  ;;  %v790_v30 = vadd.f32 %v754_v10, %v744_v41  ;;  %v676_v56 = vmul.f32 0.26601174, %v5791_v37 }
 0x10b   : > { %v1284_v59 = vsel %vm444_vm0, %v797_v58, 0  ;;  %v762_v23 = vmul.f32 0.036000773, %v758_v4  ;;  %v680_v9 = vrot.slane %v5791_v37, 7  ;;  %v690_v14 = vrot.slane %v5786_v33, 1 }
 0x10c   : > { %v5930_v25 = vand.u32 4294901760, %v1284_v59  ;;  %v705_v47 = vadd.f32 %v701_v15, %v675_v13  ;;  %v731_v7 = vmul.f32 0.1093607, %v727_v26  ;;  %v794_v63 = vmul.f32 0.0010283804, %v790_v30 }
 0x10d   : > { %v684_v51 = vsel %vm682_vm5, %v679_v32, %v680_v9  ;;  %v692_v10 = vsel %vm691_vm6, %v689_v12, %v690_v14  ;;  %v710_v31 = vrot.slane %v5791_v37, 6  ;;  %v720_v40 = vrot.slane %v5786_v33, 2 }
 0x10e   : > { %v5939_v29 = vsub.f32 %v1284_v59, %v5930_v25  ;;  %v735_v27 = vadd.f32 %v731_v7, %v705_v47  ;;  %v698_v38 = vadd.f32 %v692_v10, %v684_v51  ;;  %v779_v45 = vadd.f32 %v774_v57, %v773_v55 }
 0x10f   : > { %v714_v13 = vsel %vm712_vm7, %v709_v39, %v710_v31  ;;  %v722_v41 = vsel %vm721_vm8, %v719_v42, %v720_v40  ;;  %v791_v32 = vadd.f32 %v5855_v11, %v5842_v16  ;;  %v677_v12 = vmul.f32 0.26601174, %v5786_v33 }
 0x110   : > { %v1364_v58 = vand.u32 4294901760, %v5939_v29  ;;  %v765_v62 = vadd.f32 %v761_v53, %v735_v27  ;;  %v702_v46 = vmul.f32 0.21300554, %v698_v38  ;;  %v728_v4 = vadd.f32 %v722_v41, %v714_v13 }
 0x111   : > { %v783_v15 = vmul.f32 0.0075987587, %v779_v45  ;;  %v795_v26 = vmul.f32 0.0010283804, %v791_v32  ;;  %v683_v55 = vsel %vm682_vm5, %v680_v9, %v681_v43  ;;  %v695_v57 = vsel %vm691_vm6, %v690_v14, %v687_v44 }
 0x112   : > { %4791 = vmatprep.mubr.f32.mxu0 %v1364_v58  ;;  %v786_v16 = vadd.f32 %v782_v52, %v765_v62  ;;  %v706_v11 = vadd.f32 %v702_v46, %v676_v56  ;;  %v732_v39 = vmul.f32 0.1093607, %v728_v4  ;;  %v1365_v53 = vsub.f32 %v5939_v29, %v1364_v58 }
 0x113   : > { %v699_v42 = vadd.f32 %v695_v57, %v683_v55  ;;  %v713_v30 = vsel %vm712_vm7, %v710_v31, %v711_v48  ;;  %v725_v43 = vsel %vm721_vm8, %v720_v40, %v717_v50  ;;  %v784_v59 = vmul.f32 0.0075987587, %v5875_v24 }
 0x114   : > { %v798_v44 = vadd.f32 %v794_v63, %v786_v16  ;;  %v736_v9 = vadd.f32 %v732_v39, %v706_v11  ;;  %v1366_v52 = vand.u32 4294901760, %v1365_v53  ;;  %v729_v56 = vadd.f32 %v725_v43, %v713_v30 }
 0x115   : > { %v703_v14 = vmul.f32 0.21300554, %v699_v42  ;;  %v792_v47 = vadd.f32 %v752_v49, %v5846_v17  ;;  %v5970_v7 = vmul.f32 %v5780_v5, %v5780_v5  ;;  %v5974_v48 = vmul.f32 %v5783_v8, %v5783_v8 }
 0x116   : > { %v1287_v51 = vsel %vm444_vm0, %v798_v44, 0  ;;  %v766_v50 = vadd.f32 %v762_v23, %v736_v9  ;;  %4761 = vmatprep.mubr.f32.mxu1 %v1366_v52  ;;  %v733_v24 = vmul.f32 0.1093607, %v729_v56  ;;  %v5979_v63 = vmul.f32 %v5791_v37, %v5791_v37 }
 0x117   : > { %v5981_v10 = vand.u32 4294901760, %v1287_v51  ;;  %v707_v17 = vadd.f32 %v703_v14, %v677_v12  ;;  %v796_v49 = vmul.f32 0.0010283804, %v792_v47  ;;  %v5985_v31 = vmul.f32 %v5786_v33, %v5786_v33 }
 0x118   : > { %v787_v40 = vadd.f32 %v783_v15, %v766_v50  ;;  %v921_v27 = vmul.f32 0.26601174, %v5970_v7  ;;  %v922_v38 = vmul.f32 0.26601174, %v5974_v48  ;;  %v925_v23 = vrot.slane %v5970_v7, 7 }
 0x119   : > { %v5991_v45 = vsub.f32 %v1287_v51, %v5981_v10  ;;  %v737_v13 = vadd.f32 %v733_v24, %v707_v17  ;;  %v926_v41 = vrot.slane %v5974_v48, 7  ;;  %v7241_v32 = vrot.slane %v5985_v31, 7 }
 0x11a   : > { %v799_v12 = vadd.f32 %v795_v26, %v787_v40  ;;  %v7240_v58 = vrot.slane %v5970_v7, 1  ;;  %v934_v62 = vrot.slane %v5974_v48, 1  ;;  %v935_v46 = vrot.slane %v5979_v63, 1 }
 0x11b   : > { %v1374_v4 = vand.u32 4294901760, %v5991_v45  ;;  %v767_v15 = vadd.f32 %v5873_v60, %v737_v13  ;;  %v931_v55 = vsel %vm682_vm5, %v925_v23, %v926_v41  ;;  %v932_v26 = vsel %vm682_vm5, %v7241_v32, %v925_v23 }
 0x11c   : > { %v1290_v57 = vsel %vm444_vm0, %v799_v12, 0  ;;  %v938_v16 = vsel %vm691_vm6, %v934_v62, %v935_v46  ;;  %v939_v60 = vsel %vm691_vm6, %v7240_v58, %v934_v62  ;;  %v953_v11 = vrot.slane %v5970_v7, 6 }
 0x11d   : > { %4792 = vmatmul.mubr.f32.vlgmr.msra.gmra.mrb[0].mxu0 %v1374_v4  ;;  %v6018_v39 = vand.u32 4294901760, %v1290_v57  ;;  %v1375_v53 = vsub.f32 %v5991_v45, %v1374_v4  ;;  %v788_v42 = vadd.f32 %v784_v59, %v767_v15  ;;  %v941_v30 = vadd.f32 %v939_v60, %v932_v26 }
 0x11e   : > { %5076 = vmatpush3.bf16.msra.mxu0 %v5737_v61  ;;  %v942_v43 = vadd.f32 %v938_v16, %v931_v55  ;;  %v7261_v44 = vrot.slane %v5974_v48, 6  ;;  %v7239_v9 = vrot.slane %v5985_v31, 6  ;;  %v7238_v52 = vrot.slane %v5970_v7, 2 }
 0x11f   : > { %v6026_v56 = vsub.f32 %v1290_v57, %v6018_v39  ;;  %v1376_v14 = vand.u32 4294901760, %v1375_v53  ;;  %v800_v47 = vadd.f32 %v796_v49, %v788_v42  ;;  %5078 = vmatprep.subr.bf16.mxu0 %v5731_v54  ;;  %v945_v51 = vmul.f32 0.21300554, %v941_v30 }
 0x120   : > { %v946_v50 = vmul.f32 0.21300554, %v942_v43  ;;  %v959_v59 = vsel %vm712_vm7, %v953_v11, %v7261_v44  ;;  %v960_v24 = vsel %vm712_vm7, %v7239_v9, %v953_v11  ;;  %v962_v17 = vrot.slane %v5974_v48, 2 }
 0x121   : > { %v1384_v40 = vand.u32 4294901760, %v6026_v56  ;;  %4762 = vmatmul.mubr.f32.vlgmr.msra.gmra.mrb[0].mxu1 %v1376_v14  ;;  %v1293_v49 = vsel %vm444_vm0, %v800_v47, 0  ;;  %v949_v23 = vadd.f32 %v945_v51, %v921_v27  ;;  %v7259_v13 = vrot.slane %v5979_v63, 2 }
 0x122   : > { %5064 = vmatpush3.bf16.msra.mxu1 %v5740_v2  ;;  %v6042_v12 = vand.u32 4294901760, %v1293_v49  ;;  %v950_v62 = vadd.f32 %v946_v50, %v922_v38  ;;  %v967_v4 = vsel %vm721_vm8, %v7238_v52, %v962_v17  ;;  %v981_v15 = vrot.slane %v5970_v7, 5 }
 0x123   : > { %4794 = vmatprep.mubr.f32.mxu0 %v1384_v40  ;;  %v1385_v55 = vsub.f32 %v6026_v56, %v1384_v40  ;;  %5066 = vmatprep.subr.bf16.mxu1 %v5743_v3  ;;  %v966_v27 = vsel %vm721_vm8, %v962_v17, %v7259_v13  ;;  %v969_v26 = vadd.f32 %v967_v4, %v960_v24  ;;  %v982_v38 = vrot.slane %v5974_v48, 5 }
 0x124   : > { %v6057_v57 = vsub.f32 %v1293_v49, %v6042_v12  ;;  %v970_v16 = vadd.f32 %v966_v27, %v959_v59  ;;  %v983_v60 = vrot.slane %v5979_v63, 5  ;;  %v984_v11 = vrot.slane %v5985_v31, 5 }
 0x125   : > { %v1386_v53 = vand.u32 4294901760, %v1385_v55  ;;  %v973_v42 = vmul.f32 0.1093607, %v969_v26  ;;  %v987_v30 = vsel %vm742_vm9, %v981_v15, %v982_v38  ;;  %v989_v43 = vrot.slane %v5970_v7, 3 }
 0x126   : > { %v1394_v14 = vand.u32 4294901760, %v6057_v57  ;;  %v974_v47 = vmul.f32 0.1093607, %v970_v16  ;;  %v6069_v51 = vsel %vm742_vm9, %v982_v38, %v983_v60  ;;  %v6075_v50 = vsel %vm742_vm9, %v984_v11, %v981_v15 }
 0x127   : > { %4764 = vmatprep.mubr.f32.mxu1 %v1386_v53  ;;  %v977_v59 = vadd.f32 %v973_v42, %v949_v23  ;;  %v990_v24 = vrot.slane %v5974_v48, 3  ;;  %v991_v17 = vrot.slane %v5979_v63, 3  ;;  %v992_v40 = vrot.slane %v5985_v31, 3 }
 0x128   : > { %4795 = vmatmul.mubr.f32.gmra.mrb[2].mxu0 %v1394_v14  ;;  %v1395_v49 = vsub.f32 %v6057_v57, %v1394_v14  ;;  %v978_v4 = vadd.f32 %v974_v47, %v950_v62  ;;  %v1009_v55 = vrot.slane %v5970_v7, 4  ;;  %v1010_v27 = vrot.slane %v5974_v48, 4 }
 0x129   : > { %4801 = vmatprep.mubr.f32.mxu0 %v5930_v25  ;;  %v6088_v23 = vsel %vm751_vm10, %v990_v24, %v991_v17  ;;  %v995_v15 = vsel %vm751_vm10, %v989_v43, %v990_v24  ;;  %v6096_v62 = vsel %vm751_vm10, %v992_v40, %v989_v43  ;;  %v7242_v26 = vrot.slane %v5979_v63, 4 }
 0x12a   : > { %v1396_v38 = vand.u32 4294901760, %v1395_v49  ;;  %v997_v16 = vadd.f32 %v995_v15, %v6075_v50  ;;  %v998_v53 = vadd.f32 %v6088_v23, %v987_v30  ;;  %v7257_v42 = vrot.slane %v5985_v31, 4 }
 0x12b   : > { %v6106_v14 = vsel %vm772_vm11, %v1010_v27, %v7242_v26  ;;  %v1015_v47 = vsel %vm772_vm11, %v1009_v55, %v1010_v27  ;;  %v1029_v43 = vadd.f32 %v6096_v62, %v987_v30  ;;  %v1030_v24 = vadd.f32 %v995_v15, %v6069_v51 }
 0x12c   : > { %4765 = vmatmul.mubr.f32.gmra.mrb[2].mxu1 %v1396_v38  ;;  %4802 = vmatmul.mubr.f32.vlgmr.msra.gmra.mrb[0].mxu0 %v5981_v10  ;;  %v1001_v49 = vmul.f32 0.036000773, %v997_v16  ;;  %v1002_v18 = vmul.f32 0.036000773, %v998_v53  ;;  %v6117_v0 = vsel %vm772_vm11, %v7257_v42, %v1009_v55  ;;  %v1018_v52 = vadd.f32 %v1015_v47, %v6106_v14 }
 0x12d   : > { %4771 = vmatprep.mubr.f32.mxu1 %v5930_v25  ;;  %4804 = vmatprep.mubr.f32.mxu0 %v6018_v39  ;;  %v1017_v30 = vadd.f32 %v6117_v0, %v1015_v47  ;;  %v1033_v27 = vmul.f32 0.0010283804, %v1029_v43  ;;  %v1034_v15 = vmul.f32 0.0010283804, %v1030_v24  ;;  %v801_v38 = vmul.f32 0.26601174, %v5897_v28 }
 0x12e   : > { %5080 = vmatpush3.bf16.msra.mxu0 %v5731_v54  ;;  %v1005_v16 = vadd.f32 %v1001_v49, %v977_v59  ;;  %v1006_v53 = vadd.f32 %v1002_v18, %v978_v4  ;;  %v1022_v9 = vmul.f32 0.0075987587, %v1018_v52  ;;  %v802_v55 = vmul.f32 0.26601174, %v5900_v36 }
 0x12f   : > { %5106 = vmatprep.subr.bf16.mxu0 %v5731_v54  ;;  %v1021_v58 = vmul.f32 0.0075987587, %v1017_v30  ;;  %v805_v32 = vrot.slane %v5897_v28, 7  ;;  %v7244_v26 = vrot.slane %v5900_v36, 7  ;;  %v7243_v47 = vrot.slane %v5906_v34, 7 }
 0x130   : > { %4772 = vmatmul.mubr.f32.vlgmr.msra.gmra.mrb[0].mxu1 %v5981_v10  ;;  %4805 = vmatmul.mubr.f32.gmra.mrb[2].mxu0 %v6042_v12  ;;  %v1026_v43 = vadd.f32 %v1022_v9, %v1006_v53  ;;  %v7245_v59 = vrot.slane %v5897_v28, 1  ;;  %v814_v18 = vrot.slane %v5900_v36, 1  ;;  %v7256_v52 = vrot.slane %v5903_v35, 1 }
 0x131   : > { %5068 = vmatpush3.bf16.msra.mxu1 %v5743_v3  ;;  %4774 = vmatprep.mubr.f32.mxu1 %v6018_v39  ;;  %v1025_v4 = vadd.f32 %v1021_v58, %v1005_v16  ;;  %v811_v24 = vsel %vm682_vm5, %v805_v32, %v7244_v26  ;;  %v812_v9 = vsel %vm682_vm5, %v7243_v47, %v805_v32  ;;  %v833_v49 = vrot.slane %v5897_v28, 6 }
 0x132   : > { %4811 = vmatprep.mubr.f32.mxu0 %v5930_v25  ;;  %5082 = vmatprep.subr.bf16.mxu1 %v5731_v54  ;;  %v1038_v30 = vadd.f32 %v1034_v15, %v1026_v43  ;;  %v818_v58 = vsel %vm691_vm6, %v814_v18, %v7256_v52  ;;  %v819_v16 = vsel %vm691_vm6, %v7245_v59, %v814_v18  ;;  %v7252_v53 = vrot.slane %v5900_v36, 6 }
 0x133   : > { %v1037_v32 = vadd.f32 %v1033_v27, %v1025_v4  ;;  %v821_v47 = vadd.f32 %v819_v16, %v812_v9  ;;  %v822_v26 = vadd.f32 %v818_v58, %v811_v24  ;;  %v7248_v25 = vrot.slane %v5906_v34, 6 }
 0x134   : > { %4775 = vmatmul.mubr.f32.gmra.mrb[2].mxu1 %v6042_v12  ;;  %4812 = vmatmul.mubr.f32.vlgmr.msra.gmra.mrb[0].mxu0 %v5981_v10  ;;  %v2487_v15 = vsel %vm444_vm0, %v1038_v30, 0  ;;  %v839_v43 = vsel %vm712_vm7, %v833_v49, %v7252_v53  ;;  %v7246_v18 = vrot.slane %v5897_v28, 2  ;;  %v842_v59 = vrot.slane %v5900_v36, 2 }
 0x135   : > { %4781 = vmatprep.mubr.f32.mxu1 %v5939_v29  ;;  %4814 = vmatprep.mubr.f32.mxu0 %v6018_v39  ;;  %v2484_v27 = vsel %vm444_vm0, %v1037_v32, 0  ;;  %v6170_v4 = vand.u32 4294901760, %v2487_v15  ;;  %v825_v10 = vmul.f32 0.21300554, %v821_v47  ;;  %v826_v24 = vmul.f32 0.21300554, %v822_v26 }
 0x136   : > { %5108 = vmatpush3.bf16.msra.mxu0 %v5731_v54  ;;  %v6173_v9 = vand.u32 4294901760, %v2484_v27  ;;  %v840_v30 = vsel %vm712_vm7, %v7248_v25, %v833_v49  ;;  %v7249_v58 = vrot.slane %v5903_v35, 2  ;;  %v847_v29 = vsel %vm721_vm8, %v7246_v18, %v842_v59 }
 0x137   : > { %v6185_v39 = vsub.f32 %v2487_v15, %v6170_v4  ;;  %v829_v26 = vadd.f32 %v825_v10, %v801_v38  ;;  %v830_v47 = vadd.f32 %v826_v24, %v802_v55  ;;  %v849_v16 = vadd.f32 %v847_v29, %v840_v30  ;;  %5110 = vmatprep.subr.bf16.mxu0 %v5740_v2 }
 0x138   : > { %4782 = vmatmul.mubr.f32.vlgmr.msra.gmra.mrb[0].mxu1 %v5991_v45  ;;  %4815 = vmatmul.mubr.f32.gmra.mrb[2].mxu0 %v6042_v12  ;;  %v6191_v49 = vsub.f32 %v2484_v27, %v6173_v9  ;;  %v846_v32 = vsel %vm721_vm8, %v842_v59, %v7249_v58  ;;  %v861_v15 = vrot.slane %v5897_v28, 5  ;;  %v862_v38 = vrot.slane %v5900_v36, 5 }
 0x139   : > { %5084 = vmatpush3.bf16.msra.mxu1 %v5731_v54  ;;  %4784 = vmatprep.mubr.f32.mxu1 %v6026_v56  ;;  %v7247_v45 = vand.u32 4294901760, %v6185_v39  ;;  %v850_v55 = vadd.f32 %v846_v32, %v839_v43  ;;  %v853_v12 = vmul.f32 0.1093607, %v849_v16  ;;  %v7253_v27 = vrot.slane %v5903_v35, 5 }
 0x13a   : > { %v7250_v10 = vand.u32 4294901760, %v6191_v49  ;;  %v7254_v24 = vrot.slane %v5906_v34, 5  ;;  %v867_v59 = vsel %vm742_vm9, %v861_v15, %v862_v38  ;;  %v869_v30 = vrot.slane %v5897_v28, 3  ;;  %5086 = vmatprep.subr.bf16.mxu1 %v5740_v2 }
 0x13b   : > { %v2575_v56 = vsub.f32 %v6185_v39, %v7247_v45  ;;  %v854_v29 = vmul.f32 0.1093607, %v850_v55  ;;  %v857_v43 = vadd.f32 %v853_v12, %v829_v26  ;;  %v6216_v16 = vsel %vm742_vm9, %v862_v38, %v7253_v27 }
 0x13c   : > { %v2565_v32 = vsub.f32 %v6191_v49, %v7250_v10  ;;  %4785 = vmatmul.mubr.f32.gmra.mrb[2].mxu1 %v6057_v57  ;;  %v6226_v18 = vsel %vm742_vm9, %v7254_v24, %v861_v15  ;;  %v870_v26 = vrot.slane %v5900_v36, 3  ;;  %v7251_v55 = vrot.slane %v5903_v35, 3 }
 0x13d   : > { %v2576_v12 = vand.u32 4294901760, %v2575_v56  ;;  %v858_v45 = vadd.f32 %v854_v29, %v830_v47  ;;  %v7255_v38 = vrot.slane %v5906_v34, 3  ;;  %v889_v25 = vrot.slane %v5897_v28, 4 }
 0x13e   : > { %v2566_v58 = vand.u32 4294901760, %v2565_v32  ;;  %v6236_v57 = vsel %vm751_vm10, %v870_v26, %v7251_v55  ;;  %v875_v15 = vsel %vm751_vm10, %v869_v30, %v870_v26  ;;  %v890_v10 = vrot.slane %v5900_v36, 4 }
 0x13f   : > { %v6245_v47 = vsel %vm751_vm10, %v7255_v38, %v869_v30  ;;  %v877_v56 = vadd.f32 %v875_v15, %v6226_v18  ;;  %v878_v29 = vadd.f32 %v6236_v57, %v867_v59  ;;  %v7258_v32 = vrot.slane %v5903_v35, 4 }
 0x140   : > { %4881 = vmatprep.mubr.f32.mxu0 %v2566_v58  ;;  %v7260_v55 = vrot.slane %v5906_v34, 4  ;;  %v895_v26 = vsel %vm772_vm11, %v889_v25, %v890_v10  ;;  %v909_v53 = vadd.f32 %v6245_v47, %v867_v59  ;;  %v910_v27 = vadd.f32 %v875_v15, %v6216_v16 }
 0x141   : > { %4882 = vmatmul.mubr.f32.vlgmr.msra.gmra.mrb[4].mxu0 %v2576_v12  ;;  %v881_v24 = vmul.f32 0.036000773, %v877_v56  ;;  %v882_v30 = vmul.f32 0.036000773, %v878_v29  ;;  %v6259_v38 = vsel %vm772_vm11, %v890_v10, %v7258_v32  ;;  %v923_v58 = vmul.f32 0.26601174, %v5979_v63 }
 0x142   : > { %v6266_v52 = vsel %vm772_vm11, %v7260_v55, %v889_v25  ;;  %v898_v59 = vadd.f32 %v895_v26, %v6259_v38  ;;  %v913_v15 = vmul.f32 0.0010283804, %v909_v53  ;;  %v914_v12 = vmul.f32 0.0010283804, %v910_v27  ;;  %5112 = vmatpush3.bf16.msra.mxu0 %v5740_v2 }
 0x143   : > { %v885_v56 = vadd.f32 %v881_v24, %v857_v43  ;;  %v886_v29 = vadd.f32 %v882_v30, %v858_v45  ;;  %v897_v42 = vadd.f32 %v6266_v52, %v895_v26  ;;  %v927_v10 = vrot.slane %v5979_v63, 7  ;;  %5114 = vmatprep.subr.bf16.mxu0 %v5743_v3 }
 0x144   : > { %v902_v32 = vmul.f32 0.0075987587, %v898_v59  ;;  %v936_v13 = vrot.slane %v5985_v31, 1  ;;  %v955_v25 = vrot.slane %v5979_v63, 6  ;;  %v964_v55 = vrot.slane %v5985_v31, 2 }
 0x145   : > { %v901_v44 = vmul.f32 0.0075987587, %v897_v42  ;;  %v930_v53 = vsel %vm682_vm5, %v926_v41, %v927_v10  ;;  %v985_v45 = vsel %vm742_vm9, %v983_v60, %v984_v11  ;;  %v993_v27 = vsel %vm751_vm10, %v991_v17, %v992_v40 }
 0x146   : > { %v906_v42 = vadd.f32 %v902_v32, %v886_v29  ;;  %v937_v41 = vsel %vm691_vm6, %v935_v46, %v936_v13  ;;  %v7302_v24 = vrot.slane %v5974_v48, 6  ;;  %v7303_v60 = vrot.slane %v5979_v63, 2 }
 0x147   : > { %v905_v26 = vadd.f32 %v901_v44, %v885_v56  ;;  %v943_v30 = vadd.f32 %v937_v41, %v930_v53  ;;  %v999_v17 = vadd.f32 %v993_v27, %v6069_v51  ;;  %v1000_v40 = vadd.f32 %v6096_v62, %v985_v45 }
 0x148   : > { %v958_v43 = vsel %vm712_vm7, %v7302_v24, %v955_v25  ;;  %v965_v11 = vsel %vm721_vm8, %v7303_v60, %v964_v55  ;;  %v7304_v32 = vrot.slane %v5985_v31, 4  ;;  %v7305_v46 = vrot.slane %v5979_v63, 4 }
 0x149   : > { %v971_v59 = vadd.f32 %v965_v11, %v958_v43  ;;  %v1031_v29 = vadd.f32 %v6088_v23, %v985_v45  ;;  %v918_v24 = vadd.f32 %v914_v12, %v906_v42  ;;  %v917_v6 = vadd.f32 %v913_v15, %v905_v26 }
 0x14a   : > { %v1013_v48 = vsel %vm772_vm11, %v7305_v46, %v7304_v32  ;;  %v947_v21 = vmul.f32 0.21300554, %v943_v30  ;;  %v1003_v44 = vmul.f32 0.036000773, %v999_v17  ;;  %v1004_v56 = vmul.f32 0.036000773, %v1000_v40 }
 0x14b   : > { %v975_v60 = vmul.f32 0.1093607, %v971_v59  ;;  %v1019_v53 = vadd.f32 %v6106_v14, %v1013_v48  ;;  %v1035_v51 = vmul.f32 0.0010283804, %v1031_v29  ;;  %v1887_v62 = vsel %vm444_vm0, %v918_v24, 0 }
 0x14c   : > { %v1884_v41 = vsel %vm444_vm0, %v917_v6, 0  ;;  %v951_v43 = vadd.f32 %v947_v21, %v923_v58  ;;  %v6316_v63 = vand.u32 4294901760, %v1887_v62  ;;  %v924_v11 = vmul.f32 0.26601174, %v5985_v31 }
 0x14d   : > { %v6319_v32 = vand.u32 4294901760, %v1884_v41  ;;  %v1023_v23 = vmul.f32 0.0075987587, %v1019_v53  ;;  %v7306_v15 = vrot.slane %v5985_v31, 7  ;;  %v7307_v14 = vrot.slane %v5970_v7, 1 }
 0x14e   : > { %v979_v42 = vadd.f32 %v975_v60, %v951_v43  ;;  %v6330_v6 = vsub.f32 %v1887_v62, %v6316_v63  ;;  %v7308_v58 = vrot.slane %v5985_v31, 6  ;;  %v1032_v17 = vadd.f32 %v993_v27, %v6075_v50 }
 0x14f   : > { %v929_v12 = vsel %vm682_vm5, %v927_v10, %v7306_v15  ;;  %v940_v45 = vsel %vm691_vm6, %v936_v13, %v7307_v14  ;;  %v6337_v30 = vsub.f32 %v1884_v41, %v6319_v32  ;;  %v7309_v10 = vrot.slane %v5970_v7, 2 }
 0x150   : > { %v944_v21 = vadd.f32 %v940_v45, %v929_v12  ;;  %v957_v26 = vsel %vm712_vm7, %v955_v25, %v7308_v58  ;;  %v1020_v13 = vadd.f32 %v6117_v0, %v1013_v48  ;;  %v1007_v40 = vadd.f32 %v1003_v44, %v979_v42 }
 0x151   : > { %v968_v59 = vsel %vm721_vm8, %v964_v55, %v7309_v10  ;;  %v1974_v46 = vand.u32 4294901760, %v6330_v6  ;;  %v1964_v24 = vand.u32 4294901760, %v6337_v30  ;;  %v1036_v60 = vmul.f32 0.0010283804, %v1032_v17 }
 0x152   : > { %v948_v29 = vmul.f32 0.21300554, %v944_v21  ;;  %v972_v31 = vadd.f32 %v968_v59, %v957_v26  ;;  %v1024_v25 = vmul.f32 0.0075987587, %v1020_v13  ;;  %v807_v53 = vrot.slane %v5903_v35, 7 }
 0x153   : > { %v1027_v62 = vadd.f32 %v1023_v23, %v1007_v40  ;;  %v1975_v7 = vsub.f32 %v6330_v6, %v1974_v46  ;;  %v1965_v50 = vsub.f32 %v6337_v30, %v1964_v24  ;;  %v803_v27 = vmul.f32 0.26601174, %v5903_v35 }
 0x154   : > { %v952_v55 = vadd.f32 %v948_v29, %v924_v11  ;;  %v976_v0 = vmul.f32 0.1093607, %v972_v31  ;;  %v7310_v48 = vrot.slane %v5900_v36, 7  ;;  %v816_v41 = vrot.slane %v5906_v34, 1 }
 0x155   : > { %v1039_v43 = vadd.f32 %v1035_v51, %v1027_v62  ;;  %v1976_v23 = vand.u32 4294901760, %v1975_v7  ;;  %v835_v12 = vrot.slane %v5903_v35, 6  ;;  %v1966_v11 = vand.u32 4294901760, %v1965_v50 }
 0x156   : > { %v810_v44 = vsel %vm682_vm5, %v7310_v48, %v807_v53  ;;  %v980_v15 = vadd.f32 %v976_v0, %v952_v55  ;;  %v7311_v14 = vrot.slane %v5903_v35, 1  ;;  %v844_v42 = vrot.slane %v5906_v34, 2 }
 0x157   : > { %v7312_v21 = vrot.slane %v5906_v34, 5  ;;  %v7313_v58 = vrot.slane %v5903_v35, 5  ;;  %v2490_v51 = vsel %vm444_vm0, %v1039_v43, 0  ;;  %v7314_v13 = vrot.slane %v5900_v36, 6  ;;  %4821 = vmatprep.mubr.f32.mxu1 %v1966_v11 }
 0x158   : > { %v817_v45 = vsel %vm691_vm6, %v7311_v14, %v816_v41  ;;  %v1008_v10 = vadd.f32 %v1004_v56, %v980_v15  ;;  %v6377_v40 = vand.u32 4294901760, %v2490_v51  ;;  %v7315_v29 = vrot.slane %v5903_v35, 2  ;;  %4822 = vmatmul.mubr.f32.vlgmr.msra.gmra.mrb[4].mxu1 %v1976_v23 }
 0x159   : > { %v865_v26 = vsel %vm742_vm9, %v7313_v58, %v7312_v21  ;;  %v823_v59 = vadd.f32 %v817_v45, %v810_v44  ;;  %v838_v17 = vsel %vm712_vm7, %v7314_v13, %v835_v12  ;;  %v7316_v62 = vrot.slane %v5906_v34, 3  ;;  %5088 = vmatpush3.bf16.msra.mxu1 %v5740_v2 }
 0x15a   : > { %v845_v31 = vsel %vm721_vm8, %v7315_v29, %v844_v42  ;;  %v7317_v7 = vrot.slane %v5903_v35, 3  ;;  %v880_v55 = vadd.f32 %v6245_v47, %v865_v26  ;;  %v1028_v0 = vadd.f32 %v1024_v25, %v1008_v10  ;;  %5090 = vmatprep.subr.bf16.mxu1 %v5743_v3 }
 0x15b   : > { %v827_v50 = vmul.f32 0.21300554, %v823_v59  ;;  %v851_v48 = vadd.f32 %v845_v31, %v838_v17  ;;  %v6392_v43 = vsub.f32 %v2490_v51, %v6377_v40  ;;  %v7318_v11 = vrot.slane %v5906_v34, 4 }
 0x15c   : > { %v873_v56 = vsel %vm751_vm10, %v7317_v7, %v7316_v62  ;;  %v884_v15 = vmul.f32 0.036000773, %v880_v55  ;;  %v7319_v14 = vrot.slane %v5903_v35, 4  ;;  %v911_v47 = vadd.f32 %v6236_v57, %v865_v26 }
 0x15d   : > { %v879_v44 = vadd.f32 %v873_v56, %v6216_v16  ;;  %v1040_v25 = vadd.f32 %v1036_v60, %v1028_v0  ;;  %v831_v23 = vadd.f32 %v827_v50, %v803_v27  ;;  %v855_v21 = vmul.f32 0.1093607, %v851_v48 }
 0x15e   : > { %v893_v45 = vsel %vm772_vm11, %v7319_v14, %v7318_v11  ;;  %v2584_v16 = vand.u32 4294901760, %v6392_v43  ;;  %v915_v10 = vmul.f32 0.0010283804, %v911_v47  ;;  %v804_v59 = vmul.f32 0.26601174, %v5906_v34 }
 0x15f   : > { %v883_v58 = vmul.f32 0.036000773, %v879_v44  ;;  %v899_v51 = vadd.f32 %v6259_v38, %v893_v45  ;;  %v2493_v13 = vsel %vm444_vm0, %v1040_v25, 0  ;;  %v859_v17 = vadd.f32 %v855_v21, %v831_v23 }
 0x160   : > { %v7320_v29 = vrot.slane %v5906_v34, 7  ;;  %v7321_v60 = vrot.slane %v5897_v28, 1  ;;  %v2585_v38 = vsub.f32 %v6392_v43, %v2584_v16  ;;  %v6418_v26 = vand.u32 4294901760, %v2493_v13 }
 0x161   : > { %v903_v31 = vmul.f32 0.0075987587, %v899_v51  ;;  %v887_v7 = vadd.f32 %v883_v58, %v859_v17  ;;  %v7322_v55 = vrot.slane %v5906_v34, 6  ;;  %v912_v23 = vadd.f32 %v873_v56, %v6226_v18 }
 0x162   : > { %v809_v57 = vsel %vm682_vm5, %v807_v53, %v7320_v29  ;;  %v820_v27 = vsel %vm691_vm6, %v816_v41, %v7321_v60  ;;  %v7323_v53 = vrot.slane %v5897_v28, 2  ;;  %v900_v41 = vadd.f32 %v6266_v52, %v893_v45 }
 0x163   : > { %v824_v62 = vadd.f32 %v820_v27, %v809_v57  ;;  %v837_v0 = vsel %vm712_vm7, %v835_v12, %v7322_v55  ;;  %v2586_v48 = vand.u32 4294901760, %v2585_v38  ;;  %v6430_v44 = vsub.f32 %v2493_v13, %v6418_v26 }
 0x164   : > { %v848_v50 = vsel %vm721_vm8, %v844_v42, %v7323_v53  ;;  %v907_v47 = vadd.f32 %v903_v31, %v887_v7  ;;  %v904_v25 = vmul.f32 0.0075987587, %v900_v41  ;;  %v6435_v12 = vmul.f32 %v5897_v28, %v5780_v5 }
 0x165   : > { %v828_v11 = vmul.f32 0.21300554, %v824_v62  ;;  %v852_v14 = vadd.f32 %v848_v50, %v837_v0  ;;  %4884 = vmatprep.mubr.f32.mxu0 %v2586_v48  ;;  %v2594_v21 = vand.u32 4294901760, %v6430_v44  ;;  %v6440_v52 = vmul.f32 %v5900_v36, %v5783_v8 }
 0x166   : > { %v919_v45 = vadd.f32 %v915_v10, %v907_v47  ;;  %v916_v51 = vmul.f32 0.0010283804, %v912_v23  ;;  %v6444_v13 = vmul.f32 %v5903_v35, %v5791_v37  ;;  %v6448_v18 = vmul.f32 %v5906_v34, %v5786_v33 }
 0x167   : > { %v832_v42 = vadd.f32 %v828_v11, %v804_v59  ;;  %v856_v58 = vmul.f32 0.1093607, %v852_v14  ;;  %v2595_v5 = vsub.f32 %v6430_v44, %v2594_v21  ;;  %v1161_v59 = vmul.f32 0.26601174, %v6435_v12 }
 0x168   : > { %v1162_v8 = vmul.f32 0.26601174, %v6440_v52  ;;  %v1890_v10 = vsel %vm444_vm0, %v919_v45, 0  ;;  %v1165_v17 = vrot.slane %v6435_v12, 7  ;;  %v1166_v37 = vrot.slane %v6440_v52, 7 }
 0x169   : > { %v860_v56 = vadd.f32 %v856_v58, %v832_v42  ;;  %v7268_v29 = vrot.slane %v6448_v18, 7  ;;  %v2596_v57 = vand.u32 4294901760, %v2595_v5  ;;  %v6459_v33 = vand.u32 4294901760, %v1890_v10 }
 0x16a   : > { %v7267_v27 = vrot.slane %v6435_v12, 1  ;;  %v1171_v38 = vsel %vm682_vm5, %v1165_v17, %v1166_v37  ;;  %v1174_v62 = vrot.slane %v6440_v52, 1  ;;  %v7271_v7 = vrot.slane %v6444_v13, 1 }
 0x16b   : > { %v888_v60 = vadd.f32 %v884_v15, %v860_v56  ;;  %v1172_v31 = vsel %vm682_vm5, %v7268_v29, %v1165_v17  ;;  %4885 = vmatmul.mubr.f32.gmra.mrb[6].mxu0 %v2596_v57  ;;  %v6473_v55 = vsub.f32 %v1890_v10, %v6459_v33  ;;  %v1193_v0 = vrot.slane %v6435_v12, 6 }
 0x16c   : > { %v7270_v53 = vrot.slane %v6440_v52, 6  ;;  %4891 = vmatprep.mubr.f32.mxu0 %v6173_v9  ;;  %v1178_v50 = vsel %vm691_vm6, %v1174_v62, %v7271_v7  ;;  %v1179_v41 = vsel %vm691_vm6, %v7267_v27, %v1174_v62  ;;  %v7266_v48 = vrot.slane %v6448_v18, 6 }
 0x16d   : > { %v908_v15 = vadd.f32 %v904_v25, %v888_v60  ;;  %v7265_v11 = vrot.slane %v6435_v12, 2  ;;  %v1984_v14 = vand.u32 4294901760, %v6473_v55  ;;  %v1181_v25 = vadd.f32 %v1179_v41, %v1172_v31 }
 0x16e   : > { %v1182_v23 = vadd.f32 %v1178_v50, %v1171_v38  ;;  %v1199_v42 = vsel %vm712_vm7, %v1193_v0, %v7270_v53  ;;  %v1200_v58 = vsel %vm712_vm7, %v7266_v48, %v1193_v0  ;;  %v1202_v45 = vrot.slane %v6440_v52, 2 }
 0x16f   : > { %v920_v47 = vadd.f32 %v916_v51, %v908_v15  ;;  %v7269_v5 = vrot.slane %v6444_v13, 2  ;;  %v1985_v51 = vsub.f32 %v6473_v55, %v1984_v14  ;;  %4892 = vmatmul.mubr.f32.vlgmr.msra.gmra.mrb[4].mxu0 %v6170_v4  ;;  %v1185_v10 = vmul.f32 0.21300554, %v1181_v25 }
 0x170   : > { %v1186_v17 = vmul.f32 0.21300554, %v1182_v23  ;;  %4894 = vmatprep.mubr.f32.mxu0 %v6377_v40  ;;  %5116 = vmatpush3.bf16.msra.mxu0 %v5743_v3  ;;  %v1207_v38 = vsel %vm721_vm8, %v7265_v11, %v1202_v45  ;;  %v1221_v31 = vrot.slane %v6435_v12, 5  ;;  %v1222_v25 = vrot.slane %v6440_v52, 5 }
 0x171   : > { %v1893_v56 = vsel %vm444_vm0, %v920_v47, 0  ;;  %v1206_v60 = vsel %vm721_vm8, %v1202_v45, %v7269_v5  ;;  %v1986_v62 = vand.u32 4294901760, %v1985_v51  ;;  %5118 = vmatprep.subr.bf16.mxu0 %v5731_v54  ;;  %v1189_v15 = vadd.f32 %v1185_v10, %v1161_v59 }
 0x172   : > { %v6504_v57 = vand.u32 4294901760, %v1893_v56  ;;  %v1190_v0 = vadd.f32 %v1186_v17, %v1162_v8  ;;  %v1209_v50 = vadd.f32 %v1207_v38, %v1200_v58  ;;  %v1210_v47 = vadd.f32 %v1206_v60, %v1199_v42 }
 0x173   : > { %v7276_v23 = vrot.slane %v6444_v13, 5  ;;  %4824 = vmatprep.mubr.f32.mxu1 %v1986_v62  ;;  %4895 = vmatmul.mubr.f32.gmra.mrb[6].mxu0 %v6418_v26  ;;  %v1224_v11 = vrot.slane %v6448_v18, 5  ;;  %v1229_v51 = vrot.slane %v6435_v12, 3  ;;  %v1230_v59 = vrot.slane %v6440_v52, 3 }
 0x174   : > { %v6519_v41 = vsub.f32 %v1893_v56, %v6504_v57  ;;  %v1213_v45 = vmul.f32 0.1093607, %v1209_v50  ;;  %4901 = vmatprep.mubr.f32.mxu0 %v6191_v49  ;;  %v1214_v58 = vmul.f32 0.1093607, %v1210_v47  ;;  %v1227_v56 = vsel %vm742_vm9, %v1221_v31, %v1222_v25 }
 0x175   : > { %v6533_v42 = vsel %vm742_vm9, %v1222_v25, %v7276_v23  ;;  %v6541_v17 = vsel %vm742_vm9, %v1224_v11, %v1221_v31  ;;  %v7272_v60 = vrot.slane %v6444_v13, 3  ;;  %v7275_v38 = vrot.slane %v6448_v18, 3 }
 0x176   : > { %v1994_v8 = vand.u32 4294901760, %v6519_v41  ;;  %v1217_v10 = vadd.f32 %v1213_v45, %v1189_v15  ;;  %v1218_v50 = vadd.f32 %v1214_v58, %v1190_v0  ;;  %v1235_v47 = vsel %vm751_vm10, %v1229_v51, %v1230_v59 }
 0x177   : > { %v1249_v15 = vrot.slane %v6435_v12, 4  ;;  %4902 = vmatmul.mubr.f32.vlgmr.msra.gmra.mrb[4].mxu0 %v6185_v39  ;;  %v6556_v31 = vsel %vm751_vm10, %v1230_v59, %v7272_v60  ;;  %v6562_v25 = vsel %vm751_vm10, %v7275_v38, %v1229_v51  ;;  %v1237_v0 = vadd.f32 %v1235_v47, %v6541_v17 }
 0x178   : > { %v1995_v62 = vsub.f32 %v6519_v41, %v1994_v8  ;;  %v1250_v45 = vrot.slane %v6440_v52, 4  ;;  %4904 = vmatprep.mubr.f32.mxu0 %v6392_v43  ;;  %5120 = vmatpush3.bf16.msra.mxu0 %v5731_v54  ;;  %v1238_v48 = vadd.f32 %v6556_v31, %v1227_v56  ;;  %v7273_v59 = vrot.slane %v6444_v13, 4 }
 0x179   : > { %v7274_v27 = vrot.slane %v6448_v18, 4  ;;  %5122 = vmatprep.subr.bf16.mxu0 %v5737_v61  ;;  %v1241_v29 = vmul.f32 0.036000773, %v1237_v0  ;;  %v1269_v5 = vadd.f32 %v6562_v25, %v1227_v56  ;;  %v6590_v60 = vmul.f32 %v5897_v28, %v5897_v28 }
 0x17a   : > { %v1996_v58 = vand.u32 4294901760, %v1995_v62  ;;  %v1255_v51 = vsel %vm772_vm11, %v1249_v15, %v1250_v45  ;;  %v1270_v62 = vadd.f32 %v1235_v47, %v6533_v42  ;;  %v1242_v53 = vmul.f32 0.036000773, %v1238_v48 }
 0x17b   : > { %v6580_v7 = vsel %vm772_vm11, %v1250_v45, %v7273_v59  ;;  %v6586_v0 = vsel %vm772_vm11, %v7274_v27, %v1249_v15  ;;  %4905 = vmatmul.mubr.f32.gmra.mrb[6].mxu0 %v6430_v44  ;;  %v1245_v48 = vadd.f32 %v1241_v29, %v1217_v10  ;;  %v1273_v45 = vmul.f32 0.0010283804, %v1269_v5 }
 0x17c   : > { %4825 = vmatmul.mubr.f32.gmra.mrb[6].mxu1 %v1996_v58  ;;  %v1257_v56 = vadd.f32 %v6586_v0, %v1255_v51  ;;  %v1258_v47 = vadd.f32 %v1255_v51, %v6580_v7  ;;  %v7324_v58 = vand.u32 4294901760, %v6191_v49  ;;  %v1246_v59 = vadd.f32 %v1242_v53, %v1218_v50 }
 0x17d   : > { %4831 = vmatprep.mubr.f32.mxu1 %v6319_v32  ;;  %v1274_v15 = vmul.f32 0.0010283804, %v1270_v62  ;;  %v6600_v27 = vmul.f32 %v5900_v36, %v5900_v36  ;;  %v6604_v28 = vmul.f32 %v5903_v35, %v5903_v35  ;;  %v6608_v10 = vmul.f32 %v5906_v34, %v5906_v34 }
 0x17e   : > { %4911 = vmatprep.mubr.f32.mxu0 %v7324_v58  ;;  %v1261_v38 = vmul.f32 0.0075987587, %v1257_v56  ;;  %v1262_v29 = vmul.f32 0.0075987587, %v1258_v47  ;;  %v1041_v5 = vmul.f32 0.26601174, %v6590_v60 }
 0x17f   : > { %v1042_v49 = vmul.f32 0.26601174, %v6600_v27  ;;  %v1045_v53 = vrot.slane %v6590_v60, 7  ;;  %v1046_v36 = vrot.slane %v6600_v27, 7  ;;  %v7278_v50 = vrot.slane %v6590_v60, 1 }
 0x180   : > { %4832 = vmatmul.mubr.f32.vlgmr.msra.gmra.mrb[4].mxu1 %v6316_v63  ;;  %v1265_v35 = vadd.f32 %v1261_v38, %v1245_v48  ;;  %v1266_v51 = vadd.f32 %v1262_v29, %v1246_v59  ;;  %v7277_v34 = vrot.slane %v6608_v10, 7  ;;  %v1054_v62 = vrot.slane %v6600_v27, 1 }
 0x181   : > { %5092 = vmatpush3.bf16.msra.mxu1 %v5743_v3  ;;  %4834 = vmatprep.mubr.f32.mxu1 %v6459_v33  ;;  %v7325_v56 = vand.u32 4294901760, %v6185_v39  ;;  %v1051_v47 = vsel %vm682_vm5, %v1045_v53, %v1046_v36  ;;  %v7282_v58 = vrot.slane %v6604_v28, 1  ;;  %v1073_v23 = vrot.slane %v6590_v60, 6 }
 0x182   : > { %5094 = vmatprep.subr.bf16.mxu1 %v5731_v54  ;;  %v7279_v38 = vrot.slane %v6600_v27, 6  ;;  %v1277_v59 = vadd.f32 %v1273_v45, %v1265_v35  ;;  %v1278_v48 = vadd.f32 %v1274_v15, %v1266_v51  ;;  %v1052_v39 = vsel %vm682_vm5, %v7277_v34, %v1045_v53 }
 0x183   : > { %4912 = vmatmul.mubr.f32.vlgmr.msra.gmra.mrb[4].mxu0 %v7325_v56  ;;  %v7281_v29 = vrot.slane %v6608_v10, 6  ;;  %v1058_v43 = vsel %vm691_vm6, %v1054_v62, %v7282_v58  ;;  %v7280_v15 = vrot.slane %v6590_v60, 2  ;;  %v1101_v44 = vrot.slane %v6590_v60, 5 }
 0x184   : > { %4914 = vmatprep.mubr.f32.mxu0 %v2584_v16  ;;  %5124 = vmatpush3.bf16.msra.mxu0 %v5737_v61  ;;  %v1059_v16 = vsel %vm691_vm6, %v7278_v50, %v1054_v62  ;;  %v1079_v45 = vsel %vm712_vm7, %v1073_v23, %v7279_v38  ;;  %v3684_v53 = vsel %vm444_vm0, %v1277_v59, 0  ;;  %v3687_v35 = vsel %vm444_vm0, %v1278_v48, 0 }
 0x185   : > { %4835 = vmatmul.mubr.f32.gmra.mrb[6].mxu1 %v6504_v57  ;;  %5126 = vmatprep.subr.bf16.mxu0 %v5731_v54  ;;  %v1061_v51 = vadd.f32 %v1059_v16, %v1052_v39  ;;  %v1062_v56 = vadd.f32 %v1058_v43, %v1051_v47  ;;  %v6658_v34 = vand.u32 4294901760, %v3684_v53  ;;  %v6660_v62 = vand.u32 4294901760, %v3687_v35 }
 0x186   : > { %4841 = vmatprep.mubr.f32.mxu1 %v6337_v30  ;;  %v1080_v50 = vsel %vm712_vm7, %v7281_v29, %v1073_v23  ;;  %v1082_v38 = vrot.slane %v6600_v27, 2  ;;  %v7284_v47 = vrot.slane %v6604_v28, 2  ;;  %v1102_v43 = vrot.slane %v6600_v27, 5 }
 0x187   : > { %4915 = vmatmul.mubr.f32.gmra.mrb[6].mxu0 %v2594_v21  ;;  %v1065_v59 = vmul.f32 0.21300554, %v1061_v51  ;;  %v1066_v48 = vmul.f32 0.21300554, %v1062_v56  ;;  %v6672_v21 = vsub.f32 %v3684_v53, %v6658_v34  ;;  %v6675_v39 = vsub.f32 %v3687_v35, %v6660_v62 }
 0x188   : > { %4921 = vmatprep.mubr.f32.mxu0 %v6173_v9  ;;  %v1087_v23 = vsel %vm721_vm8, %v7280_v15, %v1082_v38  ;;  %v1086_v53 = vsel %vm721_vm8, %v1082_v38, %v7284_v47  ;;  %v1103_v35 = vrot.slane %v6604_v28, 5  ;;  %v1109_v38 = vrot.slane %v6590_v60, 3 }
 0x189   : > { %4842 = vmatmul.mubr.f32.vlgmr.msra.gmra.mrb[4].mxu1 %v6330_v6  ;;  %v1069_v16 = vadd.f32 %v1065_v59, %v1041_v5  ;;  %v1070_v51 = vadd.f32 %v1066_v48, %v1042_v49  ;;  %v7283_v56 = vand.u32 4294901760, %v6672_v21  ;;  %v7285_v15 = vand.u32 4294901760, %v6675_v39 }
 0x18a   : > { %5096 = vmatpush3.bf16.msra.mxu1 %v5731_v54  ;;  %4844 = vmatprep.mubr.f32.mxu1 %v6473_v55  ;;  %v1089_v29 = vadd.f32 %v1087_v23, %v1080_v50  ;;  %v1090_v58 = vadd.f32 %v1086_v53, %v1079_v45  ;;  %v1104_v5 = vrot.slane %v6608_v10, 5  ;;  %v1107_v49 = vsel %vm742_vm9, %v1101_v44, %v1102_v43 }
 0x18b   : > { %5098 = vmatprep.subr.bf16.mxu1 %v5737_v61  ;;  %4922 = vmatmul.mubr.f32.vlgmr.msra.gmra.mrb[4].mxu0 %v6170_v4  ;;  %v3765_v50 = vsub.f32 %v6672_v21, %v7283_v56  ;;  %v6707_v45 = vsub.f32 %v6675_v39, %v7285_v15  ;;  %v1110_v53 = vrot.slane %v6600_v27, 3  ;;  %v7286_v56 = vrot.slane %v6604_v28, 3 }
 0x18c   : > { %4924 = vmatprep.mubr.f32.mxu0 %v6377_v40  ;;  %5128 = vmatpush3.bf16.msra.mxu0 %v5731_v54  ;;  %v1093_v59 = vmul.f32 0.1093607, %v1089_v29  ;;  %v1094_v48 = vmul.f32 0.1093607, %v1090_v58  ;;  %v6715_v23 = vsel %vm742_vm9, %v1104_v5, %v1101_v44  ;;  %v7289_v47 = vrot.slane %v6608_v10, 3 }
 0x18d   : > { %4845 = vmatmul.mubr.f32.gmra.mrb[6].mxu1 %v6519_v41  ;;  %5154 = vmatprep.subr.bf16.mxu0 %v5731_v54  ;;  %v3766_v15 = vand.u32 4294901760, %v3765_v50  ;;  %v6725_v30 = vsel %vm742_vm9, %v1102_v43, %v1103_v35  ;;  %v1115_v44 = vsel %vm751_vm10, %v1109_v38, %v1110_v53  ;;  %v1129_v43 = vrot.slane %v6590_v60, 4 }
 0x18e   : > { %4851 = vmatprep.mubr.f32.mxu1 %v1964_v24  ;;  %v1097_v29 = vadd.f32 %v1093_v59, %v1069_v16  ;;  %v1098_v58 = vadd.f32 %v1094_v48, %v1070_v51  ;;  %v6732_v24 = vsel %vm751_vm10, %v1110_v53, %v7286_v56  ;;  %v6740_v16 = vsel %vm751_vm10, %v7289_v47, %v1109_v38 }
 0x18f   : > { %4925 = vmatmul.mubr.f32.gmra.mrb[6].mxu0 %v6418_v26  ;;  %v1118_v51 = vadd.f32 %v6732_v24, %v1107_v49  ;;  %v1130_v50 = vrot.slane %v6600_v27, 4  ;;  %v7287_v59 = vrot.slane %v6604_v28, 4  ;;  %v3776_v38 = vand.u32 4294901760, %v6707_v45 }
 0x190   : > { %4931 = vmatprep.mubr.f32.mxu0 %v6173_v9  ;;  %v1117_v9 = vadd.f32 %v1115_v44, %v6715_v23  ;;  %v7288_v48 = vrot.slane %v6608_v10, 4  ;;  %v1149_v6 = vadd.f32 %v6740_v16, %v1107_v49 }
 0x191   : > { %4852 = vmatmul.mubr.f32.vlgmr.msra.gmra.mrb[4].mxu1 %v1974_v46  ;;  %v1150_v46 = vadd.f32 %v1115_v44, %v6725_v30  ;;  %v1122_v56 = vmul.f32 0.036000773, %v1118_v51  ;;  %v6762_v55 = vsel %vm772_vm11, %v1130_v50, %v7287_v59  ;;  %v1163_v44 = vmul.f32 0.26601174, %v6444_v13 }
 0x192   : > { %5100 = vmatpush3.bf16.msra.mxu1 %v5737_v61  ;;  %4854 = vmatprep.mubr.f32.mxu1 %v1984_v14  ;;  %v1121_v53 = vmul.f32 0.036000773, %v1117_v9  ;;  %v1135_v14 = vsel %vm772_vm11, %v1129_v43, %v1130_v50  ;;  %v1153_v45 = vmul.f32 0.0010283804, %v1149_v6  ;;  %v1167_v50 = vrot.slane %v6444_v13, 7 }
 0x193   : > { %5102 = vmatprep.subr.bf16.mxu1 %v5731_v54  ;;  %4932 = vmatmul.mubr.f32.vlgmr.msra.gmra.mrb[4].mxu0 %v6170_v4  ;;  %v6772_v4 = vsel %vm772_vm11, %v7288_v48, %v1129_v43  ;;  %v1138_v49 = vadd.f32 %v1135_v14, %v6762_v55  ;;  %v1126_v51 = vadd.f32 %v1122_v56, %v1098_v58  ;;  %v1176_v59 = vrot.slane %v6448_v18, 1 }
 0x194   : > { %4934 = vmatprep.mubr.f32.mxu0 %v6377_v40  ;;  %5156 = vmatpush3.bf16.msra.mxu0 %v5731_v54  ;;  %v1125_v9 = vadd.f32 %v1121_v53, %v1097_v29  ;;  %v1137_v40 = vadd.f32 %v6772_v4, %v1135_v14  ;;  %v1195_v6 = vrot.slane %v6444_v13, 6  ;;  %v1204_v48 = vrot.slane %v6448_v18, 2 }
 0x195   : > { %4855 = vmatmul.mubr.f32.gmra.mrb[6].mxu1 %v1994_v8  ;;  %5158 = vmatprep.subr.bf16.mxu0 %v5740_v2  ;;  %v1142_v43 = vmul.f32 0.0075987587, %v1138_v49  ;;  %v1170_v8 = vsel %vm682_vm5, %v1166_v37, %v1167_v50  ;;  %v7326_v56 = vrot.slane %v6444_v13, 5  ;;  %v7327_v58 = vrot.slane %v6448_v18, 3 }
 0x196   : > { %4861 = vmatprep.mubr.f32.mxu1 %v6319_v32  ;;  %v1141_v41 = vmul.f32 0.0075987587, %v1137_v40  ;;  %v7328_v53 = vrot.slane %v6444_v13, 3  ;;  %v7329_v49 = vrot.slane %v6444_v13, 1  ;;  %v7330_v40 = vrot.slane %v6440_v52, 6 }
 0x197   : > { %4935 = vmatmul.mubr.f32.gmra.mrb[6].mxu0 %v6418_v26  ;;  %v1225_v29 = vsel %vm742_vm9, %v7326_v56, %v1224_v11  ;;  %v1146_v14 = vadd.f32 %v1142_v43, %v1126_v51  ;;  %v7331_v11 = vrot.slane %v6444_v13, 2  ;;  %v1154_v52 = vmul.f32 0.0010283804, %v1150_v46 }
 0x198   : > { %v1233_v26 = vsel %vm751_vm10, %v7328_v53, %v7327_v58  ;;  %5001 = vmatprep.mubr.f32.mxu0 %v3766_v15  ;;  %v1177_v37 = vsel %vm691_vm6, %v7329_v49, %v1176_v59  ;;  %v1198_v47 = vsel %vm712_vm7, %v7330_v40, %v1195_v6  ;;  %v1145_v58 = vadd.f32 %v1141_v41, %v1125_v9 }
 0x199   : > { %v1205_v56 = vsel %vm721_vm8, %v7331_v11, %v1204_v48  ;;  %4862 = vmatmul.mubr.f32.vlgmr.msra.gmra.mrb[4].mxu1 %v6316_v63  ;;  %v1183_v15 = vadd.f32 %v1177_v37, %v1170_v8  ;;  %v1239_v43 = vadd.f32 %v1233_v26, %v6533_v42  ;;  %v1240_v53 = vadd.f32 %v6562_v25, %v1225_v29 }
 0x19a   : > { %v1211_v51 = vadd.f32 %v1205_v56, %v1198_v47  ;;  %5104 = vmatpush3.bf16.msra.mxu1 %v5731_v54  ;;  %4864 = vmatprep.mubr.f32.mxu1 %v6459_v33  ;;  %v7332_v49 = vrot.slane %v6448_v18, 4  ;;  %v7333_v40 = vrot.slane %v6444_v13, 4  ;;  %v1271_v9 = vadd.f32 %v6556_v31, %v1225_v29 }
 0x19b   : > { %5130 = vmatprep.subr.bf16.mxu1 %v5731_v54  ;;  %5002 = vmatmul.mubr.f32.vlgmr.msra.gmra.mrb[8].mxu0 %v3776_v38  ;;  %v1157_v42 = vadd.f32 %v1153_v45, %v1145_v58  ;;  %v1187_v47 = vmul.f32 0.21300554, %v1183_v15  ;;  %v1164_v8 = vmul.f32 0.26601174, %v6448_v18  ;;  %v1243_v46 = vmul.f32 0.036000773, %v1239_v43 }
 0x19c   : > { %v1253_v11 = vsel %vm772_vm11, %v7333_v40, %v7332_v49  ;;  %v1215_v41 = vmul.f32 0.1093607, %v1211_v51  ;;  %v1244_v37 = vmul.f32 0.036000773, %v1240_v53  ;;  %v1158_v56 = vadd.f32 %v1154_v52, %v1146_v14  ;;  %5160 = vmatpush3.bf16.msra.mxu0 %v5740_v2 }
 0x19d   : > { %v1259_v25 = vadd.f32 %v6580_v7, %v1253_v11  ;;  %4865 = vmatmul.mubr.f32.gmra.mrb[6].mxu1 %v6504_v57  ;;  %v3084_v13 = vsel %vm444_vm0, %v1157_v42, 0  ;;  %v1191_v31 = vadd.f32 %v1187_v47, %v1163_v44  ;;  %v7334_v29 = vrot.slane %v6448_v18, 7  ;;  %5162 = vmatprep.subr.bf16.mxu0 %v5743_v3 }
 0x19e   : > { %v7335_v45 = vrot.slane %v6435_v12, 1  ;;  %4871 = vmatprep.mubr.f32.mxu1 %v6319_v32  ;;  %v6842_v7 = vand.u32 4294901760, %v3084_v13  ;;  %v1275_v14 = vmul.f32 0.0010283804, %v1271_v9  ;;  %v3087_v15 = vsel %vm444_vm0, %v1158_v56, 0 }
 0x19f   : > { %v1169_v38 = vsel %vm682_vm5, %v1167_v50, %v7334_v29  ;;  %v1219_v51 = vadd.f32 %v1215_v41, %v1191_v31  ;;  %v6845_v43 = vand.u32 4294901760, %v3087_v15  ;;  %v7336_v50 = vrot.slane %v6448_v18, 6 }
 0x1a0   : > { %v1180_v58 = vsel %vm691_vm6, %v1176_v59, %v7335_v45  ;;  %v7337_v59 = vrot.slane %v6435_v12, 2  ;;  %v6856_v32 = vsub.f32 %v3084_v13, %v6842_v7  ;;  %v1260_v9 = vadd.f32 %v6586_v0, %v1253_v11 }
 0x1a1   : > { %v1184_v44 = vadd.f32 %v1180_v58, %v1169_v38  ;;  %v1197_v52 = vsel %vm712_vm7, %v1195_v6, %v7336_v50  ;;  %4872 = vmatmul.mubr.f32.vlgmr.msra.gmra.mrb[4].mxu1 %v6316_v63  ;;  %v1247_v42 = vadd.f32 %v1243_v46, %v1219_v51  ;;  %v1263_v47 = vmul.f32 0.0075987587, %v1259_v25 }
 0x1a2   : > { %v1208_v53 = vsel %vm721_vm8, %v1204_v48, %v7337_v59  ;;  %v6861_v18 = vsub.f32 %v3087_v15, %v6845_v43  ;;  %v1272_v6 = vadd.f32 %v1233_v26, %v6541_v17  ;;  %5132 = vmatpush3.bf16.msra.mxu1 %v5731_v54  ;;  %4874 = vmatprep.mubr.f32.mxu1 %v6459_v33  ;;  %v3164_v12 = vand.u32 4294901760, %v6856_v32 }
 0x1a3   : > { %v1188_v49 = vmul.f32 0.21300554, %v1184_v44  ;;  %v1212_v40 = vadd.f32 %v1208_v53, %v1197_v52  ;;  %v1043_v56 = vmul.f32 0.26601174, %v6604_v28  ;;  %v1267_v0 = vadd.f32 %v1263_v47, %v1247_v42  ;;  %5134 = vmatprep.subr.bf16.mxu1 %v5740_v2 }
 0x1a4   : > { %v3174_v63 = vand.u32 4294901760, %v6861_v18  ;;  %v1264_v11 = vmul.f32 0.0075987587, %v1260_v9  ;;  %v1047_v46 = vrot.slane %v6604_v28, 7  ;;  %v3165_v17 = vsub.f32 %v6856_v32, %v3164_v12 }
 0x1a5   : > { %v1192_v48 = vadd.f32 %v1188_v49, %v1164_v8  ;;  %v1216_v41 = vmul.f32 0.1093607, %v1212_v40  ;;  %v1056_v33 = vrot.slane %v6608_v10, 1  ;;  %v1075_v8 = vrot.slane %v6604_v28, 6  ;;  %4875 = vmatmul.mubr.f32.gmra.mrb[6].mxu1 %v6504_v57 }
 0x1a6   : > { %v1279_v25 = vadd.f32 %v1275_v14, %v1267_v0  ;;  %v3175_v13 = vsub.f32 %v6861_v18, %v3174_v63  ;;  %v1050_v31 = vsel %vm682_vm5, %v1046_v36, %v1047_v46  ;;  %v1084_v29 = vrot.slane %v6608_v10, 2 }
 0x1a7   : > { %v1220_v26 = vadd.f32 %v1216_v41, %v1192_v48  ;;  %v3166_v38 = vand.u32 4294901760, %v3165_v17  ;;  %v7338_v58 = vrot.slane %v6604_v28, 1  ;;  %v7339_v57 = vrot.slane %v6600_v27, 6 }
 0x1a8   : > { %v3690_v44 = vsel %vm444_vm0, %v1279_v25, 0  ;;  %v3176_v51 = vand.u32 4294901760, %v3175_v13  ;;  %v7340_v36 = vrot.slane %v6604_v28, 2  ;;  %v1276_v53 = vmul.f32 0.0010283804, %v1272_v6 }
 0x1a9   : > { %v1248_v45 = vadd.f32 %v1244_v37, %v1220_v26  ;;  %v1057_v15 = vsel %vm691_vm6, %v7338_v58, %v1056_v33  ;;  %v1078_v14 = vsel %vm712_vm7, %v7339_v57, %v1075_v8  ;;  %4941 = vmatprep.mubr.f32.mxu1 %v3166_v38  ;;  %v6898_v37 = vand.u32 4294901760, %v3690_v44 }
 0x1aa   : > { %v1063_v50 = vadd.f32 %v1057_v15, %v1050_v31  ;;  %v1085_v52 = vsel %vm721_vm8, %v7340_v36, %v1084_v29  ;;  %4942 = vmatmul.mubr.f32.vlgmr.msra.gmra.mrb[8].mxu1 %v3176_v51  ;;  %v1105_v40 = vsel %vm742_vm9, %v1103_v35, %v1104_v5  ;;  %v7341_v9 = vrot.slane %v6608_v10, 3 }
 0x1ab   : > { %v1268_v59 = vadd.f32 %v1264_v11, %v1248_v45  ;;  %v1091_v49 = vadd.f32 %v1085_v52, %v1078_v14  ;;  %v7342_v42 = vrot.slane %v6604_v28, 3  ;;  %v7343_v48 = vrot.slane %v6608_v10, 4  ;;  %5136 = vmatpush3.bf16.msra.mxu1 %v5740_v2 }
 0x1ac   : > { %v1067_v27 = vmul.f32 0.21300554, %v1063_v50  ;;  %v7344_v6 = vrot.slane %v6604_v28, 4  ;;  %v6919_v0 = vsub.f32 %v3690_v44, %v6898_v37  ;;  %5138 = vmatprep.subr.bf16.mxu1 %v5743_v3  ;;  %v1151_v13 = vadd.f32 %v6732_v24, %v1105_v40 }
 0x1ad   : > { %v1113_v47 = vsel %vm751_vm10, %v7342_v42, %v7341_v9  ;;  %v1280_v35 = vadd.f32 %v1276_v53, %v1268_v59  ;;  %v1095_v17 = vmul.f32 0.1093607, %v1091_v49  ;;  %v7346_v58 = vrot.slane %v6590_v60, 1 }
 0x1ae   : > { %v1133_v41 = vsel %vm772_vm11, %v7344_v6, %v7343_v48  ;;  %v1119_v5 = vadd.f32 %v1113_v47, %v6725_v30  ;;  %v1071_v11 = vadd.f32 %v1067_v27, %v1043_v56  ;;  %v3784_v25 = vand.u32 4294901760, %v6919_v0 }
 0x1af   : > { %v1139_v26 = vadd.f32 %v6762_v55, %v1133_v41  ;;  %v3693_v28 = vsel %vm444_vm0, %v1280_v35, 0  ;;  %v7345_v56 = vrot.slane %v6608_v10, 7  ;;  %v1060_v15 = vsel %vm691_vm6, %v1056_v33, %v7346_v58 }
 0x1b0   : > { %v6928_v31 = vand.u32 4294901760, %v3693_v28  ;;  %v1099_v38 = vadd.f32 %v1095_v17, %v1071_v11  ;;  %v1123_v45 = vmul.f32 0.036000773, %v1119_v5  ;;  %v3785_v30 = vsub.f32 %v6919_v0, %v3784_v25 }
 0x1b1   : > { %v1143_v2 = vmul.f32 0.0075987587, %v1139_v26  ;;  %v1049_v55 = vsel %vm682_vm5, %v1047_v46, %v7345_v56  ;;  %v7347_v24 = vrot.slane %v6608_v10, 6  ;;  %v7348_v50 = vrot.slane %v6590_v60, 2 }
 0x1b2   : > { %v6946_v14 = vsub.f32 %v3693_v28, %v6928_v31  ;;  %v1127_v44 = vadd.f32 %v1123_v45, %v1099_v38  ;;  %v1064_v51 = vadd.f32 %v1060_v15, %v1049_v55  ;;  %v3786_v36 = vand.u32 4294901760, %v3785_v30 }
 0x1b3   : > { %v1077_v57 = vsel %vm712_vm7, %v1075_v8, %v7347_v24  ;;  %v1088_v46 = vsel %vm721_vm8, %v1084_v29, %v7348_v50  ;;  %v1120_v52 = vadd.f32 %v6740_v16, %v1105_v40  ;;  %v1044_v33 = vmul.f32 0.26601174, %v6608_v10 }
 0x1b4   : > { %v1092_v59 = vadd.f32 %v1088_v46, %v1077_v57  ;;  %v3794_v53 = vand.u32 4294901760, %v6946_v14  ;;  %v1147_v49 = vadd.f32 %v1143_v2, %v1127_v44  ;;  %v1155_v8 = vmul.f32 0.0010283804, %v1151_v13  ;;  %5004 = vmatprep.mubr.f32.mxu0 %v3786_v36  ;;  %v398_v46 = vld [vmem:[%s361_s9 + $0x8] sm:$0xff]  ;;  %v397_v36 = vld [vmem:[%s361_s9] sm:$0xff] }
 0x1b5   : > { %v1068_v27 = vmul.f32 0.21300554, %v1064_v51  ;;  %v1140_v9 = vadd.f32 %v6772_v4, %v1133_v41  ;;  %v1124_v29 = vmul.f32 0.036000773, %v1120_v52  ;;  %v1152_v10 = vadd.f32 %v1113_v47, %v6715_v23 }
 0x1b6   : > { %v3795_v42 = vsub.f32 %v6946_v14, %v3794_v53  ;;  %v1159_v60 = vadd.f32 %v1155_v8, %v1147_v49  ;;  %v1096_v1 = vmul.f32 0.1093607, %v1092_v59  ;;  %v7349_v55 = vand.u32 4294901760, %v6672_v21 }
 0x1b7   : > { %v1072_v48 = vadd.f32 %v1068_v27, %v1044_v33  ;;  %v1144_v11 = vmul.f32 0.0075987587, %v1140_v9  ;;  %v1156_v41 = vmul.f32 0.0010283804, %v1152_v10  ;;  %v7350_v58 = vand.u32 4294901760, %v6675_v39  ;;  %v5368_v10 = vld [vmem:[%s5669_s13 + $0x18] sm:$0xff] }
 0x1b8   : > { %v3796_v6 = vand.u32 4294901760, %v3795_v42  ;;  %v3090_v16 = vsel %vm444_vm0, %v1159_v60, 0  ;;  %v399_v42 = vld [vmem:[%s361_s9 + $0x10] sm:$0xff] }
 0x1b9   : > { %v1100_v40 = vadd.f32 %v1096_v1, %v1072_v48  ;;  %v6959_v35 = vand.u32 4294901760, %v3090_v16  ;;  %v5365_v60 = vld [vmem:[%s5605_s10 + $0x10] sm:$0xff] }
 0x1ba   : > { %5005 = vmatmul.mubr.f32.gmra.mrb[10].mxu0 %v3796_v6  ;;  %v5366_v48 = vld [vmem:[%s5669_s13 + $0x10] sm:$0xff] }
 0x1bb   : > { %v1128_v5 = vadd.f32 %v1124_v29, %v1100_v40  ;;  %v3183_v17 = vsub.f32 %v3090_v16, %v6959_v35  ;;  %5011 = vmatprep.mubr.f32.mxu0 %v6658_v34  ;;  %v434_v1 = vsub.f32 %v5366_v48, %v5365_v60  ;;  %v472_v29 = vsub.f32 %v399_v42, %v5365_v60  ;;  %v400_v16 = vld [vmem:[%s361_s9 + $0x18] sm:$0xff]  ;;  %s466_s9 = smul.f32 16.0, %s391_s30 }
 0x1bc   : > { %v5367_v40 = vld [vmem:[%s5605_s10 + $0x18] sm:$0xff] }
 0x1bd   : > { %v1148_v4 = vadd.f32 %v1144_v11, %v1128_v5  ;;  %v3184_v26 = vand.u32 4294901760, %v3183_v17  ;;  %v438_v6 = vmul.f32 %v5748_v19, %v434_v1  ;;  %v473_v11 = vsub.f32 %v400_v16, %v5367_v40 }
 0x1be   : > { %5012 = vmatmul.mubr.f32.vlgmr.msra.gmra.mrb[8].mxu0 %v6660_v62 }
 0x1bf   : > { %v1160_v28 = vadd.f32 %v1156_v41, %v1148_v4  ;;  %v3185_v13 = vsub.f32 %v3183_v17, %v3184_v26  ;;  %5014 = vmatprep.mubr.f32.mxu0 %v6898_v37  ;;  %5164 = vmatpush3.bf16.msra.mxu0 %v5743_v3  ;;  %v7351_v4 = vld [vmem:[#allocation10_spill] sm:$0xff] }
 0x1c0   : > { %5166 = vmatprep.subr.bf16.mxu0 %v5731_v54 }
 0x1c1   : > { %v3093_v23 = vsel %vm444_vm0, %v1160_v28, 0  ;;  %v3186_v47 = vand.u32 4294901760, %v3185_v13  ;;  %v477_v28 = vmul.f32 %v7351_v4, %v473_v11 }
 0x1c2   : > { %v3192_v38 = vand.u32 4294901760, %v3093_v23  ;;  %5015 = vmatmul.mubr.f32.gmra.mrb[10].mxu0 %v6928_v31 }
 0x1c3   : > { %4944 = vmatprep.mubr.f32.mxu1 %v3186_v47  ;;  %5021 = vmatprep.mubr.f32.mxu0 %v6672_v21  ;;  %v5364_v21 = vld [vmem:[%s5669_s13] sm:$0xff] }
 0x1c4   : > { %v3193_v45 = vsub.f32 %v3093_v23, %v3192_v38  ;;  %v481_v23 = vmul.f32 %v477_v28, %v477_v28 }
 0x1c6   : > { %v3194_v2 = vand.u32 4294901760, %v3193_v45  ;;  %5022 = vmatmul.mubr.f32.vlgmr.msra.gmra.mrb[8].mxu0 %v6675_v39  ;;  %v491_v47 = vsel %vm444_vm0, %v481_v23, 0.0 }
 0x1c7   : > { %5024 = vmatprep.mubr.f32.mxu0 %v6919_v0  ;;  %5168 = vmatpush3.bf16.msra.mxu0 %v5731_v54 }
 0x1c8   : > { %v3195_v30 = vsub.f32 %v3193_v45, %v3194_v2  ;;  %5170 = vmatprep.subr.bf16.mxu0 %v5737_v61 }
 0x1ca   : > { %v3196_v56 = vand.u32 4294901760, %v3195_v30  ;;  %5025 = vmatmul.mubr.f32.gmra.mrb[10].mxu0 %v6946_v14 }
 0x1cb   : > { %5031 = vmatprep.mubr.f32.mxu0 %v7349_v55 }
 0x1cc   : > { %4945 = vmatmul.mubr.f32.gmra.mrb[10].mxu1 %v3196_v56 }
 0x1cd   : > { %4951 = vmatprep.mubr.f32.mxu1 %v6842_v7 }
 0x1ce   : > { %5032 = vmatmul.mubr.f32.vlgmr.msra.gmra.mrb[8].mxu0 %v7350_v58 }
 0x1cf   : > { %5034 = vmatprep.mubr.f32.mxu0 %v3784_v25  ;;  %5172 = vmatpush3.bf16.msra.mxu0 %v5737_v61 }
 0x1d0   : > { %4952 = vmatmul.mubr.f32.vlgmr.msra.gmra.mrb[8].mxu1 %v6845_v43  ;;  %5174 = vmatprep.subr.bf16.mxu0 %v5731_v54 }
 0x1d1   : > { %5140 = vmatpush3.bf16.msra.mxu1 %v5743_v3  ;;  %4954 = vmatprep.mubr.f32.mxu1 %v6959_v35  ;;  %v5362_v3 = vld [vmem:[%s5669_s13 + $0x8] sm:$0xff]  ;;  %s7175_s13 = scalar_lea.hbm %s7233_s8, %s4571_s27 }
 0x1d2   : > { %5142 = vmatprep.subr.bf16.mxu1 %v5731_v54  ;;  %5035 = vmatmul.mubr.f32.gmra.mrb[10].mxu0 %v3794_v53 }
 0x1d3   : > { %5041 = vmatprep.mubr.f32.mxu0 %v6658_v34 }
 0x1d4   : > { %4955 = vmatmul.mubr.f32.gmra.mrb[10].mxu1 %v3192_v38 }
 0x1d5   : > { %4961 = vmatprep.mubr.f32.mxu1 %v6856_v32 }
 0x1d6   : > { %5042 = vmatmul.mubr.f32.vlgmr.msra.gmra.mrb[8].mxu0 %v6660_v62 }
 0x1d7   : > { %5044 = vmatprep.mubr.f32.mxu0 %v6898_v37  ;;  %5176 = vmatpush3.bf16.msra.mxu0 %v5731_v54 }
 0x1d8   : > { %4962 = vmatmul.mubr.f32.vlgmr.msra.gmra.mrb[8].mxu1 %v6861_v18 }
 0x1d9   : > { %5144 = vmatpush3.bf16.msra.mxu1 %v5731_v54  ;;  %4964 = vmatprep.mubr.f32.mxu1 %v3183_v17 }
 0x1da   : > { %5146 = vmatprep.subr.bf16.mxu1 %v5737_v61  ;;  %5045 = vmatmul.mubr.f32.gmra.mrb[10].mxu0 %v6928_v31 }
 0x1db   : > { %5051 = vmatprep.mubr.f32.mxu0 %v6658_v34 }
 0x1dc   : > { %4965 = vmatmul.mubr.f32.gmra.mrb[10].mxu1 %v3193_v45 }
 0x1dd   : > { %4971 = vmatprep.mubr.f32.mxu1 %v3164_v12 }
 0x1de   : > { %5052 = vmatmul.mubr.f32.vlgmr.msra.gmra.mrb[8].mxu0 %v6660_v62  ;;  %v5363_v62 = vld [vmem:[%s5605_s10] sm:$0xff] }
 0x1df   : > { %5054 = vmatprep.mubr.f32.mxu0 %v6898_v37  ;;  %v432_v39 = vsub.f32 %v5364_v21, %v5363_v62  ;;  %v470_v33 = vsub.f32 %v397_v36, %v5363_v62 }
 0x1e0   : > { %4972 = vmatmul.mubr.f32.vlgmr.msra.gmra.mrb[8].mxu1 %v3174_v63 }
 0x1e1   : > { %5148 = vmatpush3.bf16.msra.mxu1 %v5737_v61  ;;  %4974 = vmatprep.mubr.f32.mxu1 %v3184_v26  ;;  %v5361_v61 = vld [vmem:[%s5605_s10 + $0x8] sm:$0xff]  ;;  %v474_v53 = vmul.f32 %v5753_v20, %v470_v33  ;;  %s4563_s10 = sshll.u32 %s5590_s28, 1 }
 0x1e2   : > { %5150 = vmatprep.subr.bf16.mxu1 %v5731_v54  ;;  %5055 = vmatmul.mubr.f32.gmra.mrb[10].mxu0 %v6928_v31  ;;  %v433_v34 = vsub.f32 %v5362_v3, %v5361_v61  ;;  %v471_v52 = vsub.f32 %v398_v46, %v5361_v61  ;;  %s374_s28 = scalar_lea.vmem %s7230_s5, %s4563_s10  ;;  %s4441_s10 = sshll.u32 %s7156_s24, 4  ;;  %s7177_s10 = int_to_ptr.vmem [resolvable:$true] %s4441_s10 }
 0x1e3   : > { %v478_v8 = vmul.f32 %v474_v53, %v474_v53  ;;  %s5393_s19 = scalar_lea.vmem %s7177_s10, 16  ;;  %p5400_p11 = scmp.lt.s32.totalorder %s7177_s10, %s5398_s20 }
 0x1e4   : > { %4975 = vmatmul.mubr.f32.gmra.mrb[10].mxu1 %v3194_v2  ;;  %v437_v32 = vmul.f32 %v5763_v22, %v433_v34  ;;  %v475_v59 = vmul.f32 %v5763_v22, %v471_v52  ;;  %v476_v22 = vmul.f32 %v5748_v19, %v472_v29  ;;  %p5394_p8 = scmp.ne.s32.totalorder %s7177_s10, %s5393_s19 }
 0x1e5   : > { %4981 = vmatprep.mubr.f32.mxu1 %v6842_v7  ;;  %v482_v9 = vsel %vm444_vm0, %v478_v8, 0.0 }
 0x1e6   : > { %v441_v18 = vmul.f32 %v437_v32, %v437_v32  ;;  %v479_v49 = vmul.f32 %v475_v59, %v475_v59  ;;  %v480_v5 = vmul.f32 %v476_v22, %v476_v22  ;;  %p5395_p9 = pnand %p5394_p8, %p5570_p0 }
 0x1e8   : > { %4982 = vmatmul.mubr.f32.vlgmr.msra.gmra.mrb[8].mxu1 %v6845_v43  ;;  %v448_v63 = vsel %vm444_vm0, %v441_v18, 0.0  ;;  %v485_v27 = vsel %vm444_vm0, %v479_v49, 0.0  ;;  %v488_v26 = vsel %vm444_vm0, %v480_v5, 0.0  ;;  %p5396_p10 = pneg %p5395_p9 }
 0x1e9   : > { %5152 = vmatpush3.bf16.msra.mxu1 %v5731_v54  ;;  %4984 = vmatprep.mubr.f32.mxu1 %v6959_v35  ;;  %v436_v54 = vmul.f32 %v5753_v20, %v432_v39  ;;  %v442_v20 = vmul.f32 %v438_v6, %v438_v6 }
 0x1ea   : > { %449 = vadd.xlane.f32.xlu1 %v448_v63 }
 0x1eb   : > { %v440_v12 = vmul.f32 %v436_v54, %v436_v54  ;;  %v451_v17 = vsel %vm444_vm0, %v442_v20, 0.0 }
 0x1ec   : > { %4985 = vmatmul.mubr.f32.gmra.mrb[10].mxu1 %v3192_v38 }
 0x1ed   : > { %4991 = vmatprep.mubr.f32.mxu1 %v6842_v7  ;;  %v445_v7 = vsel %vm444_vm0, %v440_v12, 0.0 }
 0x1ee   : > { %446 = vadd.xlane.f32.xlu0 %v445_v7  ;;  %486 = vadd.xlane.f32.xlu1 %v485_v27 }
 0x1f0   : > { %4992 = vmatmul.mubr.f32.vlgmr.msra.gmra.mrb[8].mxu1 %v6845_v43 }
 0x1f1   : > { %4994 = vmatprep.mubr.f32.mxu1 %v6959_v35  ;;  %v435_v35 = vsub.f32 %v5368_v10, %v5367_v40 }
 0x1f2   : > { %483 = vadd.xlane.f32.xlu0 %v482_v9  ;;  %489 = vadd.xlane.f32.xlu1 %v488_v26 }
 0x1f3   : > { %v439_v41 = vmul.f32 %v7351_v4, %v435_v35 }
 0x1f4   : > { %4995 = vmatmul.mubr.f32.gmra.mrb[10].mxu1 %v3192_v38 }
 0x1f5   : > { %v443_v13 = vmul.f32 %v439_v41, %v439_v41 }
 0x1f6   : > { %452 = vadd.xlane.f32.xlu0 %v451_v17  ;;  %492 = vadd.xlane.f32.xlu1 %v491_v47 }
 0x1f7   : > { %v454_v19 = vsel %vm444_vm0, %v443_v13, 0.0  ;;  %vm4374_vm0 = vcmask 43008  }
 0x1fa   : > { %455 = vadd.xlane.f32.xlu0 %v454_v19 }
 0x207   : > { %v4813_v43 = vpop.f32.mrb[0].mxu0 }
 0x208   : > { %v1861_v37 = vpop.f32.mrb[1].mxu0 }
 0x20b   : > { %v4783_v0 = vpop.f32.mrb[0].mxu1  ;;  %v4816_v25 = vpop.f32.mrb[2].mxu0 }
 0x20c   : > { %v7022_v31 = vadd.f32 %v4813_v43, %v4783_v0  ;;  %v1573_v15 = vpop.f32.mrb[1].mxu1  ;;  %v1873_v24 = vpop.f32.mrb[3].mxu0 }
 0x20d   : > { %v7024_v57 = vadd.f32 %v1861_v37, %v1573_v15 }
 0x20e   : > { %v7052_v38 = vmul.f32 %v7022_v31, %v7022_v31  ;;  %v4332_v39 = vmul.f32 2.0, %v7022_v31 }
 0x20f   : > { %v4786_v14 = vpop.f32.mrb[2].mxu1  ;;  %v7058_v2 = vmul.f32 %v7024_v57, %v7024_v57  ;;  %v4331_v32 = vmul.f32 2.0, %v7024_v57 }
 0x210   : > { %v7026_v44 = vadd.f32 %v4816_v25, %v4786_v14  ;;  %v1587_v51 = vpop.f32.mrb[3].mxu1 }
 0x211   : > { %v7028_v50 = vadd.f32 %v1873_v24, %v1587_v51 }
 0x212   : > { %v7068_v58 = vmul.f32 %v7026_v44, %v7026_v44  ;;  %v4334_v25 = vmul.f32 2.0, %v7026_v44 }
 0x213   : > { %v7074_v3 = vmul.f32 %v7028_v50, %v7028_v50  ;;  %v4333_v24 = vmul.f32 2.0, %v7028_v50 }
 0x266   : > { %v7054_v45 = vpop.f32.mrb[4].mxu0 }
 0x267   : > { %v4288_v30 = vsub.f32 %v7054_v45, %v7052_v38  ;;  %v7062_v56 = vpop.f32.mrb[5].mxu0 }
 0x268   : > { %v4287_v55 = vsub.f32 %v7062_v56, %v7058_v2 }
 0x26a   : > { %v7070_v61 = vpop.f32.mrb[6].mxu0 }
 0x26b   : > { %v4290_v34 = vsub.f32 %v7070_v61, %v7068_v58  ;;  %v7078_v62 = vpop.f32.mrb[7].mxu0 }
 0x26c   : > { %v4289_v21 = vsub.f32 %v7078_v62, %v7074_v3 }
 0x274   : > { %v4873_v54 = vpop.f32.mrb[4].mxu1 }
 0x275   : > { %v4336_v18 = vmul.f32 %v4873_v54, %v4332_v39  ;;  %v2461_v12 = vpop.f32.mrb[5].mxu1  ;;  %v7085_v63 = vmul.f32 %v7022_v31, %v4873_v54  ;;  %v4292_v7 = vmul.f32 %v4873_v54, %v4873_v54 }
 0x276   : > { %v4335_v43 = vmul.f32 %v4331_v32, %v2461_v12  ;;  %v7088_v37 = vmul.f32 %v7024_v57, %v2461_v12  ;;  %v4291_v0 = vmul.f32 %v2461_v12, %v2461_v12 }
 0x277   : > { %v4344_v15 = vadd.f32 %v4292_v7, %v7052_v38  ;;  %v4340_v60 = vadd.f32 0.0001, %v4336_v18 }
 0x278   : > { %v4876_v14 = vpop.f32.mrb[6].mxu1  ;;  %v4343_v51 = vadd.f32 %v4291_v0, %v7058_v2  ;;  %v4339_v48 = vadd.f32 0.0001, %v4335_v43 }
 0x279   : > { %v4338_v46 = vmul.f32 %v4876_v14, %v4334_v25  ;;  %v2473_v36 = vpop.f32.mrb[7].mxu1  ;;  %v4348_v52 = vadd.f32 0.0001, %v4344_v15  ;;  %v7095_v31 = vmul.f32 %v7026_v44, %v4876_v14  ;;  %v4294_v33 = vmul.f32 %v4876_v14, %v4876_v14 }
 0x27a   : > { %v4337_v59 = vmul.f32 %v4333_v24, %v2473_v36  ;;  %v4347_v57 = vadd.f32 0.0001, %v4343_v51  ;;  %v7098_v53 = vmul.f32 %v7028_v50, %v2473_v36  ;;  %v4293_v49 = vmul.f32 %v2473_v36, %v2473_v36  ;;  %v7353_v24 = vld [vmem:[#allocation9_spill] sm:$0xff] }
 0x27b   : > { %5339 = vrcp.f32 %v4348_v52  ;;  %v4346_v8 = vadd.f32 %v4294_v33, %v7068_v58  ;;  %v4342_v50 = vadd.f32 0.0001, %v4338_v46  ;;  %v428_v58 = vstv %s7123_s11 }
 0x27c   : > { %5341 = vrcp.f32 %v4347_v57  ;;  %v4345_v27 = vadd.f32 %v4293_v49, %v7074_v3  ;;  %v4341_v20 = vadd.f32 0.0001, %v4337_v59  ;;  %v7354_v52 = vmov 0.0  }
 0x27d   : > { %v4350_v9 = vadd.f32 0.0001, %v4346_v8  ;;  %388 = vst.msk [vmem:[%s7156_s24] sm:$0x1] %vm387_vm2, %v7354_v52 }
 0x27e   : > { %v4349_v42 = vadd.f32 0.0001, %v4345_v27 }
 0x27f   : > { %5343 = vrcp.f32 %v4350_v9 }
 0x280   : > { %5345 = vrcp.f32 %v4349_v42 }
 0x285   : > { %v5340_v44 = vpop.eup %5339 }
 0x286   : > { %v5342_v1 = vpop.eup %5341  ;;  %v7102_v29 = vmul.f32 %v5340_v44, %v4340_v60 }
 0x287   : > { %v7104_v6 = vmul.f32 %v5342_v1, %v4339_v48 }
 0x289   : > { %v5344_v22 = vpop.eup %5343 }
 0x28a   : > { %v5346_v16 = vpop.eup %5345  ;;  %v7106_v40 = vmul.f32 %v5344_v22, %v4342_v50 }
 0x28b   : > { %v7108_v10 = vmul.f32 %v5346_v16, %v4341_v20 }
 0x2b1   : > { %v5053_v35 = vpop.f32.mrb[8].mxu0 }
 0x2b2   : > { %v4304_v5 = vsub.f32 %v5053_v35, %v7085_v63  ;;  %v4261_v11 = vpop.f32.mrb[9].mxu0 }
 0x2b3   : > { %v4303_v17 = vsub.f32 %v4261_v11, %v7088_v37  ;;  %v7352_v37 = vlaneseq }
 0x2b4   : > { %v4308_v25 = vmul.f32 2.0, %v4304_v5 }
 0x2b5   : > { %v5056_v4 = vpop.f32.mrb[10].mxu0 }
 0x2b6   : > { %v4306_v41 = vsub.f32 %v5056_v4, %v7095_v31  ;;  %v4273_v26 = vpop.f32.mrb[11].mxu0  ;;  %v4312_v3 = vadd.f32 0.0009, %v4308_v25  ;;  %v529_v25 = vstv %s391_s30 }
 0x2b7   : > { %v4305_v28 = vsub.f32 %v4273_v26, %v7098_v53 }
 0x2b8   : > { %v4310_v62 = vmul.f32 2.0, %v4306_v41 }
 0x2b9   : > { %v4309_v46 = vmul.f32 2.0, %v4305_v28 }
 0x2bb   : > { %v4313_v42 = vadd.f32 0.0009, %v4309_v46 }
 0x2c3   : > { %v4993_v13 = vpop.f32.mrb[8].mxu1 }
 0x2c4   : > { %v4296_v23 = vsub.f32 %v4993_v13, %v4292_v7  ;;  %v3661_v19 = vpop.f32.mrb[9].mxu1 }
 0x2c5   : > { %v4295_v47 = vsub.f32 %v3661_v19, %v4291_v0  ;;  %v7138_v0 = vand.u32 127, %v7352_v37 }
 0x2c6   : > { %v4316_v39 = vadd.f32 %v4296_v23, %v4288_v30  ;;  %v518_v30 = vld [vmem:[%s380_s0] sm:$0xf]  ;;  %s4429_s0 = scalar_lea.sflag [#allocation6], %s347_s22 }
 0x2c7   : > { %v4315_v32 = vadd.f32 %v4295_v47, %v4287_v55  ;;  %v4996_v54 = vpop.f32.mrb[10].mxu1  ;;  %v504_v55 = vld [vmem:[%s374_s28] sm:$0x3]  ;;  %v520_v61 = vrot.slane %v518_v30, 2  ;;  %vm425_vm12 = vcmp.lt.s32.totalorder %v7138_v0, %v7353_v24  ;;  %vm429_vm13 = vcmp.lt.s32.totalorder %v7138_v0, %v428_v58  ;;  %s5399_s28 = scalar_lea.vmem %s5398_s20, 32 }
 0x2c8   : > { %v4320_v18 = vadd.f32 0.0009, %v4316_v39  ;;  %v4298_v12 = vsub.f32 %v4996_v54, %v4294_v33  ;;  %v3673_v63 = vpop.f32.mrb[11].mxu1  ;;  %v506_v15 = vrot.slane %v504_v55, 1  ;;  %v4569_v31 = vsel %vm425_vm12, 1.0, %v7354_v52  ;;  %p5401_p12 = scmp.lt.s32.totalorder %s5399_s28, %s5393_s19 }
 0x2c9   : > { %v4319_v43 = vadd.f32 0.0009, %v4315_v32  ;;  %v4297_v7 = vsub.f32 %v3673_v63, %v4293_v49  ;;  %v4570_v57 = vsel %vm429_vm13, 1.0, %v7354_v52  ;;  %v4314_v49 = vadd.f32 0.0009, %v4310_v62 }
 0x2ca   : > { %5347 = vrcp.f32 %v4320_v18  ;;  %v4318_v38 = vadd.f32 %v4298_v12, %v4290_v34  ;;  %v4307_v34 = vmul.f32 2.0, %v4303_v17  ;;  %v508_v36 = vsub.f32 %v504_v55, %v506_v15  ;;  %p5402_p13 = por %p5401_p12, %p5400_p11 }
 0x2cb   : > { %5349 = vrcp.f32 %v4319_v43  ;;  %v4317_v45 = vadd.f32 %v4297_v7, %v4289_v21  ;;  %v522_v21 = vsub.f32 %v518_v30, %v520_v61  ;;  %v467_v30 = vstv %s466_s9 }
 0x2cc   : > { %v4322_v2 = vadd.f32 0.0009, %v4318_v38  ;;  %v4311_v51 = vadd.f32 0.0009, %v4307_v34  ;;  %v509_v44 = vmul.f32 %v4570_v57, %v508_v36  ;;  %vm4405_vm5 = vcmp.eq.s32.totalorder %v7138_v0, 0  ;;  %p5403_p1 = pnand %p5402_p13, %p5396_p10 }
 0x2cd   : > { %v4321_v56 = vadd.f32 0.0009, %v4317_v45  ;;  %v523_v27 = vmul.f32 %v4569_v31, %v522_v21  ;;  %vm4407_vm6 = vcmp.eq.s32.totalorder %v7138_v0, 1  ;;  %vm4410_vm7 = vcmp.eq.s32.totalorder %v7138_v0, 2 }
 0x2ce   : > { %5351 = vrcp.f32 %v4322_v2  ;;  %v510_v5 = vmul.f32 %v509_v44, %v509_v44  ;;  %vm4413_vm8 = vcmp.eq.s32.totalorder %v7138_v0, 3  ;;  %vm4416_vm9 = vcmp.eq.s32.totalorder %v7138_v0, 4 }
 0x2cf   : > { %5353 = vrcp.f32 %v4321_v56  ;;  %v524_v16 = vmul.f32 %v523_v27, %v523_v27  ;;  %v515_v56 = vstv %s392_s29  ;;  %vm4422_vm10 = vcmp.eq.s32.totalorder %v7138_v0, 5 }
 0x2d0   : > { %v512_v4 = vsel %vm387_vm2, %v510_v5, 0.0  ;;  %5355 = vrcp.f32 %v467_v30 }
 0x2d1   : > { %v526_v17 = vsel %vm525_vm1, %v524_v16, 0.0  ;;  %5357 = vrcp.f32 %v515_v56 }
 0x2d2   : > { %5359 = vrcp.f32 %v529_v25 }
 0x2d4   : > { %v5348_v14 = vpop.eup %5347 }
 0x2d5   : > { %v5350_v33 = vpop.eup %5349  ;;  %v4328_v59 = vmul.f32 %v5348_v14, %v4312_v3 }
 0x2d6   : > { %v4327_v53 = vmul.f32 %v5350_v33, %v4311_v51 }
 0x2d7   : > { %v4360_v8 = vmul.f32 %v7102_v29, %v4328_v59 }
 0x2d8   : > { %v5352_v9 = vpop.eup %5351  ;;  %v4359_v60 = vmul.f32 %v7104_v6, %v4327_v53 }
 0x2d9   : > { %v5354_v48 = vpop.eup %5353  ;;  %v4368_v1 = vsel %vm4367_vm14, %v4360_v8, 0.0  ;;  %v4330_v50 = vmul.f32 %v5352_v9, %v4314_v49 }
 0x2da   : > { %4369 = vadd.xlane.f32.xlu1 %v4368_v1  ;;  %v4364_v22 = vsel %vm4363_vm15, %v4359_v60, 0.0  ;;  %v4329_v20 = vmul.f32 %v5354_v48, %v4313_v42  ;;  %v5356_v36 = vpop.eup %5355 }
 0x2db   : > { %4365 = vadd.xlane.f32.xlu0 %v4364_v22  ;;  %v4362_v29 = vmul.f32 %v7106_v40, %v4330_v50  ;;  %v450_v40 = vpop.xlane.xlu1 %449  ;;  %v5358_v31 = vpop.eup %5357 }
 0x2dc   : > { %v4361_v35 = vmul.f32 %v7108_v10, %v4329_v20  ;;  %v447_v10 = vpop.xlane.xlu0 %446  ;;  %v5360_v44 = vpop.eup %5359 }
 0x2dd   : > { %v4375_v6 = vsel %vm4374_vm0, %v4362_v29, 0.0  ;;  %v457_v23 = vadd.f32 %v450_v40, %v447_v10 }
 0x2de   : > { %4376 = vadd.xlane.f32.xlu1 %v4375_v6  ;;  %v4371_v11 = vsel %vm4367_vm14, %v4361_v35, 0.0 }
 0x2df   : > { %4372 = vadd.xlane.f32.xlu0 %v4371_v11  ;;  %v487_v41 = vpop.xlane.xlu1 %486 }
 0x2e0   : > { %v484_v26 = vpop.xlane.xlu0 %483 }
 0x2e1   : > { %v494_v19 = vadd.f32 %v487_v41, %v484_v26 }
 0x2e2   : > { %527 = vadd.xlane.f32.xlu1 %v526_v17 }
 0x2e3   : > { %513 = vadd.xlane.f32.xlu0 %v512_v4  ;;  %v490_v28 = vpop.xlane.xlu1 %489 }
 0x2e4   : > { %v453_v13 = vpop.xlane.xlu0 %452  ;;  %v495_v47 = vadd.f32 %v494_v19, %v490_v28  ;;  %v4425_v19 = vld [vmem:[%s7156_s24] sm:$0x1] }
 0x2e5   : > { %v458_v39 = vadd.f32 %v457_v23, %v453_v13 }
 0x2e7   : > { %v493_v32 = vpop.xlane.xlu1 %492 }
 0x2e8   : > { %v456_v54 = vpop.xlane.xlu0 %455  ;;  %v496_v18 = vadd.f32 %v495_v47, %v493_v32 }
 0x2e9   : > { %v459_v12 = vadd.f32 %v458_v39, %v456_v54 }
 0x2ea   : > { %v497_v63 = vrot.slane %v496_v18, 4 }
 0x2eb   : > { %v460_v43 = vrot.slane %v459_v12, 4 }
 0x2ec   : > { %v498_v7 = vadd.f32 %v497_v63, %v496_v18 }
 0x2ed   : > { %v461_v38 = vadd.f32 %v460_v43, %v459_v12 }
 0x2ee   : > { %v499_v45 = vrot.slane %v498_v7, 2 }
 0x2ef   : > { %v462_v2 = vrot.slane %v461_v38, 2 }
 0x2f0   : > { %v500_v55 = vadd.f32 %v499_v45, %v498_v7 }
 0x2f1   : > { %v463_v37 = vadd.f32 %v462_v2, %v461_v38 }
 0x2f2   : > { %v501_v61 = vrot.slane %v500_v55, 1 }
 0x2f3   : > { %v464_v34 = vrot.slane %v463_v37, 1 }
 0x2f4   : > { %v502_v21 = vadd.f32 %v501_v61, %v500_v55 }
 0x2f5   : > { %v465_v14 = vadd.f32 %v464_v34, %v463_v37 }
 0x2f6   : > { %v503_v27 = vmul.f32 %v5356_v36, %v502_v21 }
 0x2f7   : > { %v469_v8 = vmul.f32 %v5356_v36, %v465_v14 }
 0x2f8   : > { %v4408_v22 = vsel %vm4407_vm6, %v503_v27, 0.0 }
 0x2f9   : > { %v4406_v50 = vsel %vm4405_vm5, %v469_v8, 0.0 }
 0x2fa   : > { %v4409_v35 = vadd.f32 %v4408_v22, %v4406_v50 }
 0x367   : > { %v4370_v58 = vpop.xlane.xlu1 %4369 }
 0x368   : > { %v4366_v15 = vpop.xlane.xlu0 %4365  ;;  %v4384_v24 = vrot.slane %v4370_v58, 5 }
 0x369   : > { %v4383_v3 = vrot.slane %v4366_v15, 5 }
 0x36b   : > { %v4377_v62 = vpop.xlane.xlu1 %4376  ;;  %v4385_v33 = vsel %vm4382_vm3, %v4383_v3, %v4384_v24 }
 0x36c   : > { %v4388_v51 = vrot.slane %v4377_v62, 5  ;;  %v4373_v46 = vpop.xlane.xlu0 %4372 }
 0x36d   : > { %v4386_v52 = vrot.slane %v4373_v46, 5 }
 0x36f   : > { %v4387_v59 = vsel %vm4382_vm3, %v4384_v24, %v4386_v52  ;;  %v4389_v57 = vsel %vm4382_vm3, %v4386_v52, %v4388_v51  ;;  %v528_v48 = vpop.xlane.xlu1 %527 }
 0x370   : > { %v4393_v53 = vadd.f32 %v4387_v59, %v4385_v33  ;;  %v4395_v49 = vsel %vm4394_vm4, %v4389_v57, 0.0  ;;  %v514_v9 = vpop.xlane.xlu0 %513  ;;  %v531_v16 = vmul.f32 %v5360_v44, %v528_v48 }
 0x371   : > { %v517_v60 = vmul.f32 %v5358_v31, %v514_v9 }
 0x372   : > { %v4396_v42 = vadd.f32 %v4395_v49, %v4393_v53  ;;  %v4414_v17 = vsel %vm4413_vm8, %v531_v16, 0.0  ;;  %v4417_v4 = vsel %vm4416_vm9, %v531_v16, 0.0 }
 0x373   : > { %v4411_v29 = vsel %vm4410_vm7, %v517_v60, 0.0  ;;  %v4419_v41 = vrot.slane %v4417_v4, 1 }
 0x374   : > { %v4397_v1 = vrot.slane %v4396_v42, 4  ;;  %v4412_v6 = vadd.f32 %v4411_v29, %v4409_v35 }
 0x376   : > { %v4398_v20 = vadd.f32 %v4397_v1, %v4396_v42  ;;  %v4415_v10 = vadd.f32 %v4414_v17, %v4412_v6 }
 0x378   : > { %v4399_v5 = vrot.slane %v4398_v20, 2  ;;  %v4421_v13 = vadd.f32 %v4419_v41, %v4415_v10 }
 0x37a   : > { %v4400_v11 = vadd.f32 %v4399_v5, %v4398_v20 }
 0x37c   : > { %v4401_v40 = vrot.slane %v4400_v11, 1 }
 0x37e   : > { %v4402_v26 = vadd.f32 %v4401_v40, %v4400_v11 }
 0x380   : > { %v4404_v28 = vmul.f32 0.007575758, %v4402_v26 }
 0x382   : > { %v4423_v23 = vsel %vm4422_vm10, %v4404_v28, 0.0 }
 0x383   : > { %v4424_v47 = vadd.f32 %v4423_v23, %v4421_v13 }
 0x385   : > { %v4426_v39 = vadd.f32 %v4425_v19, %v4424_v47 }
 0x387   : > { %4427 = vst.msk [vmem:[%s7156_s24] sm:$0x1] %vm387_vm2, %v4426_v39 }
 0x388   : > { %5406 = shalt.err (!%p5403_p1)
}
 0x389   : > { %s5407_s22 = scalar_lea.hbm %s7175_s13, 16  ;;  %s5411_s9 = scalar_lea.hbm %s7233_s8, 32 }
 0x38a   : > { %p5408_p2 = scmp.ne.s32.totalorder %s7175_s13, %s5407_s22  ;;  %p5412_p6 = scmp.lt.u32.totalorder %s7175_s13, %s7233_s8 }
 0x38b   : > { %p5413_p7 = scmp.lt.u32.totalorder %s5411_s9, %s5407_s22  ;;  %p5415_p9 = scmp.lt.u32.totalorder %s5407_s22, %s7175_s13 }
 0x38c   : > { %p5409_p3 = pnand %p5408_p2, %p5570_p0 }
 0x38d   : > { %p5414_p8 = por %p5413_p7, %p5412_p6 }
 0x38e   : > { %p5410_p5 = pneg %p5409_p3 }
 0x38f   : > { %p5416_p10 = por %p5415_p9, %p5414_p8 }
 0x391   : > { %p5417_p11 = pnand %p5416_p10, %p5410_p5 }
 0x393   : > { %5420 = shalt.err (!%p5417_p11)
}
 0x394   : > { %5277 = dma.vmem_to_hbm [thread:$0]  (%p5570_p0), %s7177_s10, 16, %s7175_s13, %s4429_s0  }
 0x395 PF: > { %p5283_p12 = scmp.ge.s32.totalorder %s5473_s18, 2  ;;  %s4453_s11 = sand.u32 1, %s5453_s1  }
 0x396   : > { %s4454_s12 = scalar_lea.sflag [#allocation6], %s4453_s11 }
 0x397   : > { %p5280_p13 = pnand %p5283_p12, %p5577_p4 }
 0x399   : > { %5448 = dma.done.wait (!%p5280_p13), %s4454_s12, 16  }
 0x39a   : > { %5450 = vsyncadd (!%p5280_p13), %s4454_s12, 4294967280  ;;  %s31_s18 = sadd.s32 1, %s5473_s18   ;;  %s7355_s1 = smov %s5457_s14 }
 0x39b   : > { %p28_p1 = scmp.ge.s32.totalorder %s31_s18, 4   ;;  %s7356_s14 = smov %s5461_s15 }
 0x39c   : > { %s7357_s15 = smov %s5583_s26  ;;  %s7358_s16 = smov %s5469_s17 }
 0x39d   : > { %s7359_s17 = smov %s7361_s21  ;;  %30 = sbr.rel (!%p28_p1) target bundleno = 29 (0x1d), region = 95 }
 0x3a4   :  { %4458 = vsyncpa [#allocation6], 1 }
 0x3a5   :  { %4460 = vsyncpa [#allocation6 + $0x1], 1 }

</bundles_post_ra>
